<compile_context>
chip_gen: v5e
topology: v5e:2x2
jax: 0.10.0
libtpu: 0.0.40
codegen_flags: <defaults>
</compile_context>

<pallas_src>
import jax
import jax.numpy as jnp
from jax import lax
from jax.experimental import pallas as pl
from jax.experimental.pallas import tpu as pltpu

DILATIONS = (1, 2, 4, 8, 16)
NB = len(DILATIONS)


def _round_up(v, m):
    return (v + m - 1) // m * m


def _default_num_steps(B):
    """2 grid steps on v7x (2 TensorCores/chip), 1 otherwise (grid is a serial loop)."""
    if B < 2 or B % 2 != 0:
        return 1
    try:
        kind = jax.devices()[0].device_kind.lower()
    except Exception:
        kind = ""
    return 2 if "v7" in kind else 1


def _pack_params(params, L):
    """Host-side packing of the branch/tap weights into wide block matrices."""
    C = params["w_in"].shape[1]
    O = params["w_out"].shape[1]

    # Distinct live shifts for conv1 (dead taps, |shift| >= L, are excluded entirely).
    shifts1 = []
    for d in DILATIONS:
        for t in range(3):
            s = (t - 1) * d
            if abs(s) < L and s not in shifts1:
                shifts1.append(s)

    wc1 = params["wc1"]                                      # (NB, 3, C, C)
    wcat1 = jnp.zeros((len(shifts1) * C, NB * C), jnp.float32)
    for br, d in enumerate(DILATIONS):
        for t in range(3):
            s = (t - 1) * d
            if abs(s) >= L:
                continue
            si = shifts1.index(s)
            wcat1 = wcat1.at[si * C:(si + 1) * C, br * C:(br + 1) * C].set(wc1[br, t])

    # conv2: shift-0 taps live for every branch; +/-d taps only where live.
    extra2 = []
    for br, d in enumerate(DILATIONS):
        for t in (0, 2):
            s = (t - 1) * d
            if abs(s) < L:
                extra2.append((br, s))

    wc2 = params["wc2"]                                      # (NB, 3, C, C)
    wcat2 = jnp.zeros((NB * C + len(extra2) * C, NB * C), jnp.float32)
    for br in range(NB):                                     # shift-0 block-diagonal
        wcat2 = wcat2.at[br * C:(br + 1) * C, br * C:(br + 1) * C].set(wc2[br, 1])
    for k, (br, s) in enumerate(extra2):
        t = s // DILATIONS[br] + 1
        r0 = NB * C + k * C
        wcat2 = wcat2.at[r0:r0 + C, br * C:(br + 1) * C].set(wc2[br, t])

    packed = dict(
        w_in=params["w_in"].astype(jnp.bfloat16),            # (F, C)
        b_in=params["b_in"].reshape(1, C).astype(jnp.float32),
        wcat1=wcat1.astype(jnp.bfloat16),                    # (len(shifts1)*C, NB*C)
        bcat1=params["bc1"].reshape(1, NB * C).astype(jnp.float32),
        wcat2=wcat2.astype(jnp.bfloat16),                    # (NB*C + len(extra2)*C, NB*C)
        bcat2=params["bc2"].reshape(1, NB * C).astype(jnp.float32),
        w_out=params["w_out"].astype(jnp.bfloat16),          # (NB*C, O)
        b_out=params["b_out"].reshape(1, O).astype(jnp.float32),
    )
    return packed, shifts1, extra2


def protein_seq_forward(x, params, b_tile=None):
    """x: (B, L, feaSize) f32.  params: f32, natural layout (see __main__)."""
    B, L, F = x.shape
    C = params["w_in"].shape[1]
    O = params["w_out"].shape[1]

    packed, shifts1, extra2 = _pack_params(params, L)

    if b_tile is None:
        b_tile = B // _default_num_steps(B)
    assert b_tile >= 1 and B % b_tile == 0, (B, b_tile)
    n_steps = B // b_tile

    # Padding sized by the largest LIVE shift (8 for L=16), not max(DILATIONS).
    PAD = max([abs(s) for s in shifts1 if s != 0], default=0)
    STRIDE = _round_up(L + PAD, 8)          # per-sequence row stride (8-aligned)
    M = b_tile * STRIDE                     # rows the convs are computed over
    ROWS = _round_up(M + 2 * PAD, 8)        # scratch rows (leading/trailing pad)

    # Branches whose +/-d conv2 taps need a shifted (scratch-mediated) read.
    shift_brs = sorted({br for br, _ in extra2})
    plane_of = {br: i for i, br in enumerate(shift_brs)}
    n_planes = max(1, len(shift_brs))

    # Pad-row bands (the only scratch rows that must read as zero; valid rows are
    # fully overwritten every step).
    bands = []
    if PAD > 0:
        bands.append((0, PAD))
    for b in range(b_tile):
        lo = PAD + b * STRIDE + L
        hi = PAD + (b + 1) * STRIDE if b < b_tile - 1 else ROWS
        if lo < hi:
            bands.append((lo, hi))

    # Validity mask (1 on valid rows, 0 on pad rows), static -> built host-side.
    fmask = (jnp.tile(jnp.arange(STRIDE) < L, b_tile)
             .astype(jnp.float32).reshape(M, 1))

    def kernel(x_ref, fmask_ref, w_in_ref, b_in_ref, wcat1_ref, bcat1_ref,
               wcat2_ref, bcat2_ref, w_out_ref, b_out_ref, out_ref,
               h_scr, a_scr):
        # Zero only the pad bands. (Not a program_id==0 one-time init: on v7x
        # megacore each TensorCore has its own private scratch.)
        for lo, hi in bands:
            h_scr[lo:hi, :] = jnp.zeros((hi - lo, C), jnp.float32)
            a_scr[:, lo:hi, :] = jnp.zeros((n_planes, hi - lo, C), jnp.float32)

        # ---- input linear over all b_tile*L rows in ONE matmul (x already bf16) ----
        x2 = x_ref[...].reshape(b_tile * L, F)
        h = jnp.dot(x2, w_in_ref[...],
                    preferred_element_type=jnp.float32) + b_in_ref[...]   # (b_tile*L, C)
        for b in range(b_tile):
            base = PAD + b * STRIDE
            h_scr[base:base + L, :] = h[b * L:(b + 1) * L, :]

        msk = fmask_ref[...]                                              # (M, 1)

        # ---- conv1: all 5 branches / all live taps in ONE wide matmul ----
        x1 = jnp.concatenate(
            [h_scr[PAD + s:PAD + s + M, :] for s in shifts1],
            axis=1).astype(jnp.bfloat16)                                  # (M, 9C)
        a_cat = jnp.dot(x1, wcat1_ref[...], preferred_element_type=jnp.float32)
        a_cat = jnp.maximum(a_cat + bcat1_ref[...], 0.0) * msk            # (M, NB*C)

        # Stage only the branch blocks whose +/-d taps need shifted reads.
        for br, plane in plane_of.items():
            a_scr[plane, PAD:PAD + M, :] = a_cat[:, br * C:(br + 1) * C]

        # ---- conv2: ONE wide matmul (shift-0 taps straight from in-vreg a_cat) ----
        parts = [a_cat]
        for br, s in extra2:
            parts.append(a_scr[plane_of[br], PAD + s:PAD + s + M, :])
        x2b = jnp.concatenate(parts, axis=1).astype(jnp.bfloat16)         # (M, 13C)
        b_cat = jnp.dot(x2b, wcat2_ref[...], preferred_element_type=jnp.float32)
        b_cat = jnp.maximum(b_cat + bcat2_ref[...], 0.0) * msk            # (M, NB*C)
        # TODO(synk): nn.Dropout is identity at inference; not modeled.

        # Global max over the length axis. Pad rows are exactly 0 and the pooled
        # values are post-ReLU (>= 0), so zeros never win unless the true max is 0.
        pooled = jnp.max(b_cat.reshape(b_tile, STRIDE, NB * C), axis=1)   # (b_tile, NB*C)

        # ---- output head: single (b_tile, 5C) @ (5C, O) matmul ----
        out = jnp.dot(pooled.astype(jnp.bfloat16), w_out_ref[...],
                      preferred_element_type=jnp.float32) + b_out_ref[...]
        out_ref[...] = jnp.maximum(out, 0.0)[None]

    def full_spec(arr):
        nd = arr.ndim
        return pl.BlockSpec(arr.shape, lambda i, _nd=nd: (0,) * _nd)

    out = pl.pallas_call(
        kernel,
        out_shape=jax.ShapeDtypeStruct((n_steps, b_tile, O), jnp.float32),
        grid=(n_steps,),
        in_specs=[
            pl.BlockSpec((b_tile, L, F), lambda i: (i, 0, 0)),   # x: b_tile seqs / step
            full_spec(fmask),
            full_spec(packed["w_in"]), full_spec(packed["b_in"]),
            full_spec(packed["wcat1"]), full_spec(packed["bcat1"]),
            full_spec(packed["wcat2"]), full_spec(packed["bcat2"]),
            full_spec(packed["w_out"]), full_spec(packed["b_out"]),
        ],
        out_specs=pl.BlockSpec((1, b_tile, O), lambda i: (i, 0, 0)),
        scratch_shapes=[pltpu.VMEM((ROWS, C), jnp.float32),              # padded h
                        pltpu.VMEM((n_planes, ROWS, C), jnp.float32)],   # padded conv1 blocks
        compiler_params=pltpu.CompilerParams(
            dimension_semantics=("parallel",)),
    )(x.astype(jnp.bfloat16), fmask,
      packed["w_in"], packed["b_in"], packed["wcat1"], packed["bcat1"],
      packed["wcat2"], packed["bcat2"], packed["w_out"], packed["b_out"])
    return out.reshape(B, O)


def ref_forward(x, params):
    """Pure-JAX f32 reference (same math as the PyTorch module, channels-last)."""
    h = x @ params["w_in"] + params["b_in"]                        # (B, L, C)
    L = h.shape[1]
    pooled = []
    for br, d in enumerate(DILATIONS):
        def conv(u, w, bias):
            up = jnp.pad(u, ((0, 0), (d, d), (0, 0)))
            acc = 0.0
            for t in range(3):
                acc = acc + jnp.einsum("blc,cd->bld",
                                       up[:, t * d:t * d + L, :], w[t])
            return acc + bias
        a = jax.nn.relu(conv(h, params["wc1"][br], params["bc1"][br]))
        b = jax.nn.relu(conv(a, params["wc2"][br], params["bc2"][br]))
        pooled.append(jnp.max(b, axis=1))                          # (B, C)
    cat = jnp.concatenate(pooled, axis=1)                          # (B, NB*C)
    return jax.nn.relu(cat @ params["w_out"] + params["b_out"])


if __name__ == "__main__":
    # Small shapes consistent with the module: feaSize=32, filterSize=32,
    # outputSize=16, seq len L=16, batch B=4, 5 dilation branches.
    B, L, F, C, O = 4, 16, 32, 32, 16

    key = jax.random.PRNGKey(0)
    ks = jax.random.split(key, 9)
    # Conv weights stored as (branch, tap, C_in, C_out), i.e. the transpose of
    # PyTorch's (C_out, C_in, K) slice per tap.
    params = {
        "w_in":  jax.random.normal(ks[0], (F, C), jnp.float32) * 0.1,
        "b_in":  jax.random.normal(ks[1], (1, C), jnp.float32) * 0.1,
        "wc1":   jax.random.normal(ks[2], (NB, 3, C, C), jnp.float32) * 0.1,
        "bc1":   jax.random.normal(ks[3], (NB, 1, C), jnp.float32) * 0.1,
        "wc2":   jax.random.normal(ks[4], (NB, 3, C, C), jnp.float32) * 0.1,
        "bc2":   jax.random.normal(ks[5], (NB, 1, C), jnp.float32) * 0.1,
        "w_out": jax.random.normal(ks[6], (NB * C, O), jnp.float32) * 0.1,
        "b_out": jax.random.normal(ks[7], (1, O), jnp.float32) * 0.1,
    }
    x = jax.random.normal(ks[8], (B, L, F), jnp.float32)

    out = jax.block_until_ready(protein_seq_forward(x, params))
    ref = ref_forward(x, params)

    assert out.shape == (B, O), out.shape
    # bf16 MXU operands with f32 accumulation -> loose tolerance vs f32 reference.
    max_err = float(jnp.max(jnp.abs(out - ref)))
    assert jnp.allclose(out, ref, rtol=5e-2, atol=5e-2), max_err
    print("KERNEL_OK")
</pallas_src>

<mosaic_0001>
module attributes {stable_mosaic.version = 11 : i64} {
  func.func @kernel(%arg0: i32, %arg1: memref<4x16x32xbf16, #tpu.memory_space<vmem>>, %arg2: memref<96x1xf32, #tpu.memory_space<vmem>>, %arg3: memref<32x32xbf16, #tpu.memory_space<vmem>>, %arg4: memref<1x32xf32, #tpu.memory_space<vmem>>, %arg5: memref<288x160xbf16, #tpu.memory_space<vmem>>, %arg6: memref<1x160xf32, #tpu.memory_space<vmem>>, %arg7: memref<416x160xbf16, #tpu.memory_space<vmem>>, %arg8: memref<1x160xf32, #tpu.memory_space<vmem>>, %arg9: memref<160x16xbf16, #tpu.memory_space<vmem>>, %arg10: memref<1x16xf32, #tpu.memory_space<vmem>>, %arg11: memref<1x4x16xf32, #tpu.memory_space<vmem>>, %arg12: memref<112x32xf32, #tpu.memory_space<vmem>>, %arg13: memref<4x112x32xf32, #tpu.memory_space<vmem>>) attributes {dimension_semantics = [#tpu.dimension_semantics<parallel>], iteration_bounds = array<i64: 1>, scalar_prefetch = 0 : i64, scratch_operands = 2 : i64, tpu.core_type = #tpu.core_type<tc>, window_params = [{transform_indices = @transform_0, window_bounds = array<i64: 4, 16, 32>}, {pipeline_mode = #tpu.pipeline_mode<synchronous>, transform_indices = @transform_1, window_bounds = array<i64: 96, 1>}, {pipeline_mode = #tpu.pipeline_mode<synchronous>, transform_indices = @transform_2, window_bounds = array<i64: 32, 32>}, {pipeline_mode = #tpu.pipeline_mode<synchronous>, transform_indices = @transform_3, window_bounds = array<i64: 1, 32>}, {pipeline_mode = #tpu.pipeline_mode<synchronous>, transform_indices = @transform_4, window_bounds = array<i64: 288, 160>}, {pipeline_mode = #tpu.pipeline_mode<synchronous>, transform_indices = @transform_5, window_bounds = array<i64: 1, 160>}, {pipeline_mode = #tpu.pipeline_mode<synchronous>, transform_indices = @transform_6, window_bounds = array<i64: 416, 160>}, {pipeline_mode = #tpu.pipeline_mode<synchronous>, transform_indices = @transform_7, window_bounds = array<i64: 1, 160>}, {pipeline_mode = #tpu.pipeline_mode<synchronous>, transform_indices = @transform_8, window_bounds = array<i64: 160, 16>}, {pipeline_mode = #tpu.pipeline_mode<synchronous>, transform_indices = @transform_9, window_bounds = array<i64: 1, 16>}, {transform_indices = @transform_10, window_bounds = array<i64: 1, 4, 16>}]} {
    %cst = arith.constant 0.000000e+00 : f32
    %0 = vector.broadcast %cst : f32 to vector<8x32xf32>
    %c0 = arith.constant 0 : index
    %c0_0 = arith.constant 0 : index
    %1 = vector.load %arg12[%c0, %c0_0] : memref<112x32xf32, #tpu.memory_space<vmem>>, vector<8x32xf32>
    tpu.vector_store %arg12[%c0, %c0_0], %0 {strides = array<i32>} : memref<112x32xf32, #tpu.memory_space<vmem>>, vector<8x32xf32>,
    %cst_1 = arith.constant 0.000000e+00 : f32
    %2 = vector.broadcast %cst_1 : f32 to vector<4x8x32xf32>
    %c0_2 = arith.constant 0 : index
    %c0_3 = arith.constant 0 : index
    %c0_4 = arith.constant 0 : index
    %3 = vector.load %arg13[%c0_2, %c0_3, %c0_4] : memref<4x112x32xf32, #tpu.memory_space<vmem>>, vector<4x8x32xf32>
    tpu.vector_store %arg13[%c0_2, %c0_3, %c0_4], %2 {strides = array<i32>} : memref<4x112x32xf32, #tpu.memory_space<vmem>>, vector<4x8x32xf32>,
    %cst_5 = arith.constant 0.000000e+00 : f32
    %4 = vector.broadcast %cst_5 : f32 to vector<8x32xf32>
    %c24 = arith.constant 24 : index
    %c0_6 = arith.constant 0 : index
    %5 = vector.load %arg12[%c24, %c0_6] : memref<112x32xf32, #tpu.memory_space<vmem>>, vector<8x32xf32>
    tpu.vector_store %arg12[%c24, %c0_6], %4 {strides = array<i32>} : memref<112x32xf32, #tpu.memory_space<vmem>>, vector<8x32xf32>,
    %cst_7 = arith.constant 0.000000e+00 : f32
    %6 = vector.broadcast %cst_7 : f32 to vector<4x8x32xf32>
    %c0_8 = arith.constant 0 : index
    %c24_9 = arith.constant 24 : index
    %c0_10 = arith.constant 0 : index
    %7 = vector.load %arg13[%c0_8, %c24_9, %c0_10] : memref<4x112x32xf32, #tpu.memory_space<vmem>>, vector<4x8x32xf32>
    tpu.vector_store %arg13[%c0_8, %c24_9, %c0_10], %6 {strides = array<i32>} : memref<4x112x32xf32, #tpu.memory_space<vmem>>, vector<4x8x32xf32>,
    %cst_11 = arith.constant 0.000000e+00 : f32
    %8 = vector.broadcast %cst_11 : f32 to vector<8x32xf32>
    %c48 = arith.constant 48 : index
    %c0_12 = arith.constant 0 : index
    %9 = vector.load %arg12[%c48, %c0_12] : memref<112x32xf32, #tpu.memory_space<vmem>>, vector<8x32xf32>
    tpu.vector_store %arg12[%c48, %c0_12], %8 {strides = array<i32>} : memref<112x32xf32, #tpu.memory_space<vmem>>, vector<8x32xf32>,
    %cst_13 = arith.constant 0.000000e+00 : f32
    %10 = vector.broadcast %cst_13 : f32 to vector<4x8x32xf32>
    %c0_14 = arith.constant 0 : index
    %c48_15 = arith.constant 48 : index
    %c0_16 = arith.constant 0 : index
    %11 = vector.load %arg13[%c0_14, %c48_15, %c0_16] : memref<4x112x32xf32, #tpu.memory_space<vmem>>, vector<4x8x32xf32>
    tpu.vector_store %arg13[%c0_14, %c48_15, %c0_16], %10 {strides = array<i32>} : memref<4x112x32xf32, #tpu.memory_space<vmem>>, vector<4x8x32xf32>,
    %cst_17 = arith.constant 0.000000e+00 : f32
    %12 = vector.broadcast %cst_17 : f32 to vector<8x32xf32>
    %c72 = arith.constant 72 : index
    %c0_18 = arith.constant 0 : index
    %13 = vector.load %arg12[%c72, %c0_18] : memref<112x32xf32, #tpu.memory_space<vmem>>, vector<8x32xf32>
    tpu.vector_store %arg12[%c72, %c0_18], %12 {strides = array<i32>} : memref<112x32xf32, #tpu.memory_space<vmem>>, vector<8x32xf32>,
    %cst_19 = arith.constant 0.000000e+00 : f32
    %14 = vector.broadcast %cst_19 : f32 to vector<4x8x32xf32>
    %c0_20 = arith.constant 0 : index
    %c72_21 = arith.constant 72 : index
    %c0_22 = arith.constant 0 : index
    %15 = vector.load %arg13[%c0_20, %c72_21, %c0_22] : memref<4x112x32xf32, #tpu.memory_space<vmem>>, vector<4x8x32xf32>
    tpu.vector_store %arg13[%c0_20, %c72_21, %c0_22], %14 {strides = array<i32>} : memref<4x112x32xf32, #tpu.memory_space<vmem>>, vector<4x8x32xf32>,
    %cst_23 = arith.constant 0.000000e+00 : f32
    %16 = vector.broadcast %cst_23 : f32 to vector<16x32xf32>
    %c96 = arith.constant 96 : index
    %c0_24 = arith.constant 0 : index
    %17 = vector.load %arg12[%c96, %c0_24] : memref<112x32xf32, #tpu.memory_space<vmem>>, vector<16x32xf32>
    tpu.vector_store %arg12[%c96, %c0_24], %16 {strides = array<i32>} : memref<112x32xf32, #tpu.memory_space<vmem>>, vector<16x32xf32>,
    %cst_25 = arith.constant 0.000000e+00 : f32
    %18 = vector.broadcast %cst_25 : f32 to vector<4x16x32xf32>
    %c0_26 = arith.constant 0 : index
    %c96_27 = arith.constant 96 : index
    %c0_28 = arith.constant 0 : index
    %19 = vector.load %arg13[%c0_26, %c96_27, %c0_28] : memref<4x112x32xf32, #tpu.memory_space<vmem>>, vector<4x16x32xf32>
    tpu.vector_store %arg13[%c0_26, %c96_27, %c0_28], %18 {strides = array<i32>} : memref<4x112x32xf32, #tpu.memory_space<vmem>>, vector<4x16x32xf32>,
    %c0_29 = arith.constant 0 : index
    %c0_30 = arith.constant 0 : index
    %c0_31 = arith.constant 0 : index
    %20 = vector.load %arg1[%c0_29, %c0_30, %c0_31] : memref<4x16x32xbf16, #tpu.memory_space<vmem>>, vector<4x16x32xbf16>
    %21 = vector.shape_cast %20 : vector<4x16x32xbf16> to vector<64x32xbf16>
    %c0_32 = arith.constant 0 : index
    %c0_33 = arith.constant 0 : index
    %22 = vector.load %arg3[%c0_32, %c0_33] : memref<32x32xbf16, #tpu.memory_space<vmem>>, vector<32x32xbf16>
    %cst_34 = arith.constant dense<0.000000e+00> : vector<64x32xf32>
    %23 = tpu.matmul %21, %22, %cst_34 {dimension_numbers = #tpu.dot_dimension_numbers<[1], [0], [0], [1], [0, 0, 1, 1], [], []>} : vector<64x32xbf16>, vector<32x32xbf16>, vector<64x32xf32> -> vector<64x32xf32>
    %c0_35 = arith.constant 0 : index
    %c0_36 = arith.constant 0 : index
    %24 = vector.load %arg4[%c0_35, %c0_36] : memref<1x32xf32, #tpu.memory_space<vmem>>, vector<1x32xf32>
    %25 = vector.broadcast %24 : vector<1x32xf32> to vector<64x32xf32>
    %26 = arith.addf %23, %25 : vector<64x32xf32>
    %27 = vector.extract_strided_slice %26 {offsets = [0, 0], sizes = [16, 32], strides = [1, 1]} : vector<64x32xf32> to vector<16x32xf32>
    %c8 = arith.constant 8 : index
    %c0_37 = arith.constant 0 : index
    %28 = vector.load %arg12[%c8, %c0_37] : memref<112x32xf32, #tpu.memory_space<vmem>>, vector<16x32xf32>
    tpu.vector_store %arg12[%c8, %c0_37], %27 {strides = array<i32>} : memref<112x32xf32, #tpu.memory_space<vmem>>, vector<16x32xf32>,
    %29 = vector.extract_strided_slice %26 {offsets = [16, 0], sizes = [16, 32], strides = [1, 1]} : vector<64x32xf32> to vector<16x32xf32>
    %c32 = arith.constant 32 : index
    %c0_38 = arith.constant 0 : index
    %30 = vector.load %arg12[%c32, %c0_38] : memref<112x32xf32, #tpu.memory_space<vmem>>, vector<16x32xf32>
    tpu.vector_store %arg12[%c32, %c0_38], %29 {strides = array<i32>} : memref<112x32xf32, #tpu.memory_space<vmem>>, vector<16x32xf32>,
    %31 = vector.extract_strided_slice %26 {offsets = [32, 0], sizes = [16, 32], strides = [1, 1]} : vector<64x32xf32> to vector<16x32xf32>
    %c56 = arith.constant 56 : index
    %c0_39 = arith.constant 0 : index
    %32 = vector.load %arg12[%c56, %c0_39] : memref<112x32xf32, #tpu.memory_space<vmem>>, vector<16x32xf32>
    tpu.vector_store %arg12[%c56, %c0_39], %31 {strides = array<i32>} : memref<112x32xf32, #tpu.memory_space<vmem>>, vector<16x32xf32>,
    %33 = vector.extract_strided_slice %26 {offsets = [48, 0], sizes = [16, 32], strides = [1, 1]} : vector<64x32xf32> to vector<16x32xf32>
    %c80 = arith.constant 80 : index
    %c0_40 = arith.constant 0 : index
    %34 = vector.load %arg12[%c80, %c0_40] : memref<112x32xf32, #tpu.memory_space<vmem>>, vector<16x32xf32>
    tpu.vector_store %arg12[%c80, %c0_40], %33 {strides = array<i32>} : memref<112x32xf32, #tpu.memory_space<vmem>>, vector<16x32xf32>,
    %c0_41 = arith.constant 0 : index
    %c0_42 = arith.constant 0 : index
    %35 = vector.load %arg2[%c0_41, %c0_42] : memref<96x1xf32, #tpu.memory_space<vmem>>, vector<96x1xf32>
    %c7 = arith.constant 7 : index
    %c0_43 = arith.constant 0 : index
    %36 = vector.load %arg12[%c7, %c0_43] : memref<112x32xf32, #tpu.memory_space<vmem>>, vector<96x32xf32>
    %c8_44 = arith.constant 8 : index
    %c0_45 = arith.constant 0 : index
    %37 = vector.load %arg12[%c8_44, %c0_45] : memref<112x32xf32, #tpu.memory_space<vmem>>, vector<96x32xf32>
    %c9 = arith.constant 9 : index
    %c0_46 = arith.constant 0 : index
    %38 = vector.load %arg12[%c9, %c0_46] : memref<112x32xf32, #tpu.memory_space<vmem>>, vector<96x32xf32>
    %c6 = arith.constant 6 : index
    %c0_47 = arith.constant 0 : index
    %39 = vector.load %arg12[%c6, %c0_47] : memref<112x32xf32, #tpu.memory_space<vmem>>, vector<96x32xf32>
    %c10 = arith.constant 10 : index
    %c0_48 = arith.constant 0 : index
    %40 = vector.load %arg12[%c10, %c0_48] : memref<112x32xf32, #tpu.memory_space<vmem>>, vector<96x32xf32>
    %c4 = arith.constant 4 : index
    %c0_49 = arith.constant 0 : index
    %41 = vector.load %arg12[%c4, %c0_49] : memref<112x32xf32, #tpu.memory_space<vmem>>, vector<96x32xf32>
    %c12 = arith.constant 12 : index
    %c0_50 = arith.constant 0 : index
    %42 = vector.load %arg12[%c12, %c0_50] : memref<112x32xf32, #tpu.memory_space<vmem>>, vector<96x32xf32>
    %c0_51 = arith.constant 0 : index
    %c0_52 = arith.constant 0 : index
    %43 = vector.load %arg12[%c0_51, %c0_52] : memref<112x32xf32, #tpu.memory_space<vmem>>, vector<96x32xf32>
    %c16 = arith.constant 16 : index
    %c0_53 = arith.constant 0 : index
    %44 = vector.load %arg12[%c16, %c0_53] : memref<112x32xf32, #tpu.memory_space<vmem>>, vector<96x32xf32>
    %45 = tpu.concatenate %36, %37, %38, %39, %40, %41, %42, %43, %44 in 1 : vector<96x32xf32>, vector<96x32xf32>, vector<96x32xf32>, vector<96x32xf32>, vector<96x32xf32>, vector<96x32xf32>, vector<96x32xf32>, vector<96x32xf32>, vector<96x32xf32> -> vector<96x288xf32>
    %46 = arith.truncf %45 : vector<96x288xf32> to vector<96x288xbf16>
    %c0_54 = arith.constant 0 : index
    %c0_55 = arith.constant 0 : index
    %47 = vector.load %arg5[%c0_54, %c0_55] : memref<288x160xbf16, #tpu.memory_space<vmem>>, vector<288x160xbf16>
    %cst_56 = arith.constant dense<0.000000e+00> : vector<96x160xf32>
    %48 = tpu.matmul %46, %47, %cst_56 {dimension_numbers = #tpu.dot_dimension_numbers<[1], [0], [0], [1], [0, 0, 1, 1], [], []>} : vector<96x288xbf16>, vector<288x160xbf16>, vector<96x160xf32> -> vector<96x160xf32>
    %c0_57 = arith.constant 0 : index
    %c0_58 = arith.constant 0 : index
    %49 = vector.load %arg6[%c0_57, %c0_58] : memref<1x160xf32, #tpu.memory_space<vmem>>, vector<1x160xf32>
    %50 = vector.broadcast %49 : vector<1x160xf32> to vector<96x160xf32>
    %51 = arith.addf %48, %50 : vector<96x160xf32>
    %cst_59 = arith.constant 0.000000e+00 : f32
    %52 = vector.broadcast %cst_59 : f32 to vector<96x160xf32>
    %53 = arith.maximumf %51, %52 : vector<96x160xf32>
    %54 = vector.broadcast %35 : vector<96x1xf32> to vector<96x160xf32>
    %55 = arith.mulf %53, %54 : vector<96x160xf32>
    %56 = vector.extract_strided_slice %55 {offsets = [0, 0], sizes = [96, 32], strides = [1, 1]} : vector<96x160xf32> to vector<96x32xf32>
    %c0_60 = arith.constant 0 : index
    %c8_61 = arith.constant 8 : index
    %c0_62 = arith.constant 0 : index
    %57 = vector.load %arg13[%c0_60, %c8_61, %c0_62] : memref<4x112x32xf32, #tpu.memory_space<vmem>>, vector<1x96x32xf32>
    %58 = vector.shape_cast %57 : vector<1x96x32xf32> to vector<96x32xf32>
    %59 = vector.shape_cast %56 : vector<96x32xf32> to vector<1x96x32xf32>
    tpu.vector_store %arg13[%c0_60, %c8_61, %c0_62], %59 {strides = array<i32>} : memref<4x112x32xf32, #tpu.memory_space<vmem>>, vector<1x96x32xf32>,
    %60 = vector.extract_strided_slice %55 {offsets = [0, 32], sizes = [96, 32], strides = [1, 1]} : vector<96x160xf32> to vector<96x32xf32>
    %c1 = arith.constant 1 : index
    %c8_63 = arith.constant 8 : index
    %c0_64 = arith.constant 0 : index
    %61 = vector.load %arg13[%c1, %c8_63, %c0_64] : memref<4x112x32xf32, #tpu.memory_space<vmem>>, vector<1x96x32xf32>
    %62 = vector.shape_cast %61 : vector<1x96x32xf32> to vector<96x32xf32>
    %63 = vector.shape_cast %60 : vector<96x32xf32> to vector<1x96x32xf32>
    tpu.vector_store %arg13[%c1, %c8_63, %c0_64], %63 {strides = array<i32>} : memref<4x112x32xf32, #tpu.memory_space<vmem>>, vector<1x96x32xf32>,
    %64 = vector.extract_strided_slice %55 {offsets = [0, 64], sizes = [96, 32], strides = [1, 1]} : vector<96x160xf32> to vector<96x32xf32>
    %c2 = arith.constant 2 : index
    %c8_65 = arith.constant 8 : index
    %c0_66 = arith.constant 0 : index
    %65 = vector.load %arg13[%c2, %c8_65, %c0_66] : memref<4x112x32xf32, #tpu.memory_space<vmem>>, vector<1x96x32xf32>
    %66 = vector.shape_cast %65 : vector<1x96x32xf32> to vector<96x32xf32>
    %67 = vector.shape_cast %64 : vector<96x32xf32> to vector<1x96x32xf32>
    tpu.vector_store %arg13[%c2, %c8_65, %c0_66], %67 {strides = array<i32>} : memref<4x112x32xf32, #tpu.memory_space<vmem>>, vector<1x96x32xf32>,
    %68 = vector.extract_strided_slice %55 {offsets = [0, 96], sizes = [96, 32], strides = [1, 1]} : vector<96x160xf32> to vector<96x32xf32>
    %c3 = arith.constant 3 : index
    %c8_67 = arith.constant 8 : index
    %c0_68 = arith.constant 0 : index
    %69 = vector.load %arg13[%c3, %c8_67, %c0_68] : memref<4x112x32xf32, #tpu.memory_space<vmem>>, vector<1x96x32xf32>
    %70 = vector.shape_cast %69 : vector<1x96x32xf32> to vector<96x32xf32>
    %71 = vector.shape_cast %68 : vector<96x32xf32> to vector<1x96x32xf32>
    tpu.vector_store %arg13[%c3, %c8_67, %c0_68], %71 {strides = array<i32>} : memref<4x112x32xf32, #tpu.memory_space<vmem>>, vector<1x96x32xf32>,
    %c0_69 = arith.constant 0 : index
    %c7_70 = arith.constant 7 : index
    %c0_71 = arith.constant 0 : index
    %72 = vector.load %arg13[%c0_69, %c7_70, %c0_71] : memref<4x112x32xf32, #tpu.memory_space<vmem>>, vector<1x96x32xf32>
    %73 = vector.shape_cast %72 : vector<1x96x32xf32> to vector<96x32xf32>
    %c0_72 = arith.constant 0 : index
    %c9_73 = arith.constant 9 : index
    %c0_74 = arith.constant 0 : index
    %74 = vector.load %arg13[%c0_72, %c9_73, %c0_74] : memref<4x112x32xf32, #tpu.memory_space<vmem>>, vector<1x96x32xf32>
    %75 = vector.shape_cast %74 : vector<1x96x32xf32> to vector<96x32xf32>
    %c1_75 = arith.constant 1 : index
    %c6_76 = arith.constant 6 : index
    %c0_77 = arith.constant 0 : index
    %76 = vector.load %arg13[%c1_75, %c6_76, %c0_77] : memref<4x112x32xf32, #tpu.memory_space<vmem>>, vector<1x96x32xf32>
    %77 = vector.shape_cast %76 : vector<1x96x32xf32> to vector<96x32xf32>
    %c1_78 = arith.constant 1 : index
    %c10_79 = arith.constant 10 : index
    %c0_80 = arith.constant 0 : index
    %78 = vector.load %arg13[%c1_78, %c10_79, %c0_80] : memref<4x112x32xf32, #tpu.memory_space<vmem>>, vector<1x96x32xf32>
    %79 = vector.shape_cast %78 : vector<1x96x32xf32> to vector<96x32xf32>
    %c2_81 = arith.constant 2 : index
    %c4_82 = arith.constant 4 : index
    %c0_83 = arith.constant 0 : index
    %80 = vector.load %arg13[%c2_81, %c4_82, %c0_83] : memref<4x112x32xf32, #tpu.memory_space<vmem>>, vector<1x96x32xf32>
    %81 = vector.shape_cast %80 : vector<1x96x32xf32> to vector<96x32xf32>
    %c2_84 = arith.constant 2 : index
    %c12_85 = arith.constant 12 : index
    %c0_86 = arith.constant 0 : index
    %82 = vector.load %arg13[%c2_84, %c12_85, %c0_86] : memref<4x112x32xf32, #tpu.memory_space<vmem>>, vector<1x96x32xf32>
    %83 = vector.shape_cast %82 : vector<1x96x32xf32> to vector<96x32xf32>
    %c3_87 = arith.constant 3 : index
    %c0_88 = arith.constant 0 : index
    %c0_89 = arith.constant 0 : index
    %84 = vector.load %arg13[%c3_87, %c0_88, %c0_89] : memref<4x112x32xf32, #tpu.memory_space<vmem>>, vector<1x96x32xf32>
    %85 = vector.shape_cast %84 : vector<1x96x32xf32> to vector<96x32xf32>
    %c3_90 = arith.constant 3 : index
    %c16_91 = arith.constant 16 : index
    %c0_92 = arith.constant 0 : index
    %86 = vector.load %arg13[%c3_90, %c16_91, %c0_92] : memref<4x112x32xf32, #tpu.memory_space<vmem>>, vector<1x96x32xf32>
    %87 = vector.shape_cast %86 : vector<1x96x32xf32> to vector<96x32xf32>
    %88 = tpu.concatenate %55, %73, %75, %77, %79, %81, %83, %85, %87 in 1 : vector<96x160xf32>, vector<96x32xf32>, vector<96x32xf32>, vector<96x32xf32>, vector<96x32xf32>, vector<96x32xf32>, vector<96x32xf32>, vector<96x32xf32>, vector<96x32xf32> -> vector<96x416xf32>
    %89 = arith.truncf %88 : vector<96x416xf32> to vector<96x416xbf16>
    %c0_93 = arith.constant 0 : index
    %c0_94 = arith.constant 0 : index
    %90 = vector.load %arg7[%c0_93, %c0_94] : memref<416x160xbf16, #tpu.memory_space<vmem>>, vector<416x160xbf16>
    %cst_95 = arith.constant dense<0.000000e+00> : vector<96x160xf32>
    %91 = tpu.matmul %89, %90, %cst_95 {dimension_numbers = #tpu.dot_dimension_numbers<[1], [0], [0], [1], [0, 0, 1, 1], [], []>} : vector<96x416xbf16>, vector<416x160xbf16>, vector<96x160xf32> -> vector<96x160xf32>
    %c0_96 = arith.constant 0 : index
    %c0_97 = arith.constant 0 : index
    %92 = vector.load %arg8[%c0_96, %c0_97] : memref<1x160xf32, #tpu.memory_space<vmem>>, vector<1x160xf32>
    %93 = vector.broadcast %92 : vector<1x160xf32> to vector<96x160xf32>
    %94 = arith.addf %91, %93 : vector<96x160xf32>
    %cst_98 = arith.constant 0.000000e+00 : f32
    %95 = vector.broadcast %cst_98 : f32 to vector<96x160xf32>
    %96 = arith.maximumf %94, %95 : vector<96x160xf32>
    %97 = vector.broadcast %35 : vector<96x1xf32> to vector<96x160xf32>
    %98 = arith.mulf %96, %97 : vector<96x160xf32>
    %99 = vector.shape_cast %98 : vector<96x160xf32> to vector<4x24x160xf32>
    %cst_99 = arith.constant dense<0xFF800000> : vector<4x160xf32>
    %100 = vector.multi_reduction <maximumf>, %99, %cst_99 [1] : vector<4x24x160xf32> to vector<4x160xf32>
    %101 = arith.truncf %100 : vector<4x160xf32> to vector<4x160xbf16>
    %c0_100 = arith.constant 0 : index
    %c0_101 = arith.constant 0 : index
    %102 = vector.load %arg9[%c0_100, %c0_101] : memref<160x16xbf16, #tpu.memory_space<vmem>>, vector<160x16xbf16>
    %cst_102 = arith.constant dense<0.000000e+00> : vector<4x16xf32>
    %103 = tpu.matmul %101, %102, %cst_102 {dimension_numbers = #tpu.dot_dimension_numbers<[1], [0], [0], [1], [0, 0, 1, 1], [], []>} : vector<4x160xbf16>, vector<160x16xbf16>, vector<4x16xf32> -> vector<4x16xf32>
    %c0_103 = arith.constant 0 : index
    %c0_104 = arith.constant 0 : index
    %104 = vector.load %arg10[%c0_103, %c0_104] : memref<1x16xf32, #tpu.memory_space<vmem>>, vector<1x16xf32>
    %105 = vector.broadcast %104 : vector<1x16xf32> to vector<4x16xf32>
    %106 = arith.addf %103, %105 : vector<4x16xf32>
    %cst_105 = arith.constant 0.000000e+00 : f32
    %107 = vector.broadcast %cst_105 : f32 to vector<4x16xf32>
    %108 = arith.maximumf %106, %107 : vector<4x16xf32>
    %109 = vector.shape_cast %108 : vector<4x16xf32> to vector<1x4x16xf32>
    %c0_106 = arith.constant 0 : index
    %c0_107 = arith.constant 0 : index
    %c0_108 = arith.constant 0 : index
    %110 = vector.load %arg11[%c0_106, %c0_107, %c0_108] : memref<1x4x16xf32, #tpu.memory_space<vmem>>, vector<1x4x16xf32>
    tpu.vector_store %arg11[%c0_106, %c0_107, %c0_108], %109 {strides = array<i32>} : memref<1x4x16xf32, #tpu.memory_space<vmem>>, vector<1x4x16xf32>,
    return
  }
  func.func @transform_0(%arg0: i32) -> (i32, i32, i32) {
    %c0_i32 = arith.constant 0 : i32
    %c0_i32_0 = arith.constant 0 : i32
    %c0_i32_1 = arith.constant 0 : i32
    return %arg0, %c0_i32, %c0_i32_0 : i32, i32, i32
  }
  func.func @transform_1(%arg0: i32) -> (i32, i32) {
    %c0_i32 = arith.constant 0 : i32
    %c0_i32_0 = arith.constant 0 : i32
    %c0_i32_1 = arith.constant 0 : i32
    return %c0_i32, %c0_i32_0 : i32, i32
  }
  func.func @transform_2(%arg0: i32) -> (i32, i32) {
    %c0_i32 = arith.constant 0 : i32
    %c0_i32_0 = arith.constant 0 : i32
    %c0_i32_1 = arith.constant 0 : i32
    return %c0_i32, %c0_i32_0 : i32, i32
  }
  func.func @transform_3(%arg0: i32) -> (i32, i32) {
    %c0_i32 = arith.constant 0 : i32
    %c0_i32_0 = arith.constant 0 : i32
    %c0_i32_1 = arith.constant 0 : i32
    return %c0_i32, %c0_i32_0 : i32, i32
  }
  func.func @transform_4(%arg0: i32) -> (i32, i32) {
    %c0_i32 = arith.constant 0 : i32
    %c0_i32_0 = arith.constant 0 : i32
    %c0_i32_1 = arith.constant 0 : i32
    return %c0_i32, %c0_i32_0 : i32, i32
  }
  func.func @transform_5(%arg0: i32) -> (i32, i32) {
    %c0_i32 = arith.constant 0 : i32
    %c0_i32_0 = arith.constant 0 : i32
    %c0_i32_1 = arith.constant 0 : i32
    return %c0_i32, %c0_i32_0 : i32, i32
  }
  func.func @transform_6(%arg0: i32) -> (i32, i32) {
    %c0_i32 = arith.constant 0 : i32
    %c0_i32_0 = arith.constant 0 : i32
    %c0_i32_1 = arith.constant 0 : i32
    return %c0_i32, %c0_i32_0 : i32, i32
  }
  func.func @transform_7(%arg0: i32) -> (i32, i32) {
    %c0_i32 = arith.constant 0 : i32
    %c0_i32_0 = arith.constant 0 : i32
    %c0_i32_1 = arith.constant 0 : i32
    return %c0_i32, %c0_i32_0 : i32, i32
  }
  func.func @transform_8(%arg0: i32) -> (i32, i32) {
    %c0_i32 = arith.constant 0 : i32
    %c0_i32_0 = arith.constant 0 : i32
    %c0_i32_1 = arith.constant 0 : i32
    return %c0_i32, %c0_i32_0 : i32, i32
  }
  func.func @transform_9(%arg0: i32) -> (i32, i32) {
    %c0_i32 = arith.constant 0 : i32
    %c0_i32_0 = arith.constant 0 : i32
    %c0_i32_1 = arith.constant 0 : i32
    return %c0_i32, %c0_i32_0 : i32, i32
  }
  func.func @transform_10(%arg0: i32) -> (i32, i32, i32) {
    %c0_i32 = arith.constant 0 : i32
    %c0_i32_0 = arith.constant 0 : i32
    %c0_i32_1 = arith.constant 0 : i32
    return %arg0, %c0_i32, %c0_i32_0 : i32, i32, i32
  }
}

</mosaic_0001>

<bundles_post_ra>
// kernel: tpu_custom_call.1
= control target key start
LH: loop header
LB: loop body
LE: loop exit
PB: predicated region body
PF: predicated region fallthrough
CT: control target
= control target key end

     0   :  { %s5274_s0 = inlined_call_operand.vmem [shape: bf16[4,16,32], index: 0, kind: input, shape index: {}]   ;;  %s5275_s1 = inlined_call_operand.vmem [shape: f32[96,1], index: 1, kind: input, shape index: {}]   ;;  %s5276_s2 = inlined_call_operand.vmem [shape: bf16[32,32], index: 2, kind: input, shape index: {}]   ;;  %s5277_s3 = inlined_call_operand.vmem [shape: f32[1,32], index: 3, kind: input, shape index: {}]   ;;  %s5278_s4 = inlined_call_operand.vmem [shape: bf16[288,160], index: 4, kind: input, shape index: {}]   ;;  %s5279_s5 = inlined_call_operand.vmem [shape: f32[1,160], index: 5, kind: input, shape index: {}]   ;;  %s5280_s6 = inlined_call_operand.vmem [shape: bf16[416,160], index: 6, kind: input, shape index: {}]   ;;  %s5281_s7 = inlined_call_operand.vmem [shape: f32[1,160], index: 7, kind: input, shape index: {}]   ;;  %s5282_s8 = inlined_call_operand.vmem [shape: bf16[160,16], index: 8, kind: input, shape index: {}]   ;;  %s5283_s9 = inlined_call_operand.vmem [shape: f32[1,16], index: 9, kind: input, shape index: {}]   ;;  %s5284_s10 = inlined_call_operand.hbm [shape: f32[1,4,16], index: 10, kind: output, shape index: {}]  }
   0x1   :  { %v3201_v0 = vld [vmem:[%s5276_s2 + $0x8] sm:$0xff]  ;;  %v3200_v1 = vld [vmem:[%s5276_s2] sm:$0xff] }
   0x2   :  { %134 = vmatpush.bf16.msra.mxu0 %v3201_v0 }
   0x3   :  { %15 = vsyncpa [#allocation5], 0  ;;  %v3196_v2 = vld [vmem:[%s5274_s0] sm:$0xff]  ;;  %vm37_vm0 = vcmask 261120   ;;  %v3197_v3 = vld [vmem:[%s5274_s0 + $0x8] sm:$0xff]  ;;  %v3705_v6 = vmov 0.0  }
   0x4   :  { %v3198_v4 = vld [vmem:[%s5274_s0 + $0x10] sm:$0xff]  ;;  %v3199_v5 = vld [vmem:[%s5274_s0 + $0x18] sm:$0xff]  ;;  %43 = vst.msk [vmem:[#allocation2 + $0x18] sm:$0xff] %vm37_vm0, %v3705_v6  ;;  %v2909_v10 = vld [vmem:[%s5278_s4 + $0x100] sm:$0xf]  ;;  %s3707_s13 = smov 32  }
   0x5   :  { %38 = vst.msk [vmem:[#allocation2] sm:$0xff] %vm37_vm0, %v3705_v6  ;;  %v2917_v7 = vld [vmem:[%s5278_s4 + $0x110] sm:$0xf]  ;;  %v3237_v8 = vld [vmem:[%s5278_s4 + $0x114] sm:$0xf0]  ;;  %s3708_s14 = smov 64  }
   0x6   :  { %135 = vmatpush.bf16.msra.mxu0 %v3200_v1  ;;  %39 = vst.msk [vmem:[#allocation3] sm:$0xff] %vm37_vm0, %v3705_v6  ;;  %v2918_v9 = vor.u32 %v3237_v8, %v2917_v7  ;;  %v3235_v11 = vld [vmem:[%s5278_s4 + $0x104] sm:$0xf0]  ;;  %v3677_v13 = vld [vmem:[%s5277_s3] ss:$0 sm:$0xff]  ;;  %s3706_s3 = smov 96  }
   0x7   :  { %40 = vst.msk [vmem:[#allocation3 + $0x70] sm:$0xff] %vm37_vm0, %v3705_v6  ;;  %v2910_v12 = vor.u32 %v3235_v11, %v2909_v10  ;;  %vm530_vm1 = vcmask 523264   ;;  %vm543_vm2 = vcmask 785408   ;;  %vm2631_vm3 = vcmask 1041409   ;;  %s2742_s26 = sshll.u32 %s5284_s10, 4  ;;  %s2743_s26 = int_to_ptr.hbm [resolvable:$true] %s2742_s26 }
   0x8   :  { %41 = vst.msk [vmem:[#allocation3 + $0xe0] sm:$0xff] %vm37_vm0, %v3705_v6  ;;  %934 = vmatpush.bf16.msra.mxu3 %v2918_v9  ;;  %vm2633_vm4 = vcmask 1042434   ;;  %vm2635_vm5 = vcmask 1043459   ;;  %vm2733_vm6 = vcmask 125952  }
   0x9   :  { %2775 = vmatmul.msk.bf16.vlgmr.msra.gmra.mxu0 %vm37_vm0, %v3196_v2  ;;  %42 = vst.msk [vmem:[#allocation3 + $0x150] sm:$0xff] %vm37_vm0, %v3705_v6 }
   0xa   :  { %44 = vst.msk [vmem:[#allocation3 + $0x18] sm:$0xff] %vm37_vm0, %v3705_v6 }
   0xb   :  { %45 = vst.msk [vmem:[#allocation3 + $0x88] sm:$0xff] %vm37_vm0, %v3705_v6  ;;  %v3835_v19 = vld [vmem:[#allocation2 + $0x18] sm:$0xff] }
   0xc   :  { %46 = vst.msk [vmem:[#allocation3 + $0xf8] sm:$0xff] %vm37_vm0, %v3705_v6  ;;  %935 = vmatpush.bf16.msra.mxu3 %v2910_v12  ;;  %v250_v8 = vld [vmem:[#allocation2] sm:$0xff] }
   0xd   :  { %47 = vst.msk [vmem:[#allocation3 + $0x168] sm:$0xff] %vm37_vm0, %v3705_v6 }
   0xe   :  { %48 = vst.msk [vmem:[#allocation2 + $0x30] sm:$0xff] %vm37_vm0, %v3705_v6 }
   0xf   :  { %49 = vst.msk [vmem:[#allocation3 + $0x30] sm:$0xff] %vm37_vm0, %v3705_v6 }
  0x10   :  { %50 = vst.msk [vmem:[#allocation3 + $0xa0] sm:$0xff] %vm37_vm0, %v3705_v6 }
  0x11   :  { %51 = vst.msk [vmem:[#allocation3 + $0x110] sm:$0xff] %vm37_vm0, %v3705_v6 }
  0x12   :  { %52 = vst.msk [vmem:[#allocation3 + $0x180] sm:$0xff] %vm37_vm0, %v3705_v6 }
  0x13   :  { %53 = vst.msk [vmem:[#allocation2 + $0x48] sm:$0xff] %vm37_vm0, %v3705_v6 }
  0x14   :  { %54 = vst.msk [vmem:[#allocation3 + $0x48] sm:$0xff] %vm37_vm0, %v3705_v6 }
  0x15   :  { %55 = vst.msk [vmem:[#allocation3 + $0xb8] sm:$0xff] %vm37_vm0, %v3705_v6  ;;  %v3853_v29 = vld [vmem:[#allocation2 + $0x30] sm:$0xff] }
  0x16   :  { %56 = vst.msk [vmem:[#allocation3 + $0x128] sm:$0xff] %vm37_vm0, %v3705_v6 }
  0x17   :  { %57 = vst.msk [vmem:[#allocation3 + $0x198] sm:$0xff] %vm37_vm0, %v3705_v6 }
  0x18   :  { %58 = vst.msk [vmem:[#allocation2 + $0x60] sm:$0xff] %vm37_vm0, %v3705_v6 }
  0x19   :  { %2776 = vmatmul.msk.bf16.gmra.mxu0 %vm37_vm0, %v3197_v3  ;;  %59 = vst.msk [vmem:[#allocation2 + $0x68] sm:$0xff] %vm37_vm0, %v3705_v6 }
  0x1a   :  { %60 = vst.msk [vmem:[#allocation3 + $0x60] sm:$0xff] %vm37_vm0, %v3705_v6  ;;  %v3873_v40 = vld [vmem:[#allocation2 + $0x48] sm:$0xff] }
  0x1b   :  { %61 = vst.msk [vmem:[#allocation3 + $0x68] sm:$0xff] %vm37_vm0, %v3705_v6 }
  0x1c   :  { %62 = vst.msk [vmem:[#allocation3 + $0xd0] sm:$0xff] %vm37_vm0, %v3705_v6 }
  0x1d   :  { %63 = vst.msk [vmem:[#allocation3 + $0xd8] sm:$0xff] %vm37_vm0, %v3705_v6 }
  0x1e   :  { %64 = vst.msk [vmem:[#allocation3 + $0x140] sm:$0xff] %vm37_vm0, %v3705_v6 }
  0x1f   :  { %65 = vst.msk [vmem:[#allocation3 + $0x148] sm:$0xff] %vm37_vm0, %v3705_v6  ;;  %v3895_v54 = vld [vmem:[#allocation2 + $0x60] sm:$0xff] }
  0x20   :  { %66 = vst.msk [vmem:[#allocation3 + $0x1b0] sm:$0xff] %vm37_vm0, %v3705_v6  ;;  %v212_v53 = vld [vmem:[#allocation2 + $0x61] sm:$0xff] }
  0x21   :  { %67 = vst.msk [vmem:[#allocation3 + $0x1b8] sm:$0xff] %vm37_vm0, %v3705_v6 }
  0x29   :  { %2777 = vmatmul.msk.bf16.gmra.mxu0 %vm37_vm0, %v3198_v4 }
  0x39   :  { %2778 = vmatmul.msk.bf16.gmra.mxu0 %vm37_vm0, %v3199_v5 }
  0x86   :  { %v137_v14 = vpop.f32.mrf.mxu0 }
  0x87   :  { %v138_v15 = vadd.f32 %v3677_v13, %v137_v14 }
  0x89   :  { %157 = vst.msk [vmem:[#allocation2 + $0x8] sm:$0xff] %vm37_vm0, %v138_v15 }
  0x8e   :  { %v139_v16 = vpop.f32.mrf.mxu0 }
  0x8f   :  { %v140_v17 = vadd.f32 %v3677_v13, %v139_v16 }
  0x90   :  { %v237_v6 = vld [vmem:[#allocation2 + $0x4] sm:$0xff] }
  0x91   :  { %158 = vst.msk [vmem:[#allocation2 + $0x10] sm:$0xff] %vm37_vm0, %v140_v17  ;;  %v189_v11 = vld [vmem:[#allocation2 + $0x8] sm:$0xff] }
  0x96   :  { %v142_v18 = vpop.f32.mrf.mxu0 }
  0x97   :  { %v143_v20 = vadd.f32 %v3677_v13, %v142_v18 }
  0x98   :  { %v3837_v21 = vld [vmem:[#allocation2 + $0x10] sm:$0xff] }
  0x99   :  { %159 = vst.msk [vmem:[#allocation2 + $0x20] sm:$0xff] %vm37_vm0, %v143_v20  ;;  %v3842_v22 = vpack.c.bf16 %v3835_v19, %v3837_v21  ;;  %v3384_v23 = vpack.i.bf16 %v3835_v19, %v3837_v21  ;;  %v238_v0 = vld [vmem:[#allocation2 + $0xc] sm:$0xff]  ;;  %v239_v3 = vld [vmem:[#allocation2 + $0x14] sm:$0xff]  ;;  %v3359_v15 = vpack.i.bf16 %v3837_v21, %v189_v11 }
  0x9a   :  { %v3349_v5 = vpack.i.bf16 %v239_v3, %v238_v0  ;;  %v3344_v7 = vpack.i.bf16 %v238_v0, %v237_v6  ;;  %v201_v9 = vld [vmem:[#allocation2 + $0x9] sm:$0xff]  ;;  %v202_v10 = vld [vmem:[#allocation2 + $0x11] sm:$0xff] }
  0x9b   :  { %2923 = vmatmul.msk.bf16.vlgmr.msra.gmra.mxu3 %vm37_vm0, %v3842_v22  ;;  %v3364_v12 = vpack.i.bf16 %v202_v10, %v201_v9  ;;  %v214_v17 = vld [vmem:[#allocation2 + $0xe] sm:$0xff]  ;;  %v213_v20 = vld [vmem:[#allocation2 + $0x6] sm:$0xff]  ;;  %v2903_v10 = vld [vmem:[%s5278_s4 + $0xf8] sm:$0xf0] }
  0x9c   :  { %v3215_v0 = vld [vmem:[%s5278_s4 + $0x64] sm:$0xf0]  ;;  %v3232_v9 = vld [vmem:[%s5278_s4 + $0xf4] sm:$0xf] }
  0x9e   :  { %v144_v24 = vpop.f32.mrf.mxu0 }
  0x9f   :  { %v145_v25 = vadd.f32 %v3677_v13, %v144_v24 }
  0xa0   :  { %v3848_v26 = vld [vmem:[#allocation2 + $0x20] sm:$0xff] }
  0xa1   :  { %160 = vst.msk [vmem:[#allocation2 + $0x28] sm:$0xff] %vm37_vm0, %v145_v25  ;;  %v3389_v27 = vpack.i.bf16 %v3848_v26, %v3835_v19  ;;  %v240_v18 = vld [vmem:[#allocation2 + $0x1c] sm:$0xff]  ;;  %v3369_v25 = vpack.i.bf16 %v214_v17, %v213_v20 }
  0xa6   :  { %v147_v28 = vpop.f32.mrf.mxu0 }
  0xa7   :  { %v148_v30 = vadd.f32 %v3677_v13, %v147_v28  ;;  %v3374_v28 = vpack.i.bf16 %v240_v18, %v239_v3  ;;  %v3213_v3 = vld [vmem:[%s5278_s4 + $0x54] sm:$0xf0] }
  0xa8   :  { %v3855_v31 = vld [vmem:[#allocation2 + $0x28] sm:$0xff] }
  0xa9   :  { %161 = vst.msk [vmem:[#allocation2 + $0x38] sm:$0xff] %vm37_vm0, %v148_v30  ;;  %v3860_v32 = vpack.c.bf16 %v3855_v31, %v3848_v26  ;;  %v3419_v33 = vpack.i.bf16 %v3853_v29, %v3855_v31  ;;  %v3414_v34 = vpack.i.bf16 %v3855_v31, %v3848_v26  ;;  %v241_v16 = vld [vmem:[#allocation2 + $0x24] sm:$0xff]  ;;  %v2837_v26 = vld [vmem:[%s5278_s4 + $0x70] sm:$0xf]  ;;  %v3217_v31 = vld [vmem:[%s5278_s4 + $0x74] sm:$0xf0] }
  0xaa   :  { %v3379_v24 = vpack.i.bf16 %v241_v16, %v240_v18  ;;  %v204_v30 = vld [vmem:[#allocation2 + $0x21] sm:$0xff] }
  0xab   :  { %2924 = vmatmul.msk.bf16.gmra.mxu3 %vm37_vm0, %v3860_v32  ;;  %v217_v19 = vld [vmem:[#allocation2 + $0x26] sm:$0xff] }
  0xae   :  { %v149_v35 = vpop.f32.mrf.mxu0 }
  0xaf   :  { %v150_v36 = vadd.f32 %v3677_v13, %v149_v35  ;;  %v203_v35 = vld [vmem:[#allocation2 + $0x19] sm:$0xff] }
  0xb0   :  { %v3868_v37 = vld [vmem:[#allocation2 + $0x38] sm:$0xff] }
  0xb1   :  { %162 = vst.msk [vmem:[#allocation2 + $0x40] sm:$0xff] %vm37_vm0, %v150_v36  ;;  %v3444_v38 = vpack.i.bf16 %v3868_v37, %v3853_v29  ;;  %v3880_v43 = vpack.c.bf16 %v3868_v37, %v3853_v29  ;;  %v3394_v36 = vpack.i.bf16 %v204_v30, %v203_v35  ;;  %v206_v21 = vld [vmem:[#allocation2 + $0x31] sm:$0xff]  ;;  %v2813_v29 = vld [vmem:[%s5278_s4 + $0x40] sm:$0xf]  ;;  %v2839_v30 = vld [vmem:[%s5278_s4 + $0x78] sm:$0xf0] }
  0xb2   :  { %v3228_v35 = vld [vmem:[%s5278_s4 + $0xd4] sm:$0xf] }
  0xb6   :  { %v152_v39 = vpop.f32.mrf.mxu0 }
  0xb7   :  { %v153_v41 = vadd.f32 %v3677_v13, %v152_v39  ;;  %v243_v39 = vld [vmem:[#allocation2 + $0x34] sm:$0xff] }
  0xb8   :  { %v3875_v42 = vld [vmem:[#allocation2 + $0x40] sm:$0xff] }
  0xb9   :  { %163 = vst.msk [vmem:[#allocation2 + $0x50] sm:$0xff] %vm37_vm0, %v153_v41  ;;  %v3449_v44 = vpack.i.bf16 %v3875_v42, %v3868_v37  ;;  %v3474_v45 = vpack.i.bf16 %v3873_v40, %v3875_v42  ;;  %v221_v48 = vld [vmem:[#allocation2 + $0x46] sm:$0xff]  ;;  %v3903_v62 = vpack.c.bf16 %v3873_v40, %v3875_v42  ;;  %v216_v41 = vld [vmem:[#allocation2 + $0x1e] sm:$0xff] }
  0xba   :  { %v220_v6 = vld [vmem:[#allocation2 + $0x3e] sm:$0xff]  ;;  %v3211_v37 = vld [vmem:[%s5278_s4 + $0x44] sm:$0xf0] }
  0xbb   :  { %2925 = vmatmul.msk.bf16.gmra.mxu3 %vm37_vm0, %v3880_v43 }
  0xbe   :  { %v154_v46 = vpop.f32.mrf.mxu0 }
  0xbf   :  { %v155_v47 = vadd.f32 %v3677_v13, %v154_v46  ;;  %v3354_v13 = vpack.i.bf16 %v189_v11, %v250_v8  ;;  %v242_v46 = vld [vmem:[#allocation2 + $0x2c] sm:$0xff]  ;;  %v2906_v11 = vor.u32 %v3232_v9, %v2903_v10  ;;  %v3233_v9 = vld [vmem:[%s5278_s4 + $0xf4] sm:$0xf0] }
  0xc0   :  { %v222_v49 = vld [vmem:[#allocation2 + $0x4e] sm:$0xff] }
  0xc1   :  { %v3888_v50 = vld [vmem:[#allocation2 + $0x50] sm:$0xff]  ;;  %164 = vst.msk [vmem:[#allocation2 + $0x58] sm:$0xff] %vm37_vm0, %v155_v47  ;;  %v3324_v51 = vpack.i.bf16 %v222_v49, %v221_v48  ;;  %v3409_v48 = vpack.i.bf16 %v243_v39, %v242_v46  ;;  %1006 = vmatpush.bf16.msrb.mxu3 %v2906_v11 }
  0xc2   :  { %v3314_v52 = vpack.i.bf16 %v3888_v50, %v3873_v40  ;;  %v209_v55 = vld [vmem:[#allocation2 + $0x49] sm:$0xff]  ;;  %v215_v47 = vld [vmem:[#allocation2 + $0x16] sm:$0xff] }
  0xc3   :  { %3325 = vrot.lane.b32.xlu1 %v3324_v51, %s3706_s3  ;;  %v3399_v49 = vpack.i.bf16 %v216_v41, %v215_v47  ;;  %v3404_v51 = vpack.i.bf16 %v242_v46, %v241_v16  ;;  %v219_v16 = vld [vmem:[#allocation2 + $0x36] sm:$0xff] }
  0xc4   :  { %3315 = vrot.lane.b32.xlu0 %v3314_v52, %s3707_s13  ;;  %v3459_v20 = vpack.i.bf16 %v220_v6, %v219_v16  ;;  %v2887_v46 = vld [vmem:[%s5278_s4 + $0xd8] sm:$0xf0]  ;;  %v3224_v40 = vld [vmem:[%s5278_s4 + $0xb4] sm:$0xf]  ;;  %v2799_v16 = vld [vmem:[%s5278_s4 + $0x28] sm:$0xf0] }
  0xc5   :  { %v2890_v47 = vor.u32 %v3228_v35, %v2887_v46  ;;  %v2877_v46 = vld [vmem:[%s5278_s4 + $0xc0] sm:$0xf] }
  0xc8   :  { %v211_v56 = vld [vmem:[#allocation2 + $0x59] sm:$0xff]  ;;  %v210_v58 = vld [vmem:[#allocation2 + $0x51] sm:$0xff] }
  0xc9   :  { %v3897_v57 = vld [vmem:[#allocation2 + $0x58] sm:$0xff]  ;;  %v3334_v59 = vpack.i.bf16 %v212_v53, %v211_v56  ;;  %v3319_v61 = vpack.i.bf16 %v210_v58, %v209_v55  ;;  %v245_v53 = vld [vmem:[#allocation2 + $0x44] sm:$0xff]  ;;  %v218_v55 = vld [vmem:[#allocation2 + $0x2e] sm:$0xff] }
  0xca   :  { %v3329_v60 = vpack.i.bf16 %v3895_v54, %v3897_v57  ;;  %v3489_v63 = vpack.i.bf16 %v3897_v57, %v3888_v50  ;;  %v223_v1 = vld [vmem:[#allocation2 + $0x56] sm:$0xff]  ;;  %v224_v2 = vld [vmem:[#allocation2 + $0x5e] sm:$0xff]  ;;  %v3917_v14 = vpack.c.bf16 %v3897_v57, %v3888_v50  ;;  %v3429_v58 = vpack.i.bf16 %v218_v55, %v217_v19 }
  0xcb   :  { %3335 = vrot.lane.b32.xlu2 %v3334_v59, %s3708_s14  ;;  %2926 = vmatmul.msk.bf16.gmra.mxu3 %vm37_vm0, %v3903_v62  ;;  %v3339_v4 = vpack.i.bf16 %v224_v2, %v223_v1  ;;  %v2821_v2 = vld [vmem:[%s5278_s4 + $0x50] sm:$0xf]  ;;  %v247_v8 = vld [vmem:[#allocation2 + $0x54] sm:$0xff]  ;;  %v3226_v19 = vld [vmem:[%s5278_s4 + $0xc4] sm:$0xf] }
  0xcc   :  { %3330 = vrot.lane.b32.xlu1 %v3329_v60, %s3707_s13  ;;  %3320 = vrot.lane.b32.xlu0 %v3319_v61, %s3708_s14  ;;  %v208_v60 = vld [vmem:[#allocation2 + $0x41] sm:$0xff]  ;;  %v2807_v50 = vld [vmem:[%s5278_s4 + $0x38] sm:$0xf0]  ;;  %v3220_v57 = vld [vmem:[%s5278_s4 + $0x94] sm:$0xf] }
  0xcd   :  { %v2829_v61 = vld [vmem:[%s5278_s4 + $0x60] sm:$0xf] }
  0xce   :  { %v2830_v1 = vor.u32 %v3215_v0, %v2829_v61  ;;  %v2781_v61 = vld [vmem:[%s5278_s4] sm:$0xf]  ;;  %v3203_v0 = vld [vmem:[%s5278_s4 + $0x4] sm:$0xf0] }
  0xd3   :  { %3340 = vrot.lane.b32.xlu2 %v3339_v4, %s3706_s3 }
  0xd4   :  { %3350 = vrot.lane.b32.xlu1 %v3349_v5, %s3708_s14  ;;  %3345 = vrot.lane.b32.xlu0 %v3344_v7, %s3707_s13  ;;  %v2822_v5 = vor.u32 %v3213_v3, %v2821_v2  ;;  %v246_v7 = vld [vmem:[#allocation2 + $0x4c] sm:$0xff]  ;;  %v2782_v2 = vor.u32 %v3203_v0, %v2781_v61 }
  0xd5   :  { %v3469_v18 = vpack.i.bf16 %v247_v8, %v246_v7  ;;  %v2815_v3 = vld [vmem:[%s5278_s4 + $0x48] sm:$0xf0] }
  0xd6   :  { %v186_v61 = vld [vmem:[#allocation2 + $0x4f] sm:$0xff] }
  0xdb   :  { %3355 = vrot.lane.b32.xlu2 %v3354_v13, %s3706_s3  ;;  %2927 = vmatmul.msk.bf16.gmra.mxu3 %vm37_vm0, %v3917_v14  ;;  %v2805_v13 = vld [vmem:[%s5278_s4 + $0x30] sm:$0xf] }
  0xdc   :  { %3365 = vrot.lane.b32.xlu1 %v3364_v12, %s3708_s14  ;;  %3360 = vrot.lane.b32.xlu0 %v3359_v15, %s3707_s13  ;;  %v2895_v12 = vld [vmem:[%s5278_s4 + $0xe8] sm:$0xf0]  ;;  %v3209_v15 = vld [vmem:[%s5278_s4 + $0x34] sm:$0xf0] }
  0xe3   :  { %3370 = vrot.lane.b32.xlu2 %v3369_v25, %s3706_s3  ;;  %v2806_v25 = vor.u32 %v3209_v15, %v2805_v13  ;;  %v3206_v13 = vld [vmem:[%s5278_s4 + $0x24] sm:$0xf] }
  0xe4   :  { %3380 = vrot.lane.b32.xlu1 %v3379_v24, %s3708_s14  ;;  %3375 = vrot.lane.b32.xlu0 %v3374_v28, %s3707_s13  ;;  %v3464_v24 = vpack.i.bf16 %v246_v7, %v245_v53  ;;  %v3216_v28 = vld [vmem:[%s5278_s4 + $0x74] sm:$0xf] }
  0xe5   :  { %v2842_v41 = vor.u32 %v3216_v28, %v2839_v30  ;;  %v3229_v28 = vld [vmem:[%s5278_s4 + $0xd4] sm:$0xf0] }
  0xe7   :  { %967 = vmatpush.bf16.msrb.mxu0 %v2842_v41 }
  0xeb   :  { %3385 = vrot.lane.b32.xlu2 %v3384_v23, %s3706_s3  ;;  %v205_v23 = vld [vmem:[#allocation2 + $0x29] sm:$0xff] }
  0xec   :  { %3395 = vrot.lane.b32.xlu1 %v3394_v36, %s3708_s14  ;;  %3390 = vrot.lane.b32.xlu0 %v3389_v27, %s3707_s13  ;;  %v3424_v52 = vpack.i.bf16 %v206_v21, %v205_v23  ;;  %v244_v27 = vld [vmem:[#allocation2 + $0x3c] sm:$0xff] }
  0xed   :  { %v3439_v56 = vpack.i.bf16 %v245_v53, %v244_v27  ;;  %v3434_v59 = vpack.i.bf16 %v244_v27, %v243_v39  ;;  %v248_v36 = vld [vmem:[#allocation2 + $0x5c] sm:$0xff]  ;;  %v249_v39 = vld [vmem:[#allocation2 + $0x64] sm:$0xff]  ;;  %v2879_v27 = vld [vmem:[%s5278_s4 + $0xc8] sm:$0xf0] }
  0xee   :  { %v3484_v21 = vpack.i.bf16 %v249_v39, %v248_v36  ;;  %v3479_v53 = vpack.i.bf16 %v248_v36, %v247_v8  ;;  %v2901_v8 = vld [vmem:[%s5278_s4 + $0xf0] sm:$0xf]  ;;  %v3204_v36 = vld [vmem:[%s5278_s4 + $0x14] sm:$0xf]  ;;  %v2791_v39 = vld [vmem:[%s5278_s4 + $0x18] sm:$0xf0] }
  0xef   :  { %v2902_v11 = vor.u32 %v3233_v9, %v2901_v8  ;;  %v2794_v41 = vor.u32 %v3204_v36, %v2791_v39  ;;  %v2845_v9 = vld [vmem:[%s5278_s4 + $0x80] sm:$0xf]  ;;  %v187_v36 = vld [vmem:[#allocation2 + $0x57] sm:$0xff] }
  0xf0   :  { %v188_v39 = vld [vmem:[#allocation2 + $0x5f] sm:$0xff] }
  0xf3   :  { %3400 = vrot.lane.b32.xlu2 %v3399_v49, %s3706_s3  ;;  %v3207_v49 = vld [vmem:[%s5278_s4 + $0x24] sm:$0xf0] }
  0xf4   :  { %3410 = vrot.lane.b32.xlu1 %v3409_v48, %s3708_s14  ;;  %3405 = vrot.lane.b32.xlu0 %v3404_v51, %s3707_s13  ;;  %v2797_v48 = vld [vmem:[%s5278_s4 + $0x20] sm:$0xf]  ;;  %v3214_v51 = vld [vmem:[%s5278_s4 + $0x64] sm:$0xf] }
  0xf5   :  { %v2798_v23 = vor.u32 %v3207_v49, %v2797_v48  ;;  %v3202_v48 = vld [vmem:[%s5278_s4 + $0x4] sm:$0xf] }
  0xfb   :  { %3415 = vrot.lane.b32.xlu2 %v3414_v34, %s3706_s3  ;;  %v207_v34 = vld [vmem:[#allocation2 + $0x39] sm:$0xff] }
  0xfc   :  { %3425 = vrot.lane.b32.xlu1 %v3424_v52, %s3708_s14  ;;  %3420 = vrot.lane.b32.xlu0 %v3419_v33, %s3707_s13  ;;  %v2838_v33 = vor.u32 %v3217_v31, %v2837_v26  ;;  %v3454_v4 = vpack.i.bf16 %v208_v60, %v207_v34  ;;  %v2831_v52 = vld [vmem:[%s5278_s4 + $0x68] sm:$0xf0]  ;;  %v3212_v34 = vld [vmem:[%s5278_s4 + $0x54] sm:$0xf] }
  0xfd   :  { %v2834_v55 = vor.u32 %v3214_v51, %v2831_v52  ;;  %v251_v31 = vld [vmem:[#allocation2 + $0x68] sm:$0xff]  ;;  %v2823_v60 = vld [vmem:[%s5278_s4 + $0x58] sm:$0xf0] }
  0xfe   :  { %3300 = vmatpush.bf16.msra.mxu2 %v2838_v33  ;;  %850 = vmatpush.bf16.msra.mxu1 %v2838_v33  ;;  %v4049_v33 = vpack.c.bf16 %v251_v31, %v3895_v54  ;;  %v2826_v42 = vor.u32 %v3212_v34, %v2823_v60  ;;  %v2783_v51 = vld [vmem:[%s5278_s4 + $0x8] sm:$0xf0]  ;;  %v3221_v31 = vld [vmem:[%s5278_s4 + $0x94] sm:$0xf0] }
  0xff   :  { %968 = vmatpush.bf16.msrb.mxu0 %v2834_v55 }
 0x100   :  { %2928 = vmatmul.msk.bf16.gmra.mxu3 %vm37_vm0, %v4049_v33 }
 0x102   :  { %3301 = vmatpush.bf16.msra.mxu2 %v2830_v1  ;;  %851 = vmatpush.bf16.msra.mxu1 %v2830_v1  ;;  %v3210_v1 = vld [vmem:[%s5278_s4 + $0x44] sm:$0xf] }
 0x103   :  { %3430 = vrot.lane.b32.xlu2 %v3429_v58, %s3706_s3  ;;  %v2789_v58 = vld [vmem:[%s5278_s4 + $0x10] sm:$0xf]  ;;  %969 = vmatpush.bf16.msrb.mxu0 %v2826_v42  ;;  %v2818_v6 = vor.u32 %v3210_v1, %v2815_v3 }
 0x104   :  { %3440 = vrot.lane.b32.xlu1 %v3439_v56, %s3708_s14  ;;  %3435 = vrot.lane.b32.xlu0 %v3434_v59, %s3707_s13  ;;  %v2882_v56 = vor.u32 %v3226_v19, %v2879_v27  ;;  %v3205_v59 = vld [vmem:[%s5278_s4 + $0x14] sm:$0xf0]  ;;  %v2869_v19 = vld [vmem:[%s5278_s4 + $0xb0] sm:$0xf] }
 0x105   :  { %v2790_v26 = vor.u32 %v3205_v59, %v2789_v58  ;;  %v3225_v27 = vld [vmem:[%s5278_s4 + $0xb4] sm:$0xf0]  ;;  %v3223_v58 = vld [vmem:[%s5278_s4 + $0xa4] sm:$0xf0] }
 0x106   :  { %3302 = vmatpush.bf16.msra.mxu2 %v2822_v5  ;;  %852 = vmatpush.bf16.msra.mxu1 %v2822_v5  ;;  %v2863_v5 = vld [vmem:[%s5278_s4 + $0xa8] sm:$0xf0]  ;;  %v2870_v55 = vor.u32 %v3225_v27, %v2869_v19 }
 0x107   :  { %970 = vmatpush.bf16.msrb.mxu0 %v2818_v6 }
 0x10b   :  { %3445 = vrot.lane.b32.xlu2 %v3444_v38, %s3706_s3  ;;  %v3230_v38 = vld [vmem:[%s5278_s4 + $0xe4] sm:$0xf] }
 0x10c   :  { %3455 = vrot.lane.b32.xlu1 %v3454_v4, %s3708_s14  ;;  %3450 = vrot.lane.b32.xlu0 %v3449_v44, %s3707_s13  ;;  %v2814_v44 = vor.u32 %v3211_v37, %v2813_v29  ;;  %v2898_v17 = vor.u32 %v3230_v38, %v2895_v12  ;;  %v3222_v4 = vld [vmem:[%s5278_s4 + $0xa4] sm:$0xf]  ;;  %v3208_v29 = vld [vmem:[%s5278_s4 + $0x34] sm:$0xf] }
 0x10d   :  { %v2866_v7 = vor.u32 %v3222_v4, %v2863_v5  ;;  %v2855_v37 = vld [vmem:[%s5278_s4 + $0x98] sm:$0xf0]  ;;  %v3231_v12 = vld [vmem:[%s5278_s4 + $0xe4] sm:$0xf0] }
 0x10e   :  { %3303 = vmatpush.bf16.msra.mxu2 %v2814_v44  ;;  %853 = vmatpush.bf16.msra.mxu1 %v2814_v44  ;;  %v2858_v38 = vor.u32 %v3220_v57, %v2855_v37  ;;  %v2893_v44 = vld [vmem:[%s5278_s4 + $0xe0] sm:$0xf] }
 0x10f   :  { %1007 = vmatpush.bf16.msrb.mxu3 %v2898_v17  ;;  %v2894_v15 = vor.u32 %v3231_v12, %v2893_v44  ;;  %v3218_v17 = vld [vmem:[%s5278_s4 + $0x84] sm:$0xf] }
 0x110   :  { %v165_v57 = vld [vmem:[%s5275_s1] sm:$0xff] }
 0x112   :  { %3304 = vmatpush.bf16.msra.mxu2 %v2806_v25  ;;  %854 = vmatpush.bf16.msra.mxu1 %v2806_v25  ;;  %v2885_v25 = vld [vmem:[%s5278_s4 + $0xd0] sm:$0xf] }
 0x113   :  { %3460 = vrot.lane.b32.xlu2 %v3459_v20, %s3706_s3  ;;  %1008 = vmatpush.bf16.msrb.mxu3 %v2890_v47  ;;  %v2802_v20 = vor.u32 %v3206_v13, %v2799_v16  ;;  %v2886_v30 = vor.u32 %v3229_v28, %v2885_v25  ;;  %v3227_v47 = vld [vmem:[%s5278_s4 + $0xc4] sm:$0xf0]  ;;  %v226_v25 = vld [vmem:[#allocation2 + $0x12] sm:$0xff] }
 0x114   :  { %3470 = vrot.lane.b32.xlu1 %v3469_v18, %s3708_s14  ;;  %3465 = vrot.lane.b32.xlu0 %v3464_v24, %s3707_s13  ;;  %v2847_v18 = vld [vmem:[%s5278_s4 + $0x88] sm:$0xf0]  ;;  %v2878_v49 = vor.u32 %v3227_v47, %v2877_v46 }
 0x115   :  { %v2850_v24 = vor.u32 %v3218_v17, %v2847_v18  ;;  %v166_v47 = vld [vmem:[%s5275_s1 + $0x8] sm:$0xff] }
 0x116   :  { %3305 = vmatpush.bf16.msra.mxu2 %v2798_v23  ;;  %855 = vmatpush.bf16.msra.mxu1 %v2798_v23 }
 0x117   :  { %1009 = vmatpush.bf16.msrb.mxu3 %v2882_v56  ;;  %v2861_v56 = vld [vmem:[%s5278_s4 + $0xa0] sm:$0xf] }
 0x118   :  { %v2862_v59 = vor.u32 %v3223_v58, %v2861_v56 }
 0x11a   :  { %3306 = vmatpush.bf16.msra.mxu2 %v2790_v26  ;;  %856 = vmatpush.bf16.msra.mxu1 %v2790_v26  ;;  %v2853_v26 = vld [vmem:[%s5278_s4 + $0x90] sm:$0xf] }
 0x11b   :  { %3475 = vrot.lane.b32.xlu2 %v3474_v45, %s3706_s3  ;;  %v2871_v45 = vld [vmem:[%s5278_s4 + $0xb8] sm:$0xf0]  ;;  %v2854_v42 = vor.u32 %v3221_v31, %v2853_v26 }
 0x11c   :  { %3485 = vrot.lane.b32.xlu1 %v3484_v21, %s3708_s14  ;;  %3480 = vrot.lane.b32.xlu0 %v3479_v53, %s3707_s13  ;;  %v2874_v54 = vor.u32 %v3224_v40, %v2871_v45  ;;  %v2786_v21 = vor.u32 %v3202_v48, %v2783_v51 }
 0x11e   :  { %1010 = vmatpush.bf16.msrb.mxu3 %v2874_v54  ;;  %3307 = vmatpush.bf16.msra.mxu2 %v2782_v2  ;;  %v185_v54 = vld [vmem:[#allocation2 + $0x47] sm:$0xff] }
 0x11f   :  { %857 = vmatpush.bf16.msra.mxu1 %v2782_v2 }
 0x122   :  { %1011 = vmatpush.bf16.msrb.mxu3 %v2866_v7  ;;  %889 = vmatpush.bf16.msrb.mxu2 %v2902_v11  ;;  %v3219_v11 = vld [vmem:[%s5278_s4 + $0x84] sm:$0xf0] }
 0x123   :  { %3490 = vrot.lane.b32.xlu2 %v3489_v63, %s3706_s3  ;;  %v2810_v63 = vor.u32 %v3208_v29, %v2807_v50  ;;  %v2846_v37 = vor.u32 %v3219_v11, %v2845_v9  ;;  %v173_v9 = vld [vmem:[%s5275_s1 + $0x40] sm:$0xff] }
 0x125   :  { %v4093_v10 = vpop.permute.xlu2 %3335  ;;  %971 = vmatpush.bf16.msrb.mxu0 %v2810_v63 }
 0x126   :  { %1012 = vmatpush.bf16.msrb.mxu3 %v2858_v38  ;;  %890 = vmatpush.bf16.msrb.mxu2 %v2894_v15  ;;  %v3709_v38 = vmov 0   ;;  %v3338_v19 = vunpack.i.h.bf16 %v4093_v10  ;;  %v3337_v27 = vunpack.i.l.bf16 %v4093_v10 }
 0x127   :  { %3494 = vset.pattern.permute.xlu0 %v3709_v38  ;;  %3495 = vset.pattern.permute.xlu1 %v3709_v38 }
 0x128   :  { %1110 = vperm.xlu0 %3494, %v165_v57   ;;  %3496 = vset.pattern.permute.xlu2 %v3709_v38 }
 0x129   :  { %972 = vmatpush.bf16.msrb.mxu0 %v2802_v20  ;;  %1115 = vperm.xlu1 %3495, %v166_v47  }
 0x12a   :  { %1013 = vmatpush.bf16.msrb.mxu3 %v2850_v24  ;;  %891 = vmatpush.bf16.msrb.mxu2 %v2886_v30  ;;  %v225_v24 = vld [vmem:[#allocation2 + $0xa] sm:$0xff] }
 0x12d   :  { %v4131_v35 = vpop.permute.xlu2 %3340  ;;  %973 = vmatpush.bf16.msrb.mxu0 %v2794_v41 }
 0x12e   :  { %892 = vmatpush.bf16.msrb.mxu2 %v2878_v49  ;;  %v3343_v31 = vunpack.i.h.bf16 %v4131_v35 }
 0x131   :  { %974 = vmatpush.bf16.msrb.mxu0 %v2786_v21 }
 0x132   :  { %893 = vmatpush.bf16.msrb.mxu2 %v2870_v55 }
 0x135   :  { %v3326_v23 = vpop.permute.xlu1 %3325  ;;  %v4157_v53 = vpop.permute.xlu2 %3355 }
 0x136   :  { %v3316_v52 = vpop.permute.xlu0 %3315  ;;  %894 = vmatpush.bf16.msrb.mxu2 %v2862_v59  ;;  %v3328_v2 = vunpack.i.h.bf16 %v3326_v23  ;;  %v3327_v3 = vunpack.i.l.bf16 %v3326_v23  ;;  %v3358_v28 = vunpack.i.h.bf16 %v4157_v53  ;;  %v3357_v30 = vunpack.i.l.bf16 %v4157_v53 }
 0x137   :  { %v3318_v34 = vunpack.i.h.bf16 %v3316_v52  ;;  %v3317_v60 = vunpack.i.l.bf16 %v3316_v52  ;;  %v170_v52 = vld [vmem:[%s5275_s1 + $0x28] sm:$0xff] }
 0x138   :  { %1135 = vperm.xlu0 %3494, %v170_v52  }
 0x139   :  { %v526_v4 = vsel %vm37_vm0, %v185_v54, %v3317_v60  ;;  %v527_v5 = vsel %vm37_vm0, %v186_v61, %v3318_v34  ;;  %v3342_v34 = vunpack.i.l.bf16 %v4131_v35  ;;  %v178_v54 = vld [vmem:[#allocation2 + $0xf] sm:$0xff]  ;;  %v177_v61 = vld [vmem:[#allocation2 + $0x7] sm:$0xff] }
 0x13a   :  { %895 = vmatpush.bf16.msrb.mxu2 %v2854_v42 }
 0x13d   :  { %v4173_v6 = vpop.permute.xlu2 %3370 }
 0x13e   :  { %v3331_v40 = vpop.permute.xlu1 %3330  ;;  %v3321_v45 = vpop.permute.xlu0 %3320  ;;  %896 = vmatpush.bf16.msrb.mxu2 %v2846_v37 }
 0x13f   :  { %v3323_v0 = vunpack.i.h.bf16 %v3321_v45  ;;  %v3322_v1 = vunpack.i.l.bf16 %v3321_v45  ;;  %v3333_v12 = vunpack.i.h.bf16 %v3331_v40  ;;  %v3332_v13 = vunpack.i.l.bf16 %v3331_v40 }
 0x140   :  { %1150 = vperm.xlu0 %3494, %v173_v9  }
 0x141   :  { %v539_v7 = vsel %vm530_vm1, %v526_v4, %v3322_v1  ;;  %v540_v8 = vsel %vm530_vm1, %v527_v5, %v3323_v0  ;;  %v529_v48 = vsel %vm37_vm0, %v188_v39, %v3333_v12  ;;  %v528_v49 = vsel %vm37_vm0, %v187_v36, %v3332_v13  ;;  %v168_v5 = vld [vmem:[%s5275_s1 + $0x18] sm:$0xff] }
 0x142   :  { %v552_v29 = vsel %vm543_vm2, %v539_v7, %v3327_v3  ;;  %v553_v50 = vsel %vm543_vm2, %v540_v8, %v3328_v2  ;;  %v541_v59 = vsel %vm530_vm1, %v528_v49, %v3337_v27  ;;  %v542_v26 = vsel %vm530_vm1, %v529_v48, %v3338_v19  ;;  %1125 = vperm.xlu1 %3495, %v168_v5   ;;  %v176_v39 = vld [vmem:[%s5275_s1 + $0x58] sm:$0xff] }
 0x143   :  { %v4188_v63 = vpack.c.bf16 %v553_v50, %v552_v29  ;;  %v554_v0 = vsel %vm543_vm2, %v541_v59, %v3342_v34  ;;  %v555_v1 = vsel %vm543_vm2, %v542_v26, %v3343_v31  ;;  %v3373_v2 = vunpack.i.h.bf16 %v4173_v6  ;;  %v179_v27 = vld [vmem:[#allocation2 + $0x17] sm:$0xff]  ;;  %v174_v31 = vld [vmem:[%s5275_s1 + $0x48] sm:$0xff] }
 0x144   :  { %v3372_v3 = vunpack.i.l.bf16 %v4173_v6  ;;  %v4232_v11 = vpack.c.bf16 %v555_v1, %v554_v0 }
 0x145   :  { %878 = vmatmul.bf16.vlgmr.msra.gmra.mxu2 %v4188_v63  ;;  %v4200_v51 = vpop.permute.xlu2 %3385 }
 0x146   :  { %v3351_v44 = vpop.permute.xlu1 %3350  ;;  %v3346_v17 = vpop.permute.xlu0 %3345 }
 0x147   :  { %v3353_v15 = vunpack.i.h.bf16 %v3351_v44  ;;  %v3352_v16 = vunpack.i.l.bf16 %v3351_v44  ;;  %v3348_v18 = vunpack.i.h.bf16 %v3346_v17  ;;  %v3347_v20 = vunpack.i.l.bf16 %v3346_v17  ;;  %v228_v17 = vld [vmem:[#allocation2 + $0x22] sm:$0xff] }
 0x148   :  { %1165 = vperm.xlu0 %3494, %v176_v39  }
 0x149   :  { %v557_v41 = vsel %vm37_vm0, %v226_v25, %v3348_v18  ;;  %v556_v46 = vsel %vm37_vm0, %v225_v24, %v3347_v20  ;;  %v3388_v18 = vunpack.i.h.bf16 %v4200_v51  ;;  %v3387_v20 = vunpack.i.l.bf16 %v4200_v51 }
 0x14a   :  { %v568_v21 = vsel %vm530_vm1, %v556_v46, %v3352_v16  ;;  %v569_v23 = vsel %vm530_vm1, %v557_v41, %v3353_v15  ;;  %v227_v16 = vld [vmem:[#allocation2 + $0x1a] sm:$0xff] }
 0x14b   :  { %v580_v53 = vsel %vm543_vm2, %v568_v21, %v3357_v30  ;;  %v581_v55 = vsel %vm543_vm2, %v569_v23, %v3358_v28  ;;  %v171_v28 = vld [vmem:[%s5275_s1 + $0x30] sm:$0xff] }
 0x14c   :  { %v4211_v56 = vpack.c.bf16 %v581_v55, %v580_v53  ;;  %1140 = vperm.xlu1 %3495, %v171_v28   ;;  %v180_v53 = vld [vmem:[#allocation2 + $0x1f] sm:$0xff] }
 0x14d   :  { %v3401_v50 = vpop.permute.xlu2 %3400 }
 0x14e   :  { %v3366_v58 = vpop.permute.xlu1 %3365  ;;  %v3361_v42 = vpop.permute.xlu0 %3360  ;;  %1014 = vmatmul.bf16.vlgmr.msrb.gmra.mxu3 %v4211_v56  ;;  %v3403_v55 = vunpack.i.h.bf16 %v3401_v50 }
 0x14f   :  { %v3368_v60 = vunpack.i.h.bf16 %v3366_v58  ;;  %v3367_v40 = vunpack.i.l.bf16 %v3366_v58  ;;  %v3363_v10 = vunpack.i.h.bf16 %v3361_v42  ;;  %v3362_v45 = vunpack.i.l.bf16 %v3361_v42 }
 0x150   :  { %v3402_v58 = vunpack.i.l.bf16 %v3401_v50 }
 0x151   :  { %v519_v4 = vsel %vm37_vm0, %v178_v54, %v3363_v10  ;;  %v518_v35 = vsel %vm37_vm0, %v177_v61, %v3362_v45 }
 0x152   :  { %v531_v7 = vsel %vm530_vm1, %v518_v35, %v3367_v40  ;;  %v532_v8 = vsel %vm530_vm1, %v519_v4, %v3368_v60  ;;  %v229_v4 = vld [vmem:[#allocation2 + $0x2a] sm:$0xff]  ;;  %v230_v35 = vld [vmem:[#allocation2 + $0x32] sm:$0xff] }
 0x153   :  { %v544_v6 = vsel %vm543_vm2, %v531_v7, %v3372_v3  ;;  %v545_v29 = vsel %vm543_vm2, %v532_v8, %v3373_v2 }
 0x154   :  { %v592_v57 = vpack.c.bf16 %v545_v29, %v544_v6  ;;  %1155 = vperm.xlu1 %3495, %v174_v31  }
 0x155   :  { %883 = vmatmul.bf16.gmra.mxu2 %v4232_v11  ;;  %v3416_v49 = vpop.permute.xlu2 %3415 }
 0x156   :  { %v3381_v37 = vpop.permute.xlu1 %3380  ;;  %v3376_v12 = vpop.permute.xlu0 %3375  ;;  %858 = vmatmul.bf16.vlgmr.msra.gmra.mxu1 %v592_v57  ;;  %975 = vmatmul.bf16.vlgmr.msrb.gmra.mxu0 %v592_v57  ;;  %v3418_v5 = vunpack.i.h.bf16 %v3416_v49  ;;  %v3417_v7 = vunpack.i.l.bf16 %v3416_v49 }
 0x157   :  { %v3383_v38 = vunpack.i.h.bf16 %v3381_v37  ;;  %v3382_v44 = vunpack.i.l.bf16 %v3381_v37  ;;  %v3378_v13 = vunpack.i.h.bf16 %v3376_v12  ;;  %v3377_v15 = vunpack.i.l.bf16 %v3376_v12 }
 0x159   :  { %v559_v24 = vsel %vm37_vm0, %v228_v17, %v3378_v13  ;;  %v558_v25 = vsel %vm37_vm0, %v227_v16, %v3377_v15  ;;  %v3236_v17 = vld [vmem:[%s5278_s4 + $0x114] sm:$0xf] }
 0x15a   :  { %v570_v30 = vsel %vm530_vm1, %v558_v25, %v3382_v44  ;;  %v571_v36 = vsel %vm530_vm1, %v559_v24, %v3383_v38  ;;  %v182_v24 = vld [vmem:[#allocation2 + $0x2f] sm:$0xff] }
 0x15b   :  { %v582_v41 = vsel %vm543_vm2, %v570_v30, %v3387_v20  ;;  %v583_v46 = vsel %vm543_vm2, %v571_v36, %v3388_v18  ;;  %v2919_v18 = vld [vmem:[%s5278_s4 + $0x118] sm:$0xf0]  ;;  %v181_v20 = vld [vmem:[#allocation2 + $0x27] sm:$0xff] }
 0x15c   :  { %v4251_v47 = vpack.c.bf16 %v583_v46, %v582_v41  ;;  %v2922_v25 = vor.u32 %v3236_v17, %v2919_v18  ;;  %v3234_v41 = vld [vmem:[%s5278_s4 + $0x104] sm:$0xf]  ;;  %v2911_v46 = vld [vmem:[%s5278_s4 + $0x108] sm:$0xf0] }
 0x15d   :  { %v3431_v3 = vpop.permute.xlu2 %3430 }
 0x15e   :  { %v3396_v48 = vpop.permute.xlu1 %3395  ;;  %v3391_v23 = vpop.permute.xlu0 %3390  ;;  %1019 = vmatmul.bf16.gmra.mxu3 %v4251_v47  ;;  %v3433_v28 = vunpack.i.h.bf16 %v3431_v3  ;;  %v3432_v30 = vunpack.i.l.bf16 %v3431_v3  ;;  %1051 = vmatpush.bf16.msrb.mxu1 %v2922_v25 }
 0x15f   :  { %v3398_v51 = vunpack.i.h.bf16 %v3396_v48  ;;  %v3397_v21 = vunpack.i.l.bf16 %v3396_v48  ;;  %v3393_v52 = vunpack.i.h.bf16 %v3391_v23  ;;  %v3392_v19 = vunpack.i.l.bf16 %v3391_v23  ;;  %v169_v48 = vld [vmem:[%s5275_s1 + $0x20] sm:$0xff] }
 0x161   :  { %v521_v59 = vsel %vm37_vm0, %v180_v53, %v3393_v52  ;;  %v520_v26 = vsel %vm37_vm0, %v179_v27, %v3392_v19  ;;  %v2914_v19 = vor.u32 %v3234_v41, %v2911_v46  ;;  %v234_v41 = vld [vmem:[#allocation2 + $0x52] sm:$0xff] }
 0x162   :  { %v533_v34 = vsel %vm530_vm1, %v520_v26, %v3397_v21  ;;  %v534_v60 = vsel %vm530_vm1, %v521_v59, %v3398_v51 }
 0x163   :  { %v546_v40 = vsel %vm543_vm2, %v533_v34, %v3402_v58  ;;  %v547_v42 = vsel %vm543_vm2, %v534_v60, %v3403_v55  ;;  %1052 = vmatpush.bf16.msrb.mxu1 %v2914_v19  ;;  %v172_v34 = vld [vmem:[%s5275_s1 + $0x38] sm:$0xff] }
 0x164   :  { %v595_v10 = vpack.c.bf16 %v547_v42, %v546_v40  ;;  %v231_v60 = vld [vmem:[#allocation2 + $0x3a] sm:$0xff]  ;;  %v232_v40 = vld [vmem:[#allocation2 + $0x42] sm:$0xff] }
 0x165   :  { %897 = vmatmul.bf16.vlgmr.msrb.gmra.mxu2 %v4211_v56  ;;  %v167_v56 = vld [vmem:[%s5275_s1 + $0x10] sm:$0xff]  ;;  %v3446_v49 = vpop.permute.xlu2 %3445 }
 0x166   :  { %v3411_v45 = vpop.permute.xlu1 %3410  ;;  %v3406_v0 = vpop.permute.xlu0 %3405  ;;  %863 = vmatmul.bf16.gmra.mxu1 %v595_v10  ;;  %980 = vmatmul.bf16.gmra.mxu0 %v595_v10  ;;  %v3448_v42 = vunpack.i.h.bf16 %v3446_v49  ;;  %v3447_v10 = vunpack.i.l.bf16 %v3446_v49 }
 0x167   :  { %v3413_v54 = vunpack.i.h.bf16 %v3411_v45  ;;  %v3412_v61 = vunpack.i.l.bf16 %v3411_v45  ;;  %v3408_v1 = vunpack.i.h.bf16 %v3406_v0  ;;  %v3407_v2 = vunpack.i.l.bf16 %v3406_v0  ;;  %1120 = vperm.xlu2 %3496, %v167_v56   ;;  %v175_v56 = vld [vmem:[%s5275_s1 + $0x50] sm:$0xff] }
 0x169   :  { %v561_v8 = vsel %vm37_vm0, %v230_v35, %v3408_v1  ;;  %v560_v9 = vsel %vm37_vm0, %v229_v4, %v3407_v2 }
 0x16a   :  { %v572_v6 = vsel %vm530_vm1, %v560_v9, %v3412_v61  ;;  %v573_v29 = vsel %vm530_vm1, %v561_v8, %v3413_v54 }
 0x16b   :  { %v584_v50 = vsel %vm543_vm2, %v572_v6, %v3417_v7  ;;  %v585_v57 = vsel %vm543_vm2, %v573_v29, %v3418_v5  ;;  %v183_v6 = vld [vmem:[#allocation2 + $0x37] sm:$0xff]  ;;  %v184_v29 = vld [vmem:[#allocation2 + $0x3f] sm:$0xff] }
 0x16c   :  { %v4273_v37 = vpack.c.bf16 %v585_v57, %v584_v50 }
 0x16d   :  { %v3461_v2 = vpop.permute.xlu2 %3460 }
 0x16e   :  { %v3426_v38 = vpop.permute.xlu1 %3425  ;;  %v3421_v13 = vpop.permute.xlu0 %3420  ;;  %1024 = vmatmul.bf16.gmra.mxu3 %v4273_v37  ;;  %v3463_v50 = vunpack.i.h.bf16 %v3461_v2  ;;  %v3462_v57 = vunpack.i.l.bf16 %v3461_v2 }
 0x16f   :  { %v3428_v44 = vunpack.i.h.bf16 %v3426_v38  ;;  %v3427_v12 = vunpack.i.l.bf16 %v3426_v38  ;;  %v3423_v15 = vunpack.i.h.bf16 %v3421_v13  ;;  %v3422_v16 = vunpack.i.l.bf16 %v3421_v13  ;;  %1130 = vperm.xlu2 %3496, %v169_v48  }
 0x171   :  { %v523_v36 = vsel %vm37_vm0, %v182_v24, %v3423_v15  ;;  %v522_v39 = vsel %vm37_vm0, %v181_v20, %v3422_v16 }
 0x172   :  { %v535_v51 = vsel %vm530_vm1, %v522_v39, %v3427_v12  ;;  %v536_v21 = vsel %vm530_vm1, %v523_v36, %v3428_v44  ;;  %v233_v39 = vld [vmem:[#allocation2 + $0x4a] sm:$0xff] }
 0x173   :  { %v548_v23 = vsel %vm543_vm2, %v535_v51, %v3432_v30  ;;  %v549_v52 = vsel %vm543_vm2, %v536_v21, %v3433_v28 }
 0x174   :  { %v598_v27 = vpack.c.bf16 %v549_v52, %v548_v23 }
 0x175   :  { %902 = vmatmul.bf16.gmra.mxu2 %v4251_v47  ;;  %v3476_v20 = vpop.permute.xlu2 %3475 }
 0x176   :  { %v3441_v53 = vpop.permute.xlu1 %3440  ;;  %v3436_v59 = vpop.permute.xlu0 %3435  ;;  %868 = vmatmul.bf16.gmra.mxu1 %v598_v27  ;;  %985 = vmatmul.bf16.gmra.mxu0 %v598_v27  ;;  %v3478_v46 = vunpack.i.h.bf16 %v3476_v20  ;;  %v3477_v48 = vunpack.i.l.bf16 %v3476_v20  ;;  %v3239_v20 = vld [vmem:[%s5280_s6 + $0x4] sm:$0xf0] }
 0x177   :  { %v3443_v55 = vunpack.i.h.bf16 %v3441_v53  ;;  %v3442_v58 = vunpack.i.l.bf16 %v3441_v53  ;;  %v3438_v26 = vunpack.i.h.bf16 %v3436_v59  ;;  %v3437_v31 = vunpack.i.l.bf16 %v3436_v59  ;;  %1145 = vperm.xlu2 %3496, %v172_v34   ;;  %v236_v59 = vld [vmem:[#allocation2 + $0x62] sm:$0xff]  ;;  %v235_v34 = vld [vmem:[#allocation2 + $0x5a] sm:$0xff] }
 0x179   :  { %v563_v45 = vsel %vm37_vm0, %v232_v40, %v3438_v26  ;;  %v562_v47 = vsel %vm37_vm0, %v231_v60, %v3437_v31 }
 0x17a   :  { %v574_v54 = vsel %vm530_vm1, %v562_v47, %v3442_v58  ;;  %v575_v61 = vsel %vm530_vm1, %v563_v45, %v3443_v55 }
 0x17b   :  { %v586_v0 = vsel %vm543_vm2, %v574_v54, %v3447_v10  ;;  %v587_v1 = vsel %vm543_vm2, %v575_v61, %v3448_v42 }
 0x17c   :  { %v602_v3 = vpack.c.bf16 %v587_v1, %v586_v0 }
 0x17d   :  { %v3491_v42 = vpop.permute.xlu2 %3490 }
 0x17e   :  { %v3456_v4 = vpop.permute.xlu1 %3455  ;;  %v3451_v7 = vpop.permute.xlu0 %3450  ;;  %1029 = vmatmul.bf16.gmra.mxu3 %v602_v3  ;;  %v3493_v47 = vunpack.i.h.bf16 %v3491_v42  ;;  %v3492_v54 = vunpack.i.l.bf16 %v3491_v42 }
 0x17f   :  { %v3458_v35 = vunpack.i.h.bf16 %v3456_v4  ;;  %v3457_v5 = vunpack.i.l.bf16 %v3456_v4  ;;  %v3453_v8 = vunpack.i.h.bf16 %v3451_v7  ;;  %v3452_v9 = vunpack.i.l.bf16 %v3451_v7  ;;  %1160 = vperm.xlu2 %3496, %v175_v56   ;;  %v3249_v4 = vld [vmem:[%s5280_s6 + $0x54] sm:$0xf0]  ;;  %v2969_v7 = vld [vmem:[%s5280_s6 + $0x40] sm:$0xf]  ;;  %v2961_v56 = vld [vmem:[%s5280_s6 + $0x30] sm:$0xf] }
 0x181   :  { %v525_v38 = vsel %vm37_vm0, %v184_v29, %v3453_v8  ;;  %v524_v44 = vsel %vm37_vm0, %v183_v6, %v3452_v9  ;;  %v3247_v8 = vld [vmem:[%s5280_s6 + $0x44] sm:$0xf0] }
 0x182   :  { %v537_v12 = vsel %vm530_vm1, %v524_v44, %v3457_v5  ;;  %v538_v13 = vsel %vm530_vm1, %v525_v38, %v3458_v35  ;;  %v2970_v9 = vor.u32 %v3247_v8, %v2969_v7  ;;  %v2945_v44 = vld [vmem:[%s5280_s6 + $0x10] sm:$0xf] }
 0x183   :  { %v550_v15 = vsel %vm543_vm2, %v537_v12, %v3462_v57  ;;  %v551_v16 = vsel %vm543_vm2, %v538_v13, %v3463_v50  ;;  %v2953_v50 = vld [vmem:[%s5280_s6 + $0x20] sm:$0xf]  ;;  %v3243_v57 = vld [vmem:[%s5280_s6 + $0x24] sm:$0xf0]  ;;  %v3241_v12 = vld [vmem:[%s5280_s6 + $0x14] sm:$0xf0]  ;;  %v937_v13 = vpop.f32.mrf.mxu3 }
 0x184   :  { %v601_v17 = vpack.c.bf16 %v551_v16, %v550_v15  ;;  %v2954_v38 = vor.u32 %v3243_v57, %v2953_v50  ;;  %v2946_v15 = vor.u32 %v3241_v12, %v2945_v44 }
 0x185   :  { %907 = vmatmul.bf16.gmra.mxu2 %v4273_v37 }
 0x186   :  { %v3471_v18 = vpop.permute.xlu1 %3470  ;;  %v3466_v28 = vpop.permute.xlu0 %3465  ;;  %873 = vmatmul.bf16.gmra.mxu1 %v601_v17  ;;  %990 = vmatmul.bf16.gmra.mxu0 %v601_v17 }
 0x187   :  { %v3473_v24 = vunpack.i.h.bf16 %v3471_v18  ;;  %v3472_v25 = vunpack.i.l.bf16 %v3471_v18  ;;  %v3468_v30 = vunpack.i.h.bf16 %v3466_v28  ;;  %v3467_v36 = vunpack.i.l.bf16 %v3466_v28  ;;  %v2937_v18 = vld [vmem:[%s5280_s6] sm:$0xf] }
 0x189   :  { %v565_v49 = vsel %vm37_vm0, %v234_v41, %v3468_v30  ;;  %v564_v51 = vsel %vm37_vm0, %v233_v39, %v3467_v36 }
 0x18a   :  { %v576_v21 = vsel %vm530_vm1, %v564_v51, %v3472_v25  ;;  %v577_v37 = vsel %vm530_vm1, %v565_v49, %v3473_v24  ;;  %v2938_v24 = vor.u32 %v3239_v20, %v2937_v18 }
 0x18b   :  { %v588_v23 = vsel %vm543_vm2, %v576_v21, %v3477_v48  ;;  %v589_v52 = vsel %vm543_vm2, %v577_v37, %v3478_v46  ;;  %v939_v25 = vpop.f32.mrf.mxu3 }
 0x18c   :  { %v605_v19 = vpack.c.bf16 %v589_v52, %v588_v23 }
 0x18e   :  { %v3481_v27 = vpop.permute.xlu0 %3480  ;;  %1034 = vmatmul.bf16.gmra.mxu3 %v605_v19  ;;  %v3486_v53 = vpop.permute.xlu1 %3485 }
 0x18f   :  { %v3483_v55 = vunpack.i.h.bf16 %v3481_v27  ;;  %v3482_v58 = vunpack.i.l.bf16 %v3481_v27  ;;  %v3488_v26 = vunpack.i.h.bf16 %v3486_v53  ;;  %v3487_v31 = vunpack.i.l.bf16 %v3486_v53 }
 0x191   :  { %v567_v60 = vsel %vm37_vm0, %v236_v59, %v3483_v55  ;;  %v566_v40 = vsel %vm37_vm0, %v235_v34, %v3482_v58 }
 0x192   :  { %v578_v10 = vsel %vm530_vm1, %v566_v40, %v3487_v31  ;;  %v579_v45 = vsel %vm530_vm1, %v567_v60, %v3488_v26 }
 0x193   :  { %v590_v61 = vsel %vm543_vm2, %v578_v10, %v3492_v54  ;;  %v591_v0 = vsel %vm543_vm2, %v579_v45, %v3493_v47  ;;  %v942_v46 = vpop.f32.mrf.mxu3 }
 0x194   :  { %v608_v1 = vpack.c.bf16 %v591_v0, %v590_v61 }
 0x195   :  { %912 = vmatmul.bf16.gmra.mxu2 %v602_v3 }
 0x196   :  { %995 = vmatmul.bf16.gmra.mxu0 %v4188_v63  ;;  %2929 = vmatmul.msk.bf16.vlgmr.msrb.gmra.mxu1 %vm37_vm0, %v3842_v22  ;;  %v2993_v22 = vld [vmem:[%s5280_s6 + $0x70] sm:$0xf]  ;;  %v3253_v63 = vld [vmem:[%s5280_s6 + $0x74] sm:$0xf0] }
 0x197   :  { %v2994_v2 = vor.u32 %v3253_v63, %v2993_v22 }
 0x199   :  { %2147 = vmatpush.bf16.msra.mxu2 %v2994_v2 }
 0x19a   :  { %v4408_v37 = vpop.permute.xlu0 %1110 }
 0x19b   :  { %v4415_v59 = vpop.permute.xlu1 %1115 }
 0x19e   :  { %1039 = vmatmul.bf16.gmra.mxu3 %v608_v1 }
 0x1a5   :  { %917 = vmatmul.bf16.gmra.mxu2 %v605_v19 }
 0x1a6   :  { %1000 = vmatmul.bf16.gmra.mxu0 %v4232_v11  ;;  %2930 = vmatmul.msk.bf16.gmra.mxu1 %vm37_vm0, %v3860_v32  ;;  %v2985_v11 = vld [vmem:[%s5280_s6 + $0x60] sm:$0xf]  ;;  %v3251_v32 = vld [vmem:[%s5280_s6 + $0x64] sm:$0xf0] }
 0x1a7   :  { %v2986_v3 = vor.u32 %v3251_v32, %v2985_v11 }
 0x1a9   :  { %2148 = vmatpush.bf16.msra.mxu2 %v2986_v3 }
 0x1b4   :  { %v4434_v32 = vpop.permute.xlu1 %1125 }
 0x1b5   :  { %922 = vmatmul.bf16.gmra.mxu2 %v608_v1 }
 0x1b6   :  { %2931 = vmatmul.msk.bf16.gmra.mxu1 %vm37_vm0, %v3880_v43  ;;  %v2977_v43 = vld [vmem:[%s5280_s6 + $0x50] sm:$0xf] }
 0x1b7   :  { %v2978_v35 = vor.u32 %v3249_v4, %v2977_v43 }
 0x1b9   :  { %2149 = vmatpush.bf16.msra.mxu2 %v2978_v35 }
 0x1bd   :  { %2150 = vmatpush.bf16.msra.mxu2 %v2970_v9 }
 0x1c1   :  { %v4426_v47 = vpop.permute.xlu2 %1120 }
 0x1c6   :  { %2932 = vmatmul.msk.bf16.gmra.mxu1 %vm37_vm0, %v3903_v62  ;;  %v3245_v62 = vld [vmem:[%s5280_s6 + $0x34] sm:$0xf0] }
 0x1c7   :  { %v2962_v6 = vor.u32 %v3245_v62, %v2961_v56 }
 0x1c8   :  { %v4357_v5 = vpop.f32.mrf.mxu2 }
 0x1c9   :  { %2151 = vmatpush.bf16.msra.mxu2 %v2962_v6 }
 0x1cd   :  { %2152 = vmatpush.bf16.msra.mxu2 %v2954_v38  ;;  %v4445_v38 = vpop.permute.xlu2 %1130 }
 0x1d0   :  { %v4371_v29 = vpop.f32.mrf.mxu2 }
 0x1d1   :  { %2153 = vmatpush.bf16.msra.mxu2 %v2946_v15 }
 0x1d3   :  { %v859_v16 = vpop.f32.mrf.mxu1 }
 0x1d5   :  { %2154 = vmatpush.bf16.msra.mxu2 %v2938_v24 }
 0x1d6   :  { %2933 = vmatmul.msk.bf16.gmra.mxu1 %vm37_vm0, %v3917_v14  ;;  %v4400_v14 = vld [vmem:[%s5279_s5] sm:$0x3]  ;;  %s3710_s5 = smov [#allocation4]  }
 0x1d7   :  { %v4403_v36 = vperm.slane %v4400_v14, 0  ;;  %s2740_s0 = sshll.u32 %s3710_s5, 4  ;;  %s2741_s0 = int_to_ptr.vmem [resolvable:$true] %s2740_s0 }
 0x1d8   :  { %v4387_v17 = vpop.f32.mrf.mxu2 }
 0x1d9   :  { %v860_v39 = vadd.f32 %v859_v16, %v4403_v36 }
 0x1db   :  { %v861_v28 = vpop.f32.mrf.mxu1 }
 0x1dc   :  { %v862_v23 = vadd.f32 %v861_v28, %v4403_v36 }
 0x1e0   :  { %v4395_v30 = vpop.f32.mrf.mxu2 }
 0x1e3   :  { %v864_v49 = vpop.f32.mrf.mxu1 }
 0x1e4   :  { %v865_v26 = vadd.f32 %v864_v49, %v4403_v36 }
 0x1e6   :  { %2934 = vmatmul.msk.bf16.gmra.mxu1 %vm37_vm0, %v4049_v33  ;;  %v944_v33 = vpop.f32.mrf.mxu3 }
 0x1e8   :  { %v898_v41 = vpop.f32.mrf.mxu2 }
 0x1e9   :  { %v899_v48 = vadd.f32 %v898_v41, %v860_v39  ;;  %v4453_v39 = vpop.permute.xlu0 %1135 }
 0x1eb   :  { %v938_v51 = vadd.f32 %v937_v13, %v899_v48  ;;  %v866_v55 = vpop.f32.mrf.mxu1 }
 0x1ec   :  { %v867_v61 = vadd.f32 %v866_v55, %v4403_v36 }
 0x1ed   :  { %v1084_v21 = vmax.f32 %v938_v51, 0.0 }
 0x1ee   :  { %v947_v10 = vpop.f32.mrf.mxu3 }
 0x1ef   :  { %v1168_v52 = vmul.f32 %v4408_v37, %v1084_v21 }
 0x1f0   :  { %v900_v19 = vpop.f32.mrf.mxu2 }
 0x1f1   :  { %1192 = vst.msk [vmem:[#allocation3 + $0x8] sm:$0xff] %vm37_vm0, %v1168_v52  ;;  %v901_v27 = vadd.f32 %v900_v19, %v862_v23  ;;  %1216 = vrot.lane.b32.xlu0 %v1168_v52, %s3706_s3  ;;  %1265 = vrot.lane.b32.xlu2 %v1168_v52, %s3708_s14  ;;  %v3252_v19 = vld [vmem:[%s5280_s6 + $0x74] sm:$0xf] }
 0x1f3   :  { %v940_v53 = vadd.f32 %v939_v25, %v901_v27  ;;  %v869_v54 = vpop.f32.mrf.mxu1  ;;  %v2995_v27 = vld [vmem:[%s5280_s6 + $0x78] sm:$0xf0] }
 0x1f4   :  { %v870_v43 = vadd.f32 %v869_v54, %v4403_v36  ;;  %v2998_v55 = vor.u32 %v3252_v19, %v2995_v27 }
 0x1f5   :  { %v1086_v58 = vmax.f32 %v940_v53, 0.0 }
 0x1f6   :  { %v949_v3 = vpop.f32.mrf.mxu3  ;;  %2303 = vmatpush.bf16.msrb.mxu2 %v2998_v55 }
 0x1f7   :  { %v1170_v31 = vmul.f32 %v4415_v59, %v1086_v58  ;;  %v4470_v58 = vpop.permute.xlu1 %1140 }
 0x1f8   :  { %v903_v34 = vpop.f32.mrf.mxu2  ;;  %v1363_v35 = vld [vmem:[#allocation3 + $0x7] sm:$0xff] }
 0x1f9   :  { %1193 = vst.msk [vmem:[#allocation3 + $0x10] sm:$0xff] %vm37_vm0, %v1170_v31  ;;  %v904_v60 = vadd.f32 %v903_v34, %v865_v26  ;;  %1218 = vrot.lane.b32.xlu1 %v1170_v31, %s3706_s3  ;;  %1267 = vrot.lane.b32.xlu0 %v1170_v31, %s3708_s14  ;;  %v4422_v40 = vpack.c.bf16 %v1170_v31, %v1168_v52 }
 0x1fa   :  { %1314 = vrot.lane.b32.xlu2 %v1168_v52, %s3707_s13 }
 0x1fb   :  { %v943_v42 = vadd.f32 %v942_v46, %v904_v60  ;;  %2155 = vmatmul.bf16.vlgmr.msra.gmra.mxu2 %v4422_v40  ;;  %v871_v7 = vpop.f32.mrf.mxu1 }
 0x1fc   :  { %v872_v12 = vadd.f32 %v871_v7, %v4403_v36  ;;  %v3246_v7 = vld [vmem:[%s5280_s6 + $0x44] sm:$0xf] }
 0x1fd   :  { %v1088_v45 = vmax.f32 %v943_v42, 0.0 }
 0x1fe   :  { %v952_v20 = vpop.f32.mrf.mxu3 }
 0x1ff   :  { %v1172_v0 = vmul.f32 %v4426_v47, %v1088_v45  ;;  %v2987_v45 = vld [vmem:[%s5280_s6 + $0x68] sm:$0xf0]  ;;  %v4539_v27 = vpop.permute.xlu1 %1155 }
 0x200   :  { %v905_v1 = vpop.f32.mrf.mxu2  ;;  %v1364_v11 = vld [vmem:[#allocation3 + $0xf] sm:$0xff] }
 0x201   :  { %1194 = vst.msk [vmem:[#allocation3 + $0x18] sm:$0xff] %vm37_vm0, %v1172_v0  ;;  %v906_v22 = vadd.f32 %v905_v1, %v867_v61  ;;  %1269 = vrot.lane.b32.xlu1 %v1172_v0, %s3708_s14  ;;  %1316 = vrot.lane.b32.xlu0 %v1170_v31, %s3707_s13  ;;  %v3497_v9 = vpack.i.bf16 %v1364_v11, %v1363_v35  ;;  %v1375_v44 = vld [vmem:[#allocation3 + $0x9] sm:$0xff]  ;;  %v3248_v1 = vld [vmem:[%s5280_s6 + $0x54] sm:$0xf] }
 0x202   :  { %1220 = vrot.lane.b32.xlu2 %v1172_v0, %s3706_s3 }
 0x203   :  { %v945_v63 = vadd.f32 %v944_v33, %v906_v22  ;;  %v874_v24 = vpop.f32.mrf.mxu1  ;;  %v2979_v22 = vld [vmem:[%s5280_s6 + $0x58] sm:$0xf0] }
 0x204   :  { %v875_v41 = vadd.f32 %v874_v24, %v4403_v36 }
 0x205   :  { %v1090_v2 = vmax.f32 %v945_v63, 0.0 }
 0x206   :  { %v954_v23 = vpop.f32.mrf.mxu3 }
 0x207   :  { %v1174_v4 = vmul.f32 %v4434_v32, %v1090_v2  ;;  %v2982_v2 = vor.u32 %v3248_v1, %v2979_v22 }
 0x208   :  { %v908_v8 = vpop.f32.mrf.mxu2  ;;  %v1376_v50 = vld [vmem:[#allocation3 + $0x11] sm:$0xff] }
 0x209   :  { %1195 = vst.msk [vmem:[#allocation3 + $0x20] sm:$0xff] %vm37_vm0, %v1174_v4  ;;  %v909_v56 = vadd.f32 %v908_v8, %v870_v43  ;;  %1318 = vrot.lane.b32.xlu1 %v1172_v0, %s3707_s13  ;;  %1222 = vrot.lane.b32.xlu0 %v1174_v4, %s3706_s3  ;;  %v4441_v62 = vpack.c.bf16 %v1174_v4, %v1172_v0  ;;  %v1365_v34 = vld [vmem:[#allocation3 + $0x17] sm:$0xff] }
 0x20a   :  { %3498 = vrot.lane.b32.xlu2 %v3497_v9, %s3707_s13  ;;  %v3502_v15 = vpack.i.bf16 %v1376_v50, %v1375_v44  ;;  %v880_v43 = vadd.f32 %v4357_v5, %v4403_v36  ;;  %v2971_v8 = vld [vmem:[%s5280_s6 + $0x48] sm:$0xf0]  ;;  %v2963_v44 = vld [vmem:[%s5280_s6 + $0x38] sm:$0xf0] }
 0x20b   :  { %v948_v6 = vadd.f32 %v947_v10, %v909_v56  ;;  %2160 = vmatmul.bf16.gmra.mxu2 %v4441_v62  ;;  %v876_v52 = vpop.f32.mrf.mxu1  ;;  %v3250_v10 = vld [vmem:[%s5280_s6 + $0x64] sm:$0xf]  ;;  %v2974_v56 = vor.u32 %v3246_v7, %v2971_v8 }
 0x20c   :  { %v877_v26 = vadd.f32 %v876_v52, %v4403_v36  ;;  %v2990_v61 = vor.u32 %v3250_v10, %v2987_v45  ;;  %v1424_v7 = vld [vmem:[#allocation3 + $0x150] sm:$0xff] }
 0x20d   :  { %v1092_v57 = vmax.f32 %v948_v6, 0.0 }
 0x20e   :  { %2304 = vmatpush.bf16.msrb.mxu2 %v2990_v61  ;;  %v957_v11 = vpop.f32.mrf.mxu3  ;;  %v887_v61 = vadd.f32 %v4395_v30, %v4403_v36 }
 0x20f   :  { %v1176_v13 = vmul.f32 %v4445_v38, %v1092_v57  ;;  %v3244_v57 = vld [vmem:[%s5280_s6 + $0x34] sm:$0xf] }
 0x210   :  { %v910_v16 = vpop.f32.mrf.mxu2  ;;  %v1366_v53 = vld [vmem:[#allocation3 + $0x1f] sm:$0xff] }
 0x211   :  { %1196 = vst.msk [vmem:[#allocation3 + $0x28] sm:$0xff] %vm37_vm0, %v1176_v13  ;;  %v911_v18 = vadd.f32 %v910_v16, %v872_v12  ;;  %1271 = vrot.lane.b32.xlu1 %v1174_v4, %s3708_s14  ;;  %3503 = vrot.lane.b32.xlu0 %v3502_v15, %s3708_s14  ;;  %v3507_v42 = vpack.i.bf16 %v1366_v53, %v1365_v34  ;;  %v4518_v15 = vpop.permute.xlu0 %1150  ;;  %v1377_v16 = vld [vmem:[#allocation3 + $0x19] sm:$0xff] }
 0x212   :  { %1320 = vrot.lane.b32.xlu2 %v1174_v4, %s3707_s13  ;;  %2305 = vmatpush.bf16.msrb.mxu2 %v2982_v2  ;;  %v2939_v34 = vld [vmem:[%s5280_s6 + $0x8] sm:$0xf0] }
 0x213   :  { %v950_v25 = vadd.f32 %v949_v3, %v911_v18  ;;  %v4490_v3 = vpop.permute.xlu2 %1145  ;;  %v882_v18 = vadd.f32 %v4371_v29, %v4403_v36 }
 0x215   :  { %v1094_v28 = vmax.f32 %v950_v25, 0.0 }
 0x216   :  { %2306 = vmatpush.bf16.msrb.mxu2 %v2974_v56  ;;  %v959_v25 = vpop.f32.mrf.mxu3 }
 0x217   :  { %v1178_v46 = vmul.f32 %v4453_v39, %v1094_v28 }
 0x218   :  { %v913_v48 = vpop.f32.mrf.mxu2  ;;  %v1378_v50 = vld [vmem:[#allocation3 + $0x21] sm:$0xff] }
 0x219   :  { %1197 = vst.msk [vmem:[#allocation3 + $0x30] sm:$0xff] %vm37_vm0, %v1178_v46  ;;  %v914_v49 = vadd.f32 %v913_v48, %v875_v41  ;;  %1224 = vrot.lane.b32.xlu1 %v1176_v13, %s3706_s3  ;;  %1322 = vrot.lane.b32.xlu0 %v1176_v13, %s3707_s13  ;;  %v4460_v51 = vpack.c.bf16 %v1178_v46, %v1176_v13  ;;  %v3242_v41 = vld [vmem:[%s5280_s6 + $0x24] sm:$0xf]  ;;  %v4577_v30 = vpop.permute.xlu0 %1165 }
 0x21a   :  { %1273 = vrot.lane.b32.xlu2 %v1176_v13, %s3708_s14  ;;  %v2966_v13 = vor.u32 %v3244_v57, %v2963_v44  ;;  %v3512_v24 = vpack.i.bf16 %v1378_v50, %v1377_v16  ;;  %v3289_v50 = vld [vmem:[%s5280_s6 + $0x194] sm:$0xf0]  ;;  %v3287_v44 = vld [vmem:[%s5280_s6 + $0x184] sm:$0xf0] }
 0x21b   :  { %v953_v21 = vadd.f32 %v952_v20, %v914_v49  ;;  %2165 = vmatmul.bf16.gmra.mxu2 %v4460_v51 }
 0x21c   :  { %2307 = vmatpush.bf16.msrb.mxu2 %v2966_v13 }
 0x21d   :  { %v1096_v33 = vmax.f32 %v953_v21, 0.0  ;;  %v3240_v21 = vld [vmem:[%s5280_s6 + $0x14] sm:$0xf] }
 0x21e   :  { %v962_v55 = vpop.f32.mrf.mxu3 }
 0x21f   :  { %v1180_v31 = vmul.f32 %v4470_v58, %v1096_v33  ;;  %v885_v33 = vadd.f32 %v4387_v17, %v4403_v36 }
 0x220   :  { %v915_v60 = vpop.f32.mrf.mxu2 }
 0x221   :  { %1198 = vst.msk [vmem:[#allocation3 + $0x38] sm:$0xff] %vm37_vm0, %v1180_v31  ;;  %v916_v54 = vadd.f32 %v915_v60, %v877_v26  ;;  %1277 = vrot.lane.b32.xlu1 %v1180_v31, %s3708_s14  ;;  %1275 = vrot.lane.b32.xlu0 %v1178_v46, %s3708_s14 }
 0x222   :  { %3508 = vrot.lane.b32.xlu2 %v3507_v42, %s3707_s13 }
 0x223   :  { %v955_v0 = vadd.f32 %v954_v23, %v916_v54  ;;  %v2947_v23 = vld [vmem:[%s5280_s6 + $0x18] sm:$0xf0]  ;;  %v4563_v54 = vpop.permute.xlu2 %1160 }
 0x224   :  { %v2950_v19 = vor.u32 %v3240_v21, %v2947_v23 }
 0x225   :  { %v1098_v63 = vmax.f32 %v955_v0, 0.0 }
 0x227   :  { %v4495_v4 = vmul.f32 %v4490_v3, %v1098_v63  ;;  %v964_v63 = vpop.f32.mrf.mxu3 }
 0x228   :  { %v918_v35 = vpop.f32.mrf.mxu2 }
 0x229   :  { %1199 = vst.msk [vmem:[#allocation3 + $0x40] sm:$0xff] %vm37_vm0, %v4495_v4  ;;  %v919_v9 = vadd.f32 %v918_v35, %v880_v43  ;;  %1326 = vrot.lane.b32.xlu1 %v1180_v31, %s3707_s13  ;;  %1324 = vrot.lane.b32.xlu0 %v1178_v46, %s3707_s13  ;;  %v4508_v5 = vpack.c.bf16 %v4495_v4, %v1180_v31 }
 0x22a   :  { %1226 = vrot.lane.b32.xlu2 %v1178_v46, %s3706_s3  ;;  %v2955_v46 = vld [vmem:[%s5280_s6 + $0x28] sm:$0xf0] }
 0x22b   :  { %v958_v6 = vadd.f32 %v957_v11, %v919_v9  ;;  %2170 = vmatmul.bf16.gmra.mxu2 %v4508_v5  ;;  %v2958_v29 = vor.u32 %v3242_v41, %v2955_v46  ;;  %v1054_v41 = vpop.f32.mrf.mxu1  ;;  %v4620_v46 = vperm.slane %v4400_v14, 1 }
 0x22d   :  { %v1100_v12 = vmax.f32 %v958_v6, 0.0  ;;  %2308 = vmatpush.bf16.msrb.mxu2 %v2958_v29  ;;  %v3137_v6 = vld [vmem:[%s5280_s6 + $0x190] sm:$0xf] }
 0x22e   :  { %v3138_v57 = vor.u32 %v3289_v50, %v3137_v6 }
 0x22f   :  { %v1184_v20 = vmul.f32 %v4518_v15, %v1100_v12 }
 0x230   :  { %v920_v28 = vpop.f32.mrf.mxu2  ;;  %2270 = vmatpush.bf16.msra.mxu1 %v3138_v57 }
 0x231   :  { %1200 = vst.msk [vmem:[#allocation3 + $0x48] sm:$0xff] %vm37_vm0, %v1184_v20  ;;  %v921_v48 = vadd.f32 %v920_v28, %v882_v18  ;;  %1281 = vrot.lane.b32.xlu1 %v1184_v20, %s3708_s14  ;;  %3513 = vrot.lane.b32.xlu0 %v3512_v24, %s3708_s14  ;;  %v976_v18 = vpop.f32.mrf.mxu0  ;;  %v1015_v28 = vpop.f32.mrf.mxu3 }
 0x232   :  { %1228 = vrot.lane.b32.xlu2 %v1180_v31, %s3706_s3  ;;  %2309 = vmatpush.bf16.msrb.mxu2 %v2950_v19  ;;  %v3238_v31 = vld [vmem:[%s5280_s6 + $0x4] sm:$0xf]  ;;  %v977_v19 = vadd.f32 %v976_v18, %v4620_v46 }
 0x233   :  { %v960_v49 = vadd.f32 %v959_v25, %v921_v48  ;;  %v2942_v42 = vor.u32 %v3238_v31, %v2939_v34 }
 0x235   :  { %v1102_v52 = vmax.f32 %v960_v49, 0.0 }
 0x236   :  { %2310 = vmatpush.bf16.msrb.mxu2 %v2942_v42 }
 0x237   :  { %v4544_v53 = vmul.f32 %v4539_v27, %v1102_v52 }
 0x238   :  { %v923_v26 = vpop.f32.mrf.mxu2 }
 0x239   :  { %1201 = vst.msk [vmem:[#allocation3 + $0x50] sm:$0xff] %vm37_vm0, %v4544_v53  ;;  %v924_v60 = vadd.f32 %v923_v26, %v885_v33  ;;  %1330 = vrot.lane.b32.xlu1 %v1184_v20, %s3707_s13  ;;  %1230 = vrot.lane.b32.xlu0 %v4495_v4, %s3706_s3  ;;  %v4558_v17 = vpack.c.bf16 %v4544_v53, %v1184_v20  ;;  %v978_v48 = vpop.f32.mrf.mxu0  ;;  %v1017_v14 = vpop.f32.mrf.mxu3 }
 0x23a   :  { %1279 = vrot.lane.b32.xlu2 %v4495_v4, %s3708_s14  ;;  %v979_v33 = vadd.f32 %v978_v48, %v4620_v46  ;;  %v1016_v26 = vadd.f32 %v1015_v28, %v977_v19 }
 0x23b   :  { %v963_v10 = vadd.f32 %v962_v55, %v924_v60  ;;  %2175 = vmatmul.bf16.gmra.mxu2 %v4558_v17  ;;  %v1056_v55 = vpop.f32.mrf.mxu1 }
 0x23c   :  { %v1018_v31 = vadd.f32 %v1017_v14, %v979_v33 }
 0x23d   :  { %v1104_v45 = vmax.f32 %v963_v10, 0.0  ;;  %v1055_v10 = vadd.f32 %v1054_v41, %v1016_v26 }
 0x23f   :  { %v4568_v0 = vmul.f32 %v4563_v54, %v1104_v45  ;;  %v1057_v45 = vadd.f32 %v1056_v55, %v1018_v31  ;;  %v1380_v55 = vld [vmem:[#allocation3 + $0x31] sm:$0xff] }
 0x240   :  { %v925_v1 = vpop.f32.mrf.mxu2 }
 0x241   :  { %1202 = vst.msk [vmem:[#allocation3 + $0x58] sm:$0xff] %vm37_vm0, %v4568_v0  ;;  %v926_v22 = vadd.f32 %v925_v1, %v887_v61  ;;  %1285 = vrot.lane.b32.xlu1 %v4568_v0, %s3708_s14  ;;  %1328 = vrot.lane.b32.xlu0 %v4495_v4, %s3707_s13  ;;  %v981_v48 = vpop.f32.mrf.mxu0  ;;  %v1020_v33 = vpop.f32.mrf.mxu3 }
 0x242   :  { %1232 = vrot.lane.b32.xlu2 %v1184_v20, %s3706_s3 }
 0x243   :  { %v965_v2 = vadd.f32 %v964_v63, %v926_v22  ;;  %v1059_v14 = vpop.f32.mrf.mxu1 }
 0x245   :  { %v1106_v11 = vmax.f32 %v965_v2, 0.0 }
 0x247   :  { %v4580_v36 = vmul.f32 %v4577_v30, %v1106_v11  ;;  %v1085_v11 = vmax.f32 %v1055_v10, 0.0 }
 0x249   :  { %1203 = vst.msk [vmem:[#allocation3 + $0x60] sm:$0xff] %vm37_vm0, %v4580_v36  ;;  %1234 = vrot.lane.b32.xlu0 %v4544_v53, %s3706_s3  ;;  %v4588_v43 = vpack.c.bf16 %v4580_v36, %v4568_v0  ;;  %v1169_v6 = vmul.f32 %v4408_v37, %v1085_v11  ;;  %v983_v26 = vpop.f32.mrf.mxu0 }
 0x24a   :  { %1283 = vrot.lane.b32.xlu2 %v4544_v53, %s3708_s14 }
 0x24b   :  { %v1266_v4 = vpop.permute.xlu2 %1265  ;;  %2180 = vmatmul.bf16.gmra.mxu2 %v4588_v43 }
 0x24c   :  { %1302 = vst.msk [vmem:[#allocation3 + $0xe8] sm:$0xff] %vm37_vm0, %v1266_v4  ;;  %v1087_v4 = vmax.f32 %v1057_v45, 0.0 }
 0x24e   :  { %v1171_v50 = vmul.f32 %v4415_v59, %v1087_v4 }
 0x254   :  { %v1315_v35 = vpop.permute.xlu2 %1314 }
 0x255   :  { %1351 = vst.msk [vmem:[#allocation3 + $0x158] sm:$0xff] %vm37_vm0, %v1315_v35 }
 0x25b   :  { %2311 = vmatmul.bf16.vlgmr.msrb.gmra.mxu2 %v4422_v40  ;;  %v3129_v40 = vld [vmem:[%s5280_s6 + $0x180] sm:$0xf] }
 0x25c   :  { %v1221_v8 = vpop.permute.xlu2 %1220  ;;  %v1425_v9 = vld [vmem:[#allocation3 + $0x158] sm:$0xff]  ;;  %v3130_v12 = vor.u32 %v3287_v44, %v3129_v40 }
 0x25d   :  { %1255 = vst.msk [vmem:[#allocation3 + $0x88] sm:$0xff] %vm37_vm0, %v1221_v8  ;;  %v3517_v56 = vpack.i.bf16 %v1425_v9, %v1424_v7  ;;  %v1368_v7 = vld [vmem:[#allocation3 + $0x2f] sm:$0xff] }
 0x25e   :  { %2271 = vmatpush.bf16.msra.mxu1 %v3130_v12  ;;  %v1367_v12 = vld [vmem:[#allocation3 + $0x27] sm:$0xff] }
 0x25f   :  { %3518 = vrot.lane.b32.xlu2 %v3517_v56, %s3706_s3 }
 0x263   :  { %v1217_v13 = vpop.permute.xlu0 %1216 }
 0x264   :  { %1253 = vst.msk [vmem:[#allocation3 + $0x78] sm:$0xff] %vm37_vm0, %v1217_v13  ;;  %v4611_v16 = vpop.permute.xlu2 %3498 }
 0x265   :  { %v3500_v35 = vunpack.i.l.bf16 %v4611_v16 }
 0x267   :  { %1287 = vrot.lane.b32.xlu2 %v4580_v36, %s3708_s14 }
 0x26b   :  { %v1219_v20 = vpop.permute.xlu1 %1218  ;;  %2316 = vmatmul.bf16.gmra.mxu2 %v4441_v62  ;;  %v1268_v24 = vpop.permute.xlu0 %1267  ;;  %v1411_v62 = vld [vmem:[#allocation3 + $0xe4] sm:$0xff]  ;;  %v1387_v22 = vld [vmem:[#allocation3 + $0x76] sm:$0xff] }
 0x26c   :  { %1254 = vst.msk [vmem:[#allocation3 + $0x80] sm:$0xff] %vm37_vm0, %v1219_v20  ;;  %v1321_v25 = vpop.permute.xlu2 %1320 }
 0x26d   :  { %1303 = vst.msk [vmem:[#allocation3 + $0xf0] sm:$0xff] %vm37_vm0, %v1268_v24 }
 0x26e   :  { %1354 = vst.msk [vmem:[#allocation3 + $0x170] sm:$0xff] %vm37_vm0, %v1321_v25  ;;  %v1715_v25 = vsel %vm37_vm0, %v1169_v6, %v3500_v35  ;;  %v984_v35 = vadd.f32 %v983_v26, %v4620_v46 }
 0x273   :  { %v1270_v29 = vpop.permute.xlu1 %1269  ;;  %v1317_v49 = vpop.permute.xlu0 %1316  ;;  %v1388_v34 = vld [vmem:[#allocation3 + $0x7e] sm:$0xff] }
 0x274   :  { %1304 = vst.msk [vmem:[#allocation3 + $0xf8] sm:$0xff] %vm37_vm0, %v1270_v29  ;;  %v1274_v21 = vpop.permute.xlu2 %1273  ;;  %v1412_v23 = vld [vmem:[#allocation3 + $0xec] sm:$0xff]  ;;  %v3527_v2 = vpack.i.bf16 %v1388_v34, %v1387_v22 }
 0x275   :  { %1352 = vst.msk [vmem:[#allocation3 + $0x160] sm:$0xff] %vm37_vm0, %v1317_v49  ;;  %v3522_v52 = vpack.i.bf16 %v1412_v23, %v1411_v62  ;;  %v1379_v34 = vld [vmem:[#allocation3 + $0x29] sm:$0xff] }
 0x276   :  { %1306 = vst.msk [vmem:[#allocation3 + $0x108] sm:$0xff] %vm37_vm0, %v1274_v21  ;;  %v1428_v22 = vld [vmem:[#allocation3 + $0x170] sm:$0xff]  ;;  %v3547_v4 = vpack.i.bf16 %v1380_v55, %v1379_v34 }
 0x277   :  { %3523 = vrot.lane.b32.xlu1 %v3522_v52, %s3707_s13  ;;  %v1369_v34 = vld [vmem:[#allocation3 + $0x37] sm:$0xff] }
 0x27b   :  { %v1319_v60 = vpop.permute.xlu1 %1318  ;;  %2321 = vmatmul.bf16.gmra.mxu2 %v4460_v51  ;;  %v1413_v42 = vld [vmem:[#allocation3 + $0xf4] sm:$0xff]  ;;  %v1223_v61 = vpop.permute.xlu0 %1222  ;;  %v3501_v51 = vunpack.i.h.bf16 %v4611_v16  ;;  %v3542_v16 = vpack.i.bf16 %v1368_v7, %v1367_v12 }
 0x27c   :  { %1353 = vst.msk [vmem:[#allocation3 + $0x168] sm:$0xff] %vm37_vm0, %v1319_v60  ;;  %v4630_v1 = vpop.permute.xlu2 %3508  ;;  %v3532_v63 = vpack.i.bf16 %v1413_v42, %v1412_v23  ;;  %v1426_v9 = vld [vmem:[#allocation3 + $0x160] sm:$0xff]  ;;  %v1022_v7 = vpop.f32.mrf.mxu3 }
 0x27d   :  { %1256 = vst.msk [vmem:[#allocation3 + $0x90] sm:$0xff] %vm37_vm0, %v1223_v61  ;;  %v1716_v24 = vsel %vm37_vm0, %v1171_v50, %v3501_v51  ;;  %v1389_v61 = vld [vmem:[#allocation3 + $0x86] sm:$0xff]  ;;  %v982_v51 = vadd.f32 %v981_v48, %v4620_v46  ;;  %v3510_v48 = vunpack.i.l.bf16 %v4630_v1 }
 0x27e   :  { %3533 = vrot.lane.b32.xlu0 %v3532_v63, %s3708_s14 }
 0x27f   :  { %3528 = vrot.lane.b32.xlu1 %v3527_v2, %s3706_s3 }
 0x283   :  { %v1272_v8 = vpop.permute.xlu1 %1271  ;;  %v1427_v56 = vld [vmem:[#allocation3 + $0x168] sm:$0xff]  ;;  %v3504_v57 = vpop.permute.xlu0 %3503 }
 0x284   :  { %1305 = vst.msk [vmem:[#allocation3 + $0x100] sm:$0xff] %vm37_vm0, %v1272_v8  ;;  %v1227_v40 = vpop.permute.xlu2 %1226  ;;  %v4640_v44 = vpack.c.bf16 %v1427_v56, %v1426_v9  ;;  %v3537_v13 = vpack.i.bf16 %v1427_v56, %v1426_v9  ;;  %v3506_v18 = vunpack.i.h.bf16 %v3504_v57  ;;  %v3505_v20 = vunpack.i.l.bf16 %v3504_v57  ;;  %v1061_v8 = vpop.f32.mrf.mxu1 }
 0x285   :  { %1258 = vst.msk [vmem:[#allocation3 + $0xa0] sm:$0xff] %vm37_vm0, %v1227_v40  ;;  %v1021_v9 = vadd.f32 %v1020_v33, %v982_v51  ;;  %v1023_v56 = vadd.f32 %v1022_v7, %v984_v35  ;;  %v1372_v51 = vld [vmem:[#allocation3 + $0x4f] sm:$0xff] }
 0x286   :  { %3143 = vmatmul.msk.bf16.vlgmr.msra.gmra.mxu1 %vm37_vm0, %v4640_v44  ;;  %1334 = vrot.lane.b32.xlu0 %v4568_v0, %s3707_s13  ;;  %v4650_v28 = vsel %vm530_vm1, %v1715_v25, %v3505_v20  ;;  %v4653_v41 = vsel %vm530_vm1, %v1716_v24, %v3506_v18  ;;  %v3511_v25 = vunpack.i.h.bf16 %v4630_v1 }
 0x287   :  { %3543 = vrot.lane.b32.xlu1 %v3542_v16, %s3707_s13  ;;  %3538 = vrot.lane.b32.xlu2 %v3537_v13, %s3706_s3  ;;  %v1060_v50 = vadd.f32 %v1059_v14, %v1021_v9  ;;  %v1062_v57 = vadd.f32 %v1061_v8, %v1023_v56  ;;  %v1371_v56 = vld [vmem:[#allocation3 + $0x47] sm:$0xff] }
 0x289   :  { %v1091_v24 = vmax.f32 %v1062_v57, 0.0 }
 0x28b   :  { %v1225_v29 = vpop.permute.xlu1 %1224  ;;  %2326 = vmatmul.bf16.gmra.mxu2 %v4508_v5  ;;  %v1414_v49 = vld [vmem:[#allocation3 + $0xfc] sm:$0xff]  ;;  %v4658_v21 = vld [vmem:[#allocation3 + $0x104] sm:$0xff]  ;;  %v1323_v62 = vpop.permute.xlu0 %1322  ;;  %v1390_v5 = vld [vmem:[#allocation3 + $0x8e] sm:$0xff] }
 0x28c   :  { %1257 = vst.msk [vmem:[#allocation3 + $0x98] sm:$0xff] %vm37_vm0, %v1225_v29  ;;  %v1229_v23 = vpop.permute.xlu2 %1228  ;;  %v3552_v52 = vpack.i.bf16 %v1414_v49, %v1413_v42  ;;  %v3562_v19 = vpack.i.bf16 %v4658_v21, %v1414_v49  ;;  %v3557_v11 = vpack.i.bf16 %v1390_v5, %v1389_v61 }
 0x28d   :  { %1355 = vst.msk [vmem:[#allocation3 + $0x178] sm:$0xff] %vm37_vm0, %v1323_v62  ;;  %v1370_v62 = vld [vmem:[#allocation3 + $0x3f] sm:$0xff] }
 0x28e   :  { %1259 = vst.msk [vmem:[#allocation3 + $0xa8] sm:$0xff] %vm37_vm0, %v1229_v23  ;;  %3563 = vrot.lane.b32.xlu0 %v3562_v19, %s3708_s14 }
 0x28f   :  { %3553 = vrot.lane.b32.xlu1 %v3552_v52, %s3707_s13  ;;  %1332 = vrot.lane.b32.xlu2 %v4544_v53, %s3707_s13  ;;  %v1175_v52 = vmul.f32 %v4434_v32, %v1091_v24  ;;  %v3113_v24 = vld [vmem:[%s5280_s6 + $0x160] sm:$0xf] }
 0x293   :  { %v1278_v31 = vpop.permute.xlu1 %1277  ;;  %v1391_v60 = vld [vmem:[#allocation3 + $0x96] sm:$0xff]  ;;  %v1392_v42 = vld [vmem:[#allocation3 + $0x9e] sm:$0xff]  ;;  %v1276_v10 = vpop.permute.xlu0 %1275 }
 0x294   :  { %1308 = vst.msk [vmem:[#allocation3 + $0x118] sm:$0xff] %vm37_vm0, %v1278_v31  ;;  %v1280_v45 = vpop.permute.xlu2 %1279  ;;  %v1429_v63 = vld [vmem:[#allocation3 + $0x178] sm:$0xff]  ;;  %v3577_v2 = vpack.i.bf16 %v1392_v42, %v1391_v60  ;;  %v1718_v60 = vsel %vm37_vm0, %v1175_v52, %v3511_v25 }
 0x295   :  { %1307 = vst.msk [vmem:[#allocation3 + $0x110] sm:$0xff] %vm37_vm0, %v1276_v10  ;;  %v4670_v53 = vpack.c.bf16 %v1429_v63, %v1428_v22  ;;  %v3567_v20 = vpack.i.bf16 %v1429_v63, %v1428_v22  ;;  %v3587_v10 = vpack.i.bf16 %v1370_v62, %v1369_v34  ;;  %v1393_v7 = vld [vmem:[#allocation3 + $0xa6] sm:$0xff]  ;;  %v3283_v25 = vld [vmem:[%s5280_s6 + $0x164] sm:$0xf0] }
 0x296   :  { %1309 = vst.msk [vmem:[#allocation3 + $0x120] sm:$0xff] %vm37_vm0, %v1280_v45  ;;  %3578 = vrot.lane.b32.xlu0 %v3577_v2, %s3706_s3 }
 0x297   :  { %3558 = vrot.lane.b32.xlu1 %v3557_v11, %s3706_s3  ;;  %3548 = vrot.lane.b32.xlu2 %v3547_v4, %s3708_s14 }
 0x298   :  { %3144 = vmatmul.msk.bf16.gmra.mxu1 %vm37_vm0, %v4670_v53 }
 0x29b   :  { %v1327_v6 = vpop.permute.xlu1 %1326  ;;  %2331 = vmatmul.bf16.gmra.mxu2 %v4558_v17  ;;  %v1325_v40 = vpop.permute.xlu0 %1324  ;;  %v1089_v17 = vmax.f32 %v1060_v50, 0.0  ;;  %v3269_v50 = vld [vmem:[%s5280_s6 + $0xf4] sm:$0xf0] }
 0x29c   :  { %1357 = vst.msk [vmem:[#allocation3 + $0x188] sm:$0xff] %vm37_vm0, %v1327_v6  ;;  %v1233_v12 = vpop.permute.xlu2 %1232  ;;  %v1416_v13 = vld [vmem:[#allocation3 + $0x10c] sm:$0xff]  ;;  %v1417_v18 = vld [vmem:[#allocation3 + $0x114] sm:$0xff]  ;;  %v3617_v6 = vpack.i.bf16 %v1372_v51, %v1371_v56  ;;  %v3025_v56 = vld [vmem:[%s5280_s6 + $0xb0] sm:$0xf] }
 0x29d   :  { %1356 = vst.msk [vmem:[#allocation3 + $0x180] sm:$0xff] %vm37_vm0, %v1325_v40  ;;  %v3582_v16 = vpack.i.bf16 %v1417_v18, %v1416_v13  ;;  %v1173_v23 = vmul.f32 %v4426_v47, %v1089_v17  ;;  %v3572_v5 = vpack.i.bf16 %v1416_v13, %v4658_v21  ;;  %v1418_v22 = vld [vmem:[#allocation3 + $0x11c] sm:$0xff]  ;;  %v3049_v13 = vld [vmem:[%s5280_s6 + $0xe0] sm:$0xf]  ;;  %v3279_v51 = vld [vmem:[%s5280_s6 + $0x144] sm:$0xf0] }
 0x29e   :  { %1261 = vst.msk [vmem:[#allocation3 + $0xb8] sm:$0xff] %vm37_vm0, %v1233_v12  ;;  %v3597_v2 = vpack.i.bf16 %v1418_v22, %v1417_v18  ;;  %v3121_v40 = vld [vmem:[%s5280_s6 + $0x170] sm:$0xf]  ;;  %v3285_v12 = vld [vmem:[%s5280_s6 + $0x174] sm:$0xf0] }
 0x29f   :  { %1238 = vrot.lane.b32.xlu2 %v4580_v36, %s3706_s3  ;;  %3568 = vrot.lane.b32.xlu1 %v3567_v20, %s3706_s3  ;;  %v1717_v42 = vsel %vm37_vm0, %v1173_v23, %v3510_v48  ;;  %v3122_v20 = vor.u32 %v3285_v12, %v3121_v40  ;;  %v1382_v48 = vld [vmem:[#allocation3 + $0x41] sm:$0xff]  ;;  %v1384_v12 = vld [vmem:[#allocation3 + $0x51] sm:$0xff] }
 0x2a0   :  { %3583 = vrot.lane.b32.xlu0 %v3582_v16, %s3708_s14  ;;  %v3267_v16 = vld [vmem:[%s5280_s6 + $0xe4] sm:$0xf0] }
 0x2a1   :  { %v3050_v17 = vor.u32 %v3267_v16, %v3049_v13  ;;  %2225 = vmatpush.bf16.msra.mxu3 %v3122_v20  ;;  %v3017_v20 = vld [vmem:[%s5280_s6 + $0xa0] sm:$0xf]  ;;  %v3259_v16 = vld [vmem:[%s5280_s6 + $0xa4] sm:$0xf0] }
 0x2a3   :  { %v1282_v29 = vpop.permute.xlu1 %1281  ;;  %v1431_v49 = vld [vmem:[#allocation3 + $0x188] sm:$0xff]  ;;  %v3514_v19 = vpop.permute.xlu0 %3513 }
 0x2a4   :  { %1310 = vst.msk [vmem:[#allocation3 + $0x128] sm:$0xff] %vm37_vm0, %v1282_v29  ;;  %v1284_v33 = vpop.permute.xlu2 %1283  ;;  %v1430_v14 = vld [vmem:[#allocation3 + $0x180] sm:$0xff]  ;;  %v3516_v55 = vunpack.i.h.bf16 %v3514_v19  ;;  %v3515_v26 = vunpack.i.l.bf16 %v3514_v19 }
 0x2a5   :  { %1311 = vst.msk [vmem:[#allocation3 + $0x130] sm:$0xff] %vm37_vm0, %v1284_v33  ;;  %v3592_v31 = vpack.i.bf16 %v1431_v49, %v1430_v14  ;;  %v4695_v1 = vpack.c.bf16 %v1431_v49, %v1430_v14  ;;  %v1381_v33 = vld [vmem:[#allocation3 + $0x39] sm:$0xff]  ;;  %v3114_v14 = vor.u32 %v3283_v25, %v3113_v24  ;;  %v1383_v25 = vld [vmem:[#allocation3 + $0x49] sm:$0xff] }
 0x2a6   :  { %v4702_v45 = vsel %vm530_vm1, %v1717_v42, %v3515_v26  ;;  %v4705_v21 = vsel %vm530_vm1, %v1718_v60, %v3516_v55  ;;  %v3041_v26 = vld [vmem:[%s5280_s6 + $0xd0] sm:$0xf]  ;;  %v3281_v42 = vld [vmem:[%s5280_s6 + $0x154] sm:$0xf0]  ;;  %v3275_v24 = vld [vmem:[%s5280_s6 + $0x124] sm:$0xf0] }
 0x2a7   :  { %3593 = vrot.lane.b32.xlu2 %v3592_v31, %s3706_s3  ;;  %3573 = vrot.lane.b32.xlu1 %v3572_v5, %s3707_s13  ;;  %v3607_v5 = vpack.i.bf16 %v1382_v48, %v1381_v33  ;;  %v3265_v31 = vld [vmem:[%s5280_s6 + $0xd4] sm:$0xf0]  ;;  %v3105_v60 = vld [vmem:[%s5280_s6 + $0x150] sm:$0xf] }
 0x2a8   :  { %3145 = vmatmul.msk.bf16.gmra.mxu1 %vm37_vm0, %v4695_v1  ;;  %3588 = vrot.lane.b32.xlu0 %v3587_v10, %s3707_s13  ;;  %v3042_v34 = vor.u32 %v3265_v31, %v3041_v26  ;;  %v3001_v26 = vld [vmem:[%s5280_s6 + $0x80] sm:$0xf]  ;;  %v3255_v31 = vld [vmem:[%s5280_s6 + $0x84] sm:$0xf0] }
 0x2a9   :  { %2226 = vmatpush.bf16.msra.mxu3 %v3114_v14  ;;  %v3273_v14 = vld [vmem:[%s5280_s6 + $0x114] sm:$0xf0] }
 0x2ab   :  { %v1331_v61 = vpop.permute.xlu1 %1330  ;;  %2336 = vmatmul.bf16.gmra.mxu2 %v4588_v43  ;;  %v1231_v63 = vpop.permute.xlu0 %1230  ;;  %v1419_v11 = vld [vmem:[#allocation3 + $0x124] sm:$0xff] }
 0x2ac   :  { %1359 = vst.msk [vmem:[#allocation3 + $0x198] sm:$0xff] %vm37_vm0, %v1331_v61  ;;  %v3602_v9 = vpack.i.bf16 %v1419_v11, %v1418_v22  ;;  %v1420_v29 = vld [vmem:[#allocation3 + $0x12c] sm:$0xff]  ;;  %v3106_v61 = vor.u32 %v3281_v42, %v3105_v60  ;;  %v3271_v42 = vld [vmem:[%s5280_s6 + $0x104] sm:$0xf0] }
 0x2ad   :  { %1260 = vst.msk [vmem:[#allocation3 + $0xb0] sm:$0xff] %vm37_vm0, %v1231_v63  ;;  %v3627_v55 = vpack.i.bf16 %v1420_v29, %v1419_v11  ;;  %v3033_v22 = vld [vmem:[%s5280_s6 + $0xc0] sm:$0xf]  ;;  %v3263_v63 = vld [vmem:[%s5280_s6 + $0xc4] sm:$0xf0] }
 0x2ae   :  { %v3034_v11 = vor.u32 %v3263_v63, %v3033_v22  ;;  %2227 = vmatpush.bf16.msra.mxu3 %v3106_v61  ;;  %v3065_v60 = vld [vmem:[%s5280_s6 + $0x100] sm:$0xf]  ;;  %v1374_v22 = vld [vmem:[#allocation3 + $0x5f] sm:$0xff]  ;;  %v1373_v63 = vld [vmem:[#allocation3 + $0x57] sm:$0xff] }
 0x2af   :  { %1236 = vrot.lane.b32.xlu1 %v4568_v0, %s3706_s3  ;;  %v3057_v0 = vld [vmem:[%s5280_s6 + $0xf0] sm:$0xf] }
 0x2b0   :  { %3598 = vrot.lane.b32.xlu0 %v3597_v2, %s3707_s13  ;;  %v3058_v57 = vor.u32 %v3269_v50, %v3057_v0  ;;  %v3089_v0 = vld [vmem:[%s5280_s6 + $0x130] sm:$0xf] }
 0x2b2   :  { %2186 = vmatpush.bf16.msra.mxu0 %v3058_v57  ;;  %v3277_v57 = vld [vmem:[%s5280_s6 + $0x134] sm:$0xf0] }
 0x2b3   :  { %v1286_v4 = vpop.permute.xlu1 %1285  ;;  %v1329_v35 = vpop.permute.xlu0 %1328  ;;  %v1433_v23 = vld [vmem:[#allocation3 + $0x198] sm:$0xff]  ;;  %v3090_v40 = vor.u32 %v3277_v57, %v3089_v0 }
 0x2b4   :  { %1312 = vst.msk [vmem:[#allocation3 + $0x138] sm:$0xff] %vm37_vm0, %v1286_v4  ;;  %v1394_v43 = vld [vmem:[#allocation3 + $0xae] sm:$0xff] }
 0x2b5   :  { %1358 = vst.msk [vmem:[#allocation3 + $0x190] sm:$0xff] %vm37_vm0, %v1329_v35  ;;  %v3612_v8 = vpack.i.bf16 %v1394_v43, %v1393_v7  ;;  %v3097_v4 = vld [vmem:[%s5280_s6 + $0x140] sm:$0xf]  ;;  %v1395_v35 = vld [vmem:[#allocation3 + $0xb6] sm:$0xff] }
 0x2b6   :  { %2187 = vmatpush.bf16.msra.mxu0 %v3050_v17  ;;  %v3018_v17 = vor.u32 %v3259_v16, %v3017_v20 }
 0x2b7   :  { %3613 = vrot.lane.b32.xlu2 %v3612_v8, %s3706_s3  ;;  %3603 = vrot.lane.b32.xlu1 %v3602_v9, %s3708_s14  ;;  %v3098_v8 = vor.u32 %v3279_v51, %v3097_v4 }
 0x2b8   :  { %3618 = vrot.lane.b32.xlu0 %v3617_v6, %s3707_s13  ;;  %v3261_v6 = vld [vmem:[%s5280_s6 + $0xb4] sm:$0xf0] }
 0x2b9   :  { %v4736_v18 = vpop.permute.xlu2 %3518  ;;  %v3026_v50 = vor.u32 %v3261_v6, %v3025_v56  ;;  %2228 = vmatpush.bf16.msra.mxu3 %v3098_v8  ;;  %v1399_v56 = vld [vmem:[#allocation3 + $0x7a] sm:$0xff]  ;;  %v1400_v6 = vld [vmem:[#allocation3 + $0x82] sm:$0xff] }
 0x2ba   :  { %2188 = vmatpush.bf16.msra.mxu0 %v3042_v34  ;;  %v3002_v34 = vor.u32 %v3255_v31, %v3001_v26  ;;  %v3521_v8 = vunpack.i.h.bf16 %v4736_v18 }
 0x2bb   :  { %v1235_v49 = vpop.permute.xlu0 %1234  ;;  %v1421_v2 = vld [vmem:[#allocation3 + $0x134] sm:$0xff] }
 0x2bc   :  { %v1432_v62 = vld [vmem:[#allocation3 + $0x190] sm:$0xff]  ;;  %1262 = vst.msk [vmem:[#allocation3 + $0xc0] sm:$0xff] %vm37_vm0, %v1235_v49  ;;  %v3632_v9 = vpack.i.bf16 %v1421_v2, %v1420_v29  ;;  %v3637_v29 = vpack.i.bf16 %v1384_v12, %v1383_v25 }
 0x2bd   :  { %v4748_v52 = vpack.c.bf16 %v1433_v23, %v1432_v62  ;;  %v3622_v19 = vpack.i.bf16 %v1433_v23, %v1432_v62  ;;  %2229 = vmatpush.bf16.msra.mxu3 %v3090_v40  ;;  %v3009_v62 = vld [vmem:[%s5280_s6 + $0x90] sm:$0xf]  ;;  %v3257_v23 = vld [vmem:[%s5280_s6 + $0x94] sm:$0xf0] }
 0x2be   :  { %2189 = vmatpush.bf16.msra.mxu0 %v3034_v11  ;;  %v3010_v33 = vor.u32 %v3257_v23, %v3009_v62  ;;  %v986_v62 = vpop.f32.mrf.mxu0 }
 0x2bf   :  { %3146 = vmatmul.msk.bf16.gmra.mxu1 %vm37_vm0, %v4748_v52  ;;  %3623 = vrot.lane.b32.xlu2 %v3622_v19, %s3706_s3  ;;  %v3073_v19 = vld [vmem:[%s5280_s6 + $0x110] sm:$0xf] }
 0x2c0   :  { %3608 = vrot.lane.b32.xlu1 %v3607_v5, %s3708_s14  ;;  %3628 = vrot.lane.b32.xlu0 %v3627_v55, %s3707_s13  ;;  %v3074_v5 = vor.u32 %v3273_v14, %v3073_v19 }
 0x2c1   :  { %v1288_v10 = vpop.permute.xlu2 %1287 }
 0x2c2   :  { %1313 = vst.msk [vmem:[#allocation3 + $0x140] sm:$0xff] %vm37_vm0, %v1288_v10  ;;  %2190 = vmatpush.bf16.msra.mxu0 %v3026_v50  ;;  %v3066_v10 = vor.u32 %v3271_v42, %v3065_v60 }
 0x2c3   :  { %v1396_v7 = vld [vmem:[#allocation3 + $0xbe] sm:$0xff] }
 0x2c4   :  { %v3642_v43 = vpack.i.bf16 %v1396_v7, %v1395_v35 }
 0x2c6   :  { %2191 = vmatpush.bf16.msra.mxu0 %v3018_v17 }
 0x2c7   :  { %3643 = vrot.lane.b32.xlu2 %v3642_v43, %s3706_s3 }
 0x2c8   :  { %3633 = vrot.lane.b32.xlu1 %v3632_v9, %s3708_s14  ;;  %1336 = vrot.lane.b32.xlu0 %v4580_v36, %s3707_s13  ;;  %v3081_v36 = vld [vmem:[%s5280_s6 + $0x120] sm:$0xf]  ;;  %v3520_v9 = vunpack.i.l.bf16 %v4736_v18 }
 0x2c9   :  { %v1422_v13 = vld [vmem:[#allocation3 + $0x13c] sm:$0xff]  ;;  %v3082_v48 = vor.u32 %v3275_v24, %v3081_v36  ;;  %v1423_v55 = vld [vmem:[#allocation3 + $0x144] sm:$0xff] }
 0x2ca   :  { %v3652_v49 = vpack.i.bf16 %v1422_v13, %v1421_v2  ;;  %2192 = vmatpush.bf16.msra.mxu0 %v3010_v33  ;;  %v3657_v61 = vpack.i.bf16 %v1423_v55, %v1422_v13  ;;  %v3662_v2 = vpack.i.bf16 %v1374_v22, %v1373_v63  ;;  %v1064_v33 = vpop.f32.mrf.mxu1  ;;  %v988_v22 = vpop.f32.mrf.mxu0  ;;  %v1402_v63 = vld [vmem:[#allocation3 + $0x92] sm:$0xff] }
 0x2cb   :  { %2230 = vmatpush.bf16.msra.mxu3 %v3082_v48 }
 0x2ce   :  { %2193 = vmatpush.bf16.msra.mxu0 %v3002_v34 }
 0x2cf   :  { %2231 = vmatpush.bf16.msra.mxu3 %v3074_v5 }
 0x2d0   :  { %3638 = vrot.lane.b32.xlu1 %v3637_v29, %s3708_s14  ;;  %3653 = vrot.lane.b32.xlu0 %v3652_v49, %s3707_s13 }
 0x2d3   :  { %2232 = vmatpush.bf16.msra.mxu3 %v3066_v10 }
 0x2d8   :  { %3658 = vrot.lane.b32.xlu1 %v3657_v61, %s3708_s14 }
 0x2e0   :  { %3663 = vrot.lane.b32.xlu1 %v3662_v2, %s3707_s13  ;;  %v1401_v2 = vld [vmem:[#allocation3 + $0x8a] sm:$0xff] }
 0x2e1   :  { %v4836_v11 = vpop.permute.xlu2 %3538 }
 0x2e9   :  { %v3524_v4 = vpop.permute.xlu1 %3523  ;;  %v1333_v51 = vpop.permute.xlu2 %1332 }
 0x2ea   :  { %1360 = vst.msk [vmem:[#allocation3 + $0x1a0] sm:$0xff] %vm37_vm0, %v1333_v51  ;;  %v3526_v35 = vunpack.i.h.bf16 %v3524_v4  ;;  %v3525_v7 = vunpack.i.l.bf16 %v3524_v4  ;;  %v3541_v4 = vunpack.i.h.bf16 %v4836_v11  ;;  %v3540_v51 = vunpack.i.l.bf16 %v4836_v11 }
 0x2ec   :  { %v1751_v12 = vsel %vm37_vm0, %v1399_v56, %v3525_v7  ;;  %v1752_v13 = vsel %vm37_vm0, %v1400_v6, %v3526_v35  ;;  %v989_v56 = vadd.f32 %v988_v22, %v4620_v46 }
 0x2f0   :  { %v3534_v43 = vpop.permute.xlu0 %3533 }
 0x2f1   :  { %v3529_v0 = vpop.permute.xlu1 %3528  ;;  %v3536_v50 = vunpack.i.h.bf16 %v3534_v43  ;;  %v3535_v57 = vunpack.i.l.bf16 %v3534_v43  ;;  %v4841_v40 = vpop.permute.xlu2 %3548  ;;  %v1434_v5 = vld [vmem:[#allocation3 + $0x1a0] sm:$0xff] }
 0x2f2   :  { %v3531_v20 = vunpack.i.h.bf16 %v3529_v0  ;;  %v3530_v16 = vunpack.i.l.bf16 %v3529_v0 }
 0x2f3   :  { %v1764_v17 = vsel %vm530_vm1, %v1752_v13, %v3536_v50  ;;  %v1763_v36 = vsel %vm530_vm1, %v1751_v12, %v3535_v57  ;;  %v1385_v50 = vld [vmem:[#allocation3 + $0x59] sm:$0xff]  ;;  %v1386_v57 = vld [vmem:[#allocation3 + $0x61] sm:$0xff] }
 0x2f4   :  { %v1739_v18 = vsel %vm543_vm2, %v4650_v28, %v3530_v16  ;;  %v1740_v24 = vsel %vm543_vm2, %v4653_v41, %v3531_v20  ;;  %v1775_v25 = vsel %vm543_vm2, %v1763_v36, %v3520_v9  ;;  %v1776_v48 = vsel %vm543_vm2, %v1764_v17, %v3521_v8  ;;  %v1025_v41 = vpop.f32.mrf.mxu3  ;;  %v1066_v20 = vpop.f32.mrf.mxu1 }
 0x2f5   :  { %v4853_v29 = vpack.c.bf16 %v1740_v24, %v1739_v18  ;;  %v4855_v49 = vpack.c.bf16 %v1776_v48, %v1775_v25  ;;  %v987_v9 = vadd.f32 %v986_v62, %v4620_v46  ;;  %v3667_v17 = vpack.i.bf16 %v1386_v57, %v1385_v50  ;;  %v1403_v57 = vld [vmem:[#allocation3 + $0x9a] sm:$0xff] }
 0x2f7   :  { %2194 = vmatmul.bf16.vlgmr.msra.gmra.mxu0 %v4853_v29  ;;  %2233 = vmatmul.bf16.vlgmr.msra.gmra.mxu3 %v4855_v49  ;;  %v1026_v36 = vadd.f32 %v1025_v41, %v987_v9 }
 0x2f8   :  { %v1335_v23 = vpop.permute.xlu0 %1334 }
 0x2f9   :  { %v4859_v19 = vpop.permute.xlu1 %3543  ;;  %1361 = vst.msk [vmem:[#allocation3 + $0x1a8] sm:$0xff] %vm37_vm0, %v1335_v23  ;;  %v1239_v28 = vpop.permute.xlu2 %1238  ;;  %v1065_v48 = vadd.f32 %v1064_v33, %v1026_v36 }
 0x2fa   :  { %1264 = vst.msk [vmem:[#allocation3 + $0xd0] sm:$0xff] %vm37_vm0, %v1239_v28 }
 0x2fc   :  { %v1027_v11 = vpop.f32.mrf.mxu3 }
 0x2fd   :  { %v1028_v18 = vadd.f32 %v1027_v11, %v989_v56  ;;  %v1404_v11 = vld [vmem:[#allocation3 + $0xa2] sm:$0xff] }
 0x2ff   :  { %v1067_v62 = vadd.f32 %v1066_v20, %v1028_v18 }
 0x300   :  { %v3564_v14 = vpop.permute.xlu0 %3563  ;;  %v1435_v55 = vld [vmem:[#allocation3 + $0x1a8] sm:$0xff] }
 0x301   :  { %v3554_v26 = vpop.permute.xlu1 %3553  ;;  %v3566_v31 = vunpack.i.h.bf16 %v3564_v14  ;;  %v3565_v34 = vunpack.i.l.bf16 %v3564_v14  ;;  %v3647_v60 = vpack.i.bf16 %v1435_v55, %v1434_v5  ;;  %v4863_v42 = vpack.c.bf16 %v1435_v55, %v1434_v5 }
 0x302   :  { %v3556_v10 = vunpack.i.h.bf16 %v3554_v26  ;;  %v3555_v61 = vunpack.i.l.bf16 %v3554_v26  ;;  %v1093_v5 = vmax.f32 %v1065_v48, 0.0  ;;  %v1095_v55 = vmax.f32 %v1067_v62, 0.0  ;;  %v991_v26 = vpop.f32.mrf.mxu0 }
 0x303   :  { %3648 = vrot.lane.b32.xlu2 %v3647_v60, %s3706_s3  ;;  %3147 = vmatmul.msk.bf16.gmra.mxu1 %vm37_vm0, %v4863_v42 }
 0x304   :  { %v1754_v35 = vsel %vm37_vm0, %v1402_v63, %v3556_v10  ;;  %v1753_v7 = vsel %vm37_vm0, %v1401_v2, %v3555_v61  ;;  %v1177_v60 = vmul.f32 %v4445_v38, %v1093_v5  ;;  %v1030_v63 = vpop.f32.mrf.mxu3  ;;  %v3551_v2 = vunpack.i.h.bf16 %v4841_v40 }
 0x305   :  { %v1766_v43 = vsel %vm530_vm1, %v1754_v35, %v3566_v31  ;;  %v1765_v8 = vsel %vm530_vm1, %v1753_v7, %v3565_v34  ;;  %v3546_v31 = vunpack.i.h.bf16 %v4859_v19  ;;  %v3545_v34 = vunpack.i.l.bf16 %v4859_v19 }
 0x306   :  { %v1777_v6 = vsel %vm543_vm2, %v1765_v8, %v3540_v51  ;;  %v1778_v0 = vsel %vm543_vm2, %v1766_v43, %v3541_v4  ;;  %v3550_v4 = vunpack.i.l.bf16 %v4841_v40  ;;  %v1069_v51 = vpop.f32.mrf.mxu1  ;;  %v992_v5 = vadd.f32 %v991_v26, %v4620_v46 }
 0x307   :  { %v4878_v12 = vpack.c.bf16 %v1778_v0, %v1777_v6 }
 0x308   :  { %v3579_v13 = vpop.permute.xlu0 %3578 }
 0x309   :  { %v3559_v16 = vpop.permute.xlu1 %3558  ;;  %2238 = vmatmul.bf16.gmra.mxu3 %v4878_v12  ;;  %v3581_v61 = vunpack.i.h.bf16 %v3579_v13  ;;  %v3580_v22 = vunpack.i.l.bf16 %v3579_v13 }
 0x30a   :  { %v3561_v24 = vunpack.i.h.bf16 %v3559_v16  ;;  %v3560_v25 = vunpack.i.l.bf16 %v3559_v16  ;;  %v993_v13 = vpop.f32.mrf.mxu0 }
 0x30b   :  { %3668 = vrot.lane.b32.xlu2 %v3667_v17, %s3708_s14 }
 0x30c   :  { %v1741_v23 = vsel %vm543_vm2, %v4702_v45, %v3560_v25  ;;  %v1742_v28 = vsel %vm543_vm2, %v4705_v21, %v3561_v24  ;;  %v1179_v45 = vmul.f32 %v4453_v39, %v1095_v55  ;;  %v1719_v21 = vsel %vm37_vm0, %v1177_v60, %v3545_v34  ;;  %v3594_v34 = vpop.permute.xlu2 %3593 }
 0x30d   :  { %v4886_v14 = vpack.c.bf16 %v1742_v28, %v1741_v23  ;;  %v1731_v19 = vsel %vm530_vm1, %v1719_v21, %v3550_v4  ;;  %v1032_v23 = vpop.f32.mrf.mxu3  ;;  %v1031_v60 = vadd.f32 %v1030_v63, %v992_v5 }
 0x30e   :  { %v1720_v10 = vsel %vm37_vm0, %v1179_v45, %v3546_v31  ;;  %v1743_v56 = vsel %vm543_vm2, %v1731_v19, %v3580_v22  ;;  %v1071_v55 = vpop.f32.mrf.mxu1  ;;  %v994_v31 = vadd.f32 %v993_v13, %v4620_v46  ;;  %v1405_v19 = vld [vmem:[#allocation3 + $0xaa] sm:$0xff] }
 0x30f   :  { %2199 = vmatmul.bf16.gmra.mxu0 %v4886_v14  ;;  %v1732_v7 = vsel %vm530_vm1, %v1720_v10, %v3551_v2  ;;  %v1070_v21 = vadd.f32 %v1069_v51, %v1031_v60 }
 0x310   :  { %v1744_v6 = vsel %vm543_vm2, %v1732_v7, %v3581_v61  ;;  %v1033_v61 = vadd.f32 %v1032_v23, %v994_v31  ;;  %v1406_v7 = vld [vmem:[#allocation3 + $0xb2] sm:$0xff]  ;;  %v3131_v31 = vld [vmem:[%s5280_s6 + $0x188] sm:$0xf0] }
 0x311   :  { %v3569_v41 = vpop.permute.xlu1 %3568  ;;  %v4905_v36 = vpack.c.bf16 %v1744_v6, %v1743_v56  ;;  %v1097_v51 = vmax.f32 %v1070_v21, 0.0  ;;  %v3286_v23 = vld [vmem:[%s5280_s6 + $0x184] sm:$0xf] }
 0x312   :  { %v3584_v33 = vpop.permute.xlu0 %3583  ;;  %v3571_v40 = vunpack.i.h.bf16 %v3569_v41  ;;  %v3570_v20 = vunpack.i.l.bf16 %v3569_v41 }
 0x313   :  { %v3586_v0 = vunpack.i.h.bf16 %v3584_v33  ;;  %v3585_v50 = vunpack.i.l.bf16 %v3584_v33  ;;  %v996_v33 = vpop.f32.mrf.mxu0  ;;  %v1181_v21 = vmul.f32 %v4470_v58, %v1097_v51 }
 0x314   :  { %v3614_v13 = vpop.permute.xlu2 %3613 }
 0x315   :  { %v1035_v6 = vpop.f32.mrf.mxu3 }
 0x319   :  { %v3574_v35 = vpop.permute.xlu1 %3573 }
 0x31a   :  { %v3576_v43 = vunpack.i.h.bf16 %v3574_v35  ;;  %v3575_v8 = vunpack.i.l.bf16 %v3574_v35  ;;  %v4899_v9 = vpop.permute.xlu0 %3588  ;;  %v1072_v35 = vadd.f32 %v1071_v55, %v1033_v61 }
 0x31b   :  { %v3591_v60 = vunpack.i.h.bf16 %v4899_v9 }
 0x31c   :  { %v1755_v16 = vsel %vm37_vm0, %v1403_v57, %v3575_v8  ;;  %v1756_v17 = vsel %vm37_vm0, %v1404_v11, %v3576_v43  ;;  %v1074_v11 = vpop.f32.mrf.mxu1 }
 0x31d   :  { %v1767_v18 = vsel %vm530_vm1, %v1755_v16, %v3585_v50  ;;  %v1768_v24 = vsel %vm530_vm1, %v1756_v17, %v3586_v0  ;;  %v3596_v0 = vunpack.i.h.bf16 %v3594_v34  ;;  %v3595_v50 = vunpack.i.l.bf16 %v3594_v34  ;;  %v3288_v16 = vld [vmem:[%s5280_s6 + $0x194] sm:$0xf]  ;;  %v3139_v17 = vld [vmem:[%s5280_s6 + $0x198] sm:$0xf0]  ;;  %v998_v34 = vpop.f32.mrf.mxu0 }
 0x31e   :  { %v1779_v25 = vsel %vm543_vm2, %v1767_v18, %v3570_v20  ;;  %v1780_v48 = vsel %vm543_vm2, %v1768_v24, %v3571_v40  ;;  %v3142_v55 = vor.u32 %v3288_v16, %v3139_v17  ;;  %v3282_v17 = vld [vmem:[%s5280_s6 + $0x164] sm:$0xf] }
 0x31f   :  { %2204 = vmatmul.bf16.gmra.mxu0 %v4905_v36  ;;  %v4912_v62 = vpack.c.bf16 %v1780_v48, %v1779_v25  ;;  %v3284_v25 = vld [vmem:[%s5280_s6 + $0x174] sm:$0xf]  ;;  %v3123_v48 = vld [vmem:[%s5280_s6 + $0x178] sm:$0xf0] }
 0x320   :  { %2426 = vmatpush.bf16.msrb.mxu1 %v3142_v55  ;;  %v3107_v55 = vld [vmem:[%s5280_s6 + $0x158] sm:$0xf0] }
 0x321   :  { %v1237_v28 = vpop.permute.xlu1 %1236  ;;  %2243 = vmatmul.bf16.gmra.mxu3 %v4912_v62 }
 0x322   :  { %1263 = vst.msk [vmem:[#allocation3 + $0xc8] sm:$0xff] %vm37_vm0, %v1237_v28  ;;  %v3599_v41 = vpop.permute.xlu0 %3598  ;;  %v1099_v28 = vmax.f32 %v1072_v35, 0.0  ;;  %v999_v35 = vadd.f32 %v998_v34, %v4620_v46 }
 0x323   :  { %v3601_v45 = vunpack.i.h.bf16 %v3599_v41  ;;  %v3600_v10 = vunpack.i.l.bf16 %v3599_v41  ;;  %v3126_v41 = vor.u32 %v3284_v25, %v3123_v48 }
 0x324   :  { %v1183_v61 = vmul.f32 %v4490_v3, %v1099_v28  ;;  %v1076_v51 = vpop.f32.mrf.mxu1 }
 0x325   :  { %v1757_v63 = vsel %vm37_vm0, %v1405_v19, %v3600_v10  ;;  %v1758_v57 = vsel %vm37_vm0, %v1406_v7, %v3601_v45  ;;  %v3590_v45 = vunpack.i.l.bf16 %v4899_v9  ;;  %2381 = vmatpush.bf16.msrb.mxu3 %v3126_v41  ;;  %v3134_v10 = vor.u32 %v3286_v23, %v3131_v31 }
 0x326   :  { %v1722_v9 = vsel %vm37_vm0, %v1183_v61, %v3591_v60 }
 0x327   :  { %2427 = vmatpush.bf16.msrb.mxu1 %v3134_v10 }
 0x329   :  { %v3604_v22 = vpop.permute.xlu1 %3603  ;;  %v1397_v2 = vld [vmem:[#allocation3 + $0xc6] sm:$0xff]  ;;  %v1398_v4 = vld [vmem:[#allocation3 + $0xce] sm:$0xff] }
 0x32a   :  { %v3606_v26 = vunpack.i.h.bf16 %v3604_v22  ;;  %v3605_v43 = vunpack.i.l.bf16 %v3604_v22  ;;  %v4918_v8 = vpop.permute.xlu0 %3618  ;;  %v3672_v56 = vpack.i.bf16 %v1398_v4, %v1397_v2  ;;  %v997_v4 = vadd.f32 %v996_v33, %v4620_v46  ;;  %v3268_v33 = vld [vmem:[%s5280_s6 + $0xf4] sm:$0xf] }
 0x32b   :  { %v1408_v61 = vld [vmem:[#allocation3 + $0xc2] sm:$0xff] }
 0x32c   :  { %v1769_v40 = vsel %vm530_vm1, %v1757_v63, %v3605_v43  ;;  %v1770_v20 = vsel %vm530_vm1, %v1758_v57, %v3606_v26  ;;  %3673 = vrot.lane.b32.xlu0 %v3672_v56, %s3706_s3  ;;  %v3616_v26 = vunpack.i.h.bf16 %v3614_v13  ;;  %v3615_v43 = vunpack.i.l.bf16 %v3614_v13  ;;  %v3059_v57 = vld [vmem:[%s5280_s6 + $0xf8] sm:$0xf0]  ;;  %v3624_v13 = vpop.permute.xlu2 %3623 }
 0x32d   :  { %v1781_v18 = vsel %vm543_vm2, %v1769_v40, %v3595_v50  ;;  %v1782_v24 = vsel %vm543_vm2, %v1770_v20, %v3596_v0  ;;  %v1721_v56 = vsel %vm37_vm0, %v1181_v21, %v3590_v45  ;;  %v1037_v0 = vpop.f32.mrf.mxu3  ;;  %v3062_v16 = vor.u32 %v3268_v33, %v3059_v57  ;;  %v3278_v33 = vld [vmem:[%s5280_s6 + $0x144] sm:$0xf] }
 0x32e   :  { %v4942_v5 = vpack.c.bf16 %v1782_v24, %v1781_v18  ;;  %v3115_v18 = vld [vmem:[%s5280_s6 + $0x168] sm:$0xf0]  ;;  %v3280_v24 = vld [vmem:[%s5280_s6 + $0x154] sm:$0xf]  ;;  %v1036_v25 = vadd.f32 %v1035_v6, %v997_v4  ;;  %v1038_v48 = vadd.f32 %v1037_v0, %v999_v35  ;;  %v3626_v35 = vunpack.i.h.bf16 %v3624_v13 }
 0x32f   :  { %v3118_v28 = vor.u32 %v3282_v17, %v3115_v18  ;;  %2342 = vmatpush.bf16.msrb.mxu0 %v3062_v16  ;;  %v3110_v45 = vor.u32 %v3280_v24, %v3107_v55  ;;  %v1407_v6 = vld [vmem:[#allocation3 + $0xba] sm:$0xff]  ;;  %v3620_v16 = vunpack.i.l.bf16 %v4918_v8 }
 0x330   :  { %v1075_v34 = vadd.f32 %v1074_v11, %v1036_v25  ;;  %v1077_v60 = vadd.f32 %v1076_v51, %v1038_v48  ;;  %v1437_v18 = vld [vmem:[#allocation3 + $0x1b8] sm:$0xff] }
 0x331   :  { %2248 = vmatmul.bf16.gmra.mxu3 %v4942_v5 }
 0x332   :  { %v3609_v22 = vpop.permute.xlu1 %3608  ;;  %v3629_v2 = vpop.permute.xlu0 %3628  ;;  %2382 = vmatpush.bf16.msrb.mxu3 %v3118_v28  ;;  %v1101_v11 = vmax.f32 %v1075_v34, 0.0 }
 0x333   :  { %v3611_v19 = vunpack.i.h.bf16 %v3609_v22  ;;  %v3610_v7 = vunpack.i.l.bf16 %v3609_v22  ;;  %v3631_v41 = vunpack.i.h.bf16 %v3629_v2  ;;  %v3630_v31 = vunpack.i.l.bf16 %v3629_v2 }
 0x334   :  { %v1185_v24 = vmul.f32 %v4518_v15, %v1101_v11  ;;  %v3264_v11 = vld [vmem:[%s5280_s6 + $0xd4] sm:$0xf] }
 0x335   :  { %v1734_v50 = vsel %vm530_vm1, %v1722_v9, %v3611_v19  ;;  %v1733_v63 = vsel %vm530_vm1, %v1721_v56, %v3610_v7  ;;  %v3625_v19 = vunpack.i.l.bf16 %v3624_v13  ;;  %v1760_v7 = vsel %vm37_vm0, %v1408_v61, %v3631_v41  ;;  %v3099_v13 = vld [vmem:[%s5280_s6 + $0x148] sm:$0xf0] }
 0x336   :  { %v1745_v40 = vsel %vm543_vm2, %v1733_v63, %v3615_v43  ;;  %v1746_v20 = vsel %vm543_vm2, %v1734_v50, %v3616_v26  ;;  %v1759_v2 = vsel %vm37_vm0, %v1407_v6, %v3630_v31  ;;  %v1103_v26 = vmax.f32 %v1077_v60, 0.0  ;;  %2383 = vmatpush.bf16.msrb.mxu3 %v3110_v45  ;;  %v3266_v50 = vld [vmem:[%s5280_s6 + $0xe4] sm:$0xf]  ;;  %v3051_v63 = vld [vmem:[%s5280_s6 + $0xe8] sm:$0xf0] }
 0x337   :  { %v4975_v23 = vpack.c.bf16 %v1746_v20, %v1745_v40  ;;  %v3054_v51 = vor.u32 %v3266_v50, %v3051_v63  ;;  %v3644_v40 = vpop.permute.xlu2 %3643  ;;  %v3621_v20 = vunpack.i.h.bf16 %v4918_v8  ;;  %v3102_v17 = vor.u32 %v3278_v33, %v3099_v13  ;;  %v3270_v63 = vld [vmem:[%s5280_s6 + $0x104] sm:$0xf]  ;;  %v3067_v33 = vld [vmem:[%s5280_s6 + $0x108] sm:$0xf0] }
 0x338   :  { %v1187_v25 = vmul.f32 %v4539_v27, %v1103_v26  ;;  %v3646_v55 = vunpack.i.h.bf16 %v3644_v40  ;;  %v3645_v34 = vunpack.i.l.bf16 %v3644_v40  ;;  %v1723_v8 = vsel %vm37_vm0, %v1185_v24, %v3620_v16  ;;  %v3262_v13 = vld [vmem:[%s5280_s6 + $0xc4] sm:$0xf]  ;;  %v3035_v40 = vld [vmem:[%s5280_s6 + $0xc8] sm:$0xf0] }
 0x339   :  { %2209 = vmatmul.bf16.gmra.mxu0 %v4975_v23  ;;  %v3038_v16 = vor.u32 %v3262_v13, %v3035_v40 }
 0x33a   :  { %v3634_v10 = vpop.permute.xlu1 %3633  ;;  %v1337_v21 = vpop.permute.xlu0 %1336  ;;  %2343 = vmatpush.bf16.msrb.mxu0 %v3054_v51  ;;  %2384 = vmatpush.bf16.msrb.mxu3 %v3102_v17  ;;  %v1724_v60 = vsel %vm37_vm0, %v1187_v25, %v3621_v20  ;;  %v3070_v51 = vor.u32 %v3270_v63, %v3067_v33 }
 0x33b   :  { %v3636_v22 = vunpack.i.h.bf16 %v3634_v10  ;;  %v3635_v4 = vunpack.i.l.bf16 %v3634_v10  ;;  %1362 = vst.msk [vmem:[#allocation3 + $0x1b0] sm:$0xff] %vm37_vm0, %v1337_v21  ;;  %v3276_v10 = vld [vmem:[%s5280_s6 + $0x134] sm:$0xf]  ;;  %v3091_v21 = vld [vmem:[%s5280_s6 + $0x138] sm:$0xf0] }
 0x33d   :  { %v1771_v43 = vsel %vm530_vm1, %v1759_v2, %v3635_v4  ;;  %v1772_v9 = vsel %vm530_vm1, %v1760_v7, %v3636_v22  ;;  %v3274_v7 = vld [vmem:[%s5280_s6 + $0x124] sm:$0xf]  ;;  %v3083_v2 = vld [vmem:[%s5280_s6 + $0x128] sm:$0xf0] }
 0x33e   :  { %v1783_v56 = vsel %vm543_vm2, %v1771_v43, %v3625_v19  ;;  %v1784_v0 = vsel %vm543_vm2, %v1772_v9, %v3626_v35  ;;  %v3094_v35 = vor.u32 %v3276_v10, %v3091_v21  ;;  %v3086_v26 = vor.u32 %v3274_v7, %v3083_v2  ;;  %v3043_v43 = vld [vmem:[%s5280_s6 + $0xd8] sm:$0xf0]  ;;  %v3272_v9 = vld [vmem:[%s5280_s6 + $0x114] sm:$0xf] }
 0x33f   :  { %v4997_v57 = vpack.c.bf16 %v1784_v0, %v1783_v56  ;;  %v3075_v56 = vld [vmem:[%s5280_s6 + $0x118] sm:$0xf0]  ;;  %v3046_v0 = vor.u32 %v3264_v11, %v3043_v43  ;;  %v3260_v7 = vld [vmem:[%s5280_s6 + $0xb4] sm:$0xf] }
 0x340   :  { %2385 = vmatpush.bf16.msrb.mxu3 %v3094_v35  ;;  %v3078_v50 = vor.u32 %v3272_v9, %v3075_v56  ;;  %v1079_v35 = vpop.f32.mrf.mxu1  ;;  %v3027_v2 = vld [vmem:[%s5280_s6 + $0xb8] sm:$0xf0]  ;;  %v2156_v9 = vpop.f32.mrf.mxu2 }
 0x341   :  { %2253 = vmatmul.bf16.gmra.mxu3 %v4997_v57  ;;  %2344 = vmatpush.bf16.msrb.mxu0 %v3046_v0  ;;  %v3030_v43 = vor.u32 %v3260_v7, %v3027_v2 }
 0x342   :  { %v3639_v48 = vpop.permute.xlu1 %3638  ;;  %v1436_v28 = vld [vmem:[#allocation3 + $0x1b0] sm:$0xff]  ;;  %v3654_v20 = vpop.permute.xlu0 %3653 }
 0x343   :  { %v3641_v41 = vunpack.i.h.bf16 %v3639_v48  ;;  %v3640_v31 = vunpack.i.l.bf16 %v3639_v48  ;;  %v5009_v45 = vpack.c.bf16 %v1437_v18, %v1436_v28  ;;  %v3656_v18 = vunpack.i.h.bf16 %v3654_v20  ;;  %v1409_v28 = vld [vmem:[#allocation3 + $0xca] sm:$0xff] }
 0x344   :  { %2386 = vmatpush.bf16.msrb.mxu3 %v3086_v26  ;;  %v3655_v24 = vunpack.i.l.bf16 %v3654_v20  ;;  %v5078_v26 = vld [vmem:[%s5281_s7] sm:$0x3] }
 0x345   :  { %v1736_v6 = vsel %vm530_vm1, %v1724_v60, %v3641_v41  ;;  %v1735_v61 = vsel %vm530_vm1, %v1723_v8, %v3640_v31  ;;  %3148 = vmatmul.msk.bf16.gmra.mxu1 %vm37_vm0, %v5009_v45  ;;  %2345 = vmatpush.bf16.msrb.mxu0 %v3038_v16 }
 0x346   :  { %v1747_v22 = vsel %vm543_vm2, %v1735_v61, %v3645_v34  ;;  %v1748_v4 = vsel %vm543_vm2, %v1736_v6, %v3646_v55  ;;  %v1410_v55 = vld [vmem:[#allocation3 + $0xd2] sm:$0xff] }
 0x347   :  { %v5023_v19 = vpack.c.bf16 %v1748_v4, %v1747_v22  ;;  %v1762_v31 = vsel %vm37_vm0, %v1410_v55, %v3656_v18  ;;  %v1001_v22 = vpop.f32.mrf.mxu0  ;;  %v1040_v4 = vpop.f32.mrf.mxu3 }
 0x348   :  { %2387 = vmatpush.bf16.msrb.mxu3 %v3078_v50  ;;  %v1081_v0 = vpop.f32.mrf.mxu1  ;;  %v2158_v20 = vpop.f32.mrf.mxu2 }
 0x349   :  { %2214 = vmatmul.bf16.gmra.mxu0 %v5023_v19 }
 0x34a   :  { %v3659_v17 = vpop.permute.xlu1 %3658  ;;  %2346 = vmatpush.bf16.msrb.mxu0 %v3030_v43  ;;  %v3254_v43 = vld [vmem:[%s5280_s6 + $0x84] sm:$0xf] }
 0x34b   :  { %v3661_v25 = vunpack.i.h.bf16 %v3659_v17  ;;  %v3660_v48 = vunpack.i.l.bf16 %v3659_v17 }
 0x34c   :  { %2388 = vmatpush.bf16.msrb.mxu3 %v3070_v51 }
 0x34d   :  { %v1774_v10 = vsel %vm530_vm1, %v1762_v31, %v3661_v25 }
 0x34f   :  { %v1003_v11 = vpop.f32.mrf.mxu0  ;;  %v1042_v56 = vpop.f32.mrf.mxu3 }
 0x350   :  { %v2273_v51 = vpop.f32.mrf.mxu1  ;;  %v2161_v31 = vpop.f32.mrf.mxu2 }
 0x355   :  { %3149 = vmatmul.msk.bf16.vlgmr.msrb.gmra.mxu1 %vm37_vm0, %v4640_v44  ;;  %v1761_v44 = vsel %vm37_vm0, %v1409_v28, %v3655_v24 }
 0x356   :  { %v1773_v8 = vsel %vm530_vm1, %v1761_v44, %v3660_v48  ;;  %v3019_v44 = vld [vmem:[%s5280_s6 + $0xa8] sm:$0xf0] }
 0x358   :  { %v2275_v28 = vpop.f32.mrf.mxu1 }
 0x35d   :  { %v3649_v41 = vpop.permute.xlu2 %3648 }
 0x35e   :  { %v3651_v34 = vunpack.i.h.bf16 %v3649_v41  ;;  %v3650_v60 = vunpack.i.l.bf16 %v3649_v41  ;;  %v3258_v41 = vld [vmem:[%s5280_s6 + $0xa4] sm:$0xf] }
 0x360   :  { %v1785_v21 = vsel %vm543_vm2, %v1773_v8, %v3650_v60  ;;  %v1786_v6 = vsel %vm543_vm2, %v1774_v10, %v3651_v34  ;;  %v3022_v34 = vor.u32 %v3258_v41, %v3019_v44  ;;  %v3011_v60 = vld [vmem:[%s5280_s6 + $0x98] sm:$0xf0] }
 0x361   :  { %v5064_v61 = vpack.c.bf16 %v1786_v6, %v1785_v21 }
 0x362   :  { %2347 = vmatpush.bf16.msrb.mxu0 %v3022_v34 }
 0x363   :  { %2258 = vmatmul.bf16.gmra.mxu3 %v5064_v61 }
 0x365   :  { %3150 = vmatmul.msk.bf16.gmra.mxu1 %vm37_vm0, %v4670_v53  ;;  %v5081_v53 = vperm.slane %v5078_v26, 0 }
 0x367   :  { %v2157_v50 = vadd.f32 %v2156_v9, %v5081_v53  ;;  %v2159_v17 = vadd.f32 %v2158_v20, %v5081_v53  ;;  %v2162_v21 = vadd.f32 %v2161_v31, %v5081_v53  ;;  %v3003_v9 = vld [vmem:[%s5280_s6 + $0x88] sm:$0xf0] }
 0x373   :  { %2389 = vmatmul.bf16.vlgmr.msrb.gmra.mxu3 %v4855_v49 }
 0x374   :  { %v2195_v63 = vpop.f32.mrf.mxu0 }
 0x375   :  { %v2196_v33 = vadd.f32 %v2195_v63, %v2157_v50  ;;  %3151 = vmatmul.msk.bf16.gmra.mxu1 %vm37_vm0, %v4695_v1  ;;  %v3006_v63 = vor.u32 %v3254_v43, %v3003_v9 }
 0x37a   :  { %v2234_v13 = vpop.f32.mrf.mxu3 }
 0x37b   :  { %v2235_v40 = vadd.f32 %v2234_v13, %v2196_v33  ;;  %v1002_v33 = vadd.f32 %v1001_v22, %v4620_v46  ;;  %v3664_v22 = vpop.permute.xlu1 %3663 }
 0x37c   :  { %v2197_v16 = vpop.f32.mrf.mxu0 }
 0x37d   :  { %v2274_v18 = vadd.f32 %v2273_v51, %v2235_v40  ;;  %v2198_v24 = vadd.f32 %v2197_v16, %v2159_v17  ;;  %v1004_v51 = vadd.f32 %v1003_v11, %v4620_v46  ;;  %v2278_v40 = vpop.f32.mrf.mxu1  ;;  %v1041_v16 = vadd.f32 %v1040_v4, %v1002_v33 }
 0x37f   :  { %v2459_v49 = vmax.f32 %v2274_v18, 0.0  ;;  %v1043_v17 = vadd.f32 %v1042_v56, %v1004_v51 }
 0x382   :  { %v2236_v25 = vpop.f32.mrf.mxu3 }
 0x383   :  { %v2237_v48 = vadd.f32 %v2236_v25, %v2198_v24  ;;  %2394 = vmatmul.bf16.gmra.mxu3 %v4878_v12  ;;  %v3256_v12 = vld [vmem:[%s5280_s6 + $0x94] sm:$0xf]  ;;  %v1080_v24 = vadd.f32 %v1079_v35, %v1041_v16  ;;  %v1082_v25 = vadd.f32 %v1081_v0, %v1043_v17 }
 0x384   :  { %v3014_v10 = vor.u32 %v3256_v12, %v3011_v60 }
 0x385   :  { %v2276_v55 = vadd.f32 %v2275_v28, %v2237_v48  ;;  %3152 = vmatmul.msk.bf16.gmra.mxu1 %vm37_vm0, %v4748_v52  ;;  %v2483_v52 = vmul.f32 %v2459_v49, %v4408_v37  ;;  %v1105_v46 = vmax.f32 %v1080_v24, 0.0  ;;  %v1107_v11 = vmax.f32 %v1082_v25, 0.0  ;;  %v3669_v49 = vpop.permute.xlu2 %3668 }
 0x386   :  { %2348 = vmatpush.bf16.msrb.mxu0 %v3014_v10  ;;  %v3671_v4 = vunpack.i.h.bf16 %v3669_v49  ;;  %v3670_v56 = vunpack.i.l.bf16 %v3669_v49  ;;  %v2163_v10 = vpop.f32.mrf.mxu2 }
 0x387   :  { %v2461_v1 = vmax.f32 %v2276_v55, 0.0  ;;  %v3666_v55 = vunpack.i.h.bf16 %v3664_v22  ;;  %v1189_v41 = vmul.f32 %v4563_v54, %v1105_v46 }
 0x389   :  { %v2485_v8 = vmul.f32 %v2461_v1, %v4415_v59  ;;  %v3665_v1 = vunpack.i.l.bf16 %v3664_v22 }
 0x38a   :  { %2349 = vmatpush.bf16.msrb.mxu0 %v3006_v63 }
 0x38b   :  { %v2507_v6 = vmax.f32 %v2483_v52, %v2485_v8  ;;  %v1725_v44 = vsel %vm37_vm0, %v1189_v41, %v3665_v1  ;;  %v3297_v1 = vld [vmem:[%s5282_s8 + $0x38] sm:$0xff] }
 0x38c   :  { %v2200_v7 = vpop.f32.mrf.mxu0  ;;  %v2239_v50 = vpop.f32.mrf.mxu3  ;;  %v1737_v12 = vsel %vm530_vm1, %v1725_v44, %v3670_v56  ;;  %2706 = vmatpush.bf16.msra.mxu2 %v3297_v1 }
 0x38d   :  { %v2201_v2 = vadd.f32 %v2200_v7, %v2162_v21  ;;  %v2280_v7 = vpop.f32.mrf.mxu1 }
 0x38e   :  { %v2166_v21 = vpop.f32.mrf.mxu2 }
 0x38f   :  { %v2240_v13 = vadd.f32 %v2239_v50, %v2201_v2  ;;  %v2167_v22 = vadd.f32 %v2166_v21, %v5081_v53 }
 0x391   :  { %v2279_v20 = vadd.f32 %v2278_v40, %v2240_v13 }
 0x393   :  { %v2463_v18 = vmax.f32 %v2279_v20, 0.0  ;;  %2399 = vmatmul.bf16.gmra.mxu3 %v4912_v62  ;;  %v1191_v62 = vmul.f32 %v4577_v30, %v1107_v11 }
 0x394   :  { %v2202_v50 = vpop.f32.mrf.mxu0 }
 0x395   :  { %v2487_v48 = vmul.f32 %v2463_v18, %v4426_v47  ;;  %3153 = vmatmul.msk.bf16.gmra.mxu1 %vm37_vm0, %v4863_v42  ;;  %v1726_v0 = vsel %vm37_vm0, %v1191_v62, %v3666_v55 }
 0x396   :  { %v1738_v34 = vsel %vm530_vm1, %v1726_v0, %v3671_v4  ;;  %v2168_v43 = vpop.f32.mrf.mxu2 }
 0x397   :  { %v5118_v28 = vmax.f32 %v2507_v6, %v2487_v48  ;;  %v2241_v6 = vpop.f32.mrf.mxu3  ;;  %v2169_v11 = vadd.f32 %v2168_v43, %v5081_v53 }
 0x39c   :  { %v2205_v33 = vpop.f32.mrf.mxu0 }
 0x39d   :  { %v2206_v41 = vadd.f32 %v2205_v33, %v2167_v22 }
 0x39e   :  { %v3674_v35 = vpop.permute.xlu0 %3673 }
 0x39f   :  { %v3676_v42 = vunpack.i.h.bf16 %v3674_v35  ;;  %v3675_v31 = vunpack.i.l.bf16 %v3674_v35 }
 0x3a1   :  { %v1749_v60 = vsel %vm543_vm2, %v1737_v12, %v3675_v31  ;;  %v1750_v52 = vsel %vm543_vm2, %v1738_v34, %v3676_v42  ;;  %v3296_v12 = vld [vmem:[%s5282_s8 + $0x30] sm:$0xff] }
 0x3a2   :  { %v1808_v8 = vpack.c.bf16 %v1750_v52, %v1749_v60  ;;  %2707 = vmatpush.bf16.msra.mxu2 %v3296_v12 }
 0x3a3   :  { %2404 = vmatmul.bf16.gmra.mxu3 %v4942_v5  ;;  %v2283_v5 = vpop.f32.mrf.mxu1 }
 0x3a4   :  { %2219 = vmatmul.bf16.gmra.mxu0 %v1808_v8  ;;  %v2244_v2 = vpop.f32.mrf.mxu3 }
 0x3a5   :  { %3154 = vmatmul.msk.bf16.gmra.mxu1 %vm37_vm0, %v5009_v45  ;;  %v2171_v45 = vpop.f32.mrf.mxu2  ;;  %v2245_v42 = vadd.f32 %v2244_v2, %v2206_v41 }
 0x3a6   :  { %v2172_v49 = vadd.f32 %v2171_v45, %v5081_v53 }
 0x3ab   :  { %v2285_v63 = vpop.f32.mrf.mxu1 }
 0x3ac   :  { %v2246_v9 = vpop.f32.mrf.mxu3 }
 0x3b3   :  { %2409 = vmatmul.bf16.gmra.mxu3 %v4997_v57 }
 0x3b4   :  { %2350 = vmatmul.bf16.vlgmr.msrb.gmra.mxu0 %v4853_v29  ;;  %v2249_v57 = vpop.f32.mrf.mxu3  ;;  %v2173_v29 = vpop.f32.mrf.mxu2 }
 0x3b5   :  { %v2174_v46 = vadd.f32 %v2173_v29, %v5081_v53 }
 0x3bc   :  { %v2251_v51 = vpop.f32.mrf.mxu3  ;;  %v2176_v13 = vpop.f32.mrf.mxu2 }
 0x3bd   :  { %v2177_v4 = vadd.f32 %v2176_v13, %v5081_v53 }
 0x3c3   :  { %2414 = vmatmul.bf16.gmra.mxu3 %v5064_v61  ;;  %v2288_v61 = vpop.f32.mrf.mxu1 }
 0x3c4   :  { %2355 = vmatmul.bf16.gmra.mxu0 %v4886_v14  ;;  %v2207_v14 = vpop.f32.mrf.mxu0  ;;  %v2254_v16 = vpop.f32.mrf.mxu3 }
 0x3c5   :  { %v2208_v44 = vadd.f32 %v2207_v14, %v2169_v11 }
 0x3c7   :  { %v2247_v52 = vadd.f32 %v2246_v9, %v2208_v44 }
 0x3c9   :  { %v2286_v33 = vadd.f32 %v2285_v63, %v2247_v52 }
 0x3cb   :  { %v2290_v40 = vpop.f32.mrf.mxu1 }
 0x3cc   :  { %v2210_v20 = vpop.f32.mrf.mxu0  ;;  %v5140_v24 = vpop.f32.mrf.mxu3 }
 0x3cd   :  { %v2211_v31 = vadd.f32 %v2210_v20, %v2172_v49 }
 0x3cf   :  { %v2250_v21 = vadd.f32 %v2249_v57, %v2211_v31  ;;  %v2469_v57 = vmax.f32 %v2286_v33, 0.0 }
 0x3d1   :  { %v2289_v13 = vadd.f32 %v2288_v61, %v2250_v21  ;;  %v3293_v61 = vld [vmem:[%s5282_s8 + $0x18] sm:$0xff]  ;;  %v2509_v21 = vrot.slane %v5118_v28, 4 }
 0x3d3   :  { %v2293_v17 = vpop.f32.mrf.mxu1 }
 0x3d4   :  { %2360 = vmatmul.bf16.gmra.mxu0 %v4905_v36  ;;  %v5138_v36 = vpop.f32.mrf.mxu2  ;;  %v2212_v18 = vpop.f32.mrf.mxu0 }
 0x3d5   :  { %v2213_v62 = vadd.f32 %v2212_v18, %v2174_v46  ;;  %v2179_v1 = vadd.f32 %v5138_v36, %v5081_v53  ;;  %v3291_v36 = vld [vmem:[%s5282_s8 + $0x8] sm:$0xff] }
 0x3db   :  { %v5144_v48 = vpop.f32.mrf.mxu1 }
 0x3dc   :  { %v5142_v25 = vpop.f32.mrf.mxu2  ;;  %v2215_v55 = vpop.f32.mrf.mxu0 }
 0x3dd   :  { %v2216_v34 = vadd.f32 %v2215_v55, %v2177_v4  ;;  %v3292_v4 = vld [vmem:[%s5282_s8 + $0x10] sm:$0xff]  ;;  %v2182_v44 = vadd.f32 %v5142_v25, %v5081_v53 }
 0x3df   :  { %v2255_v43 = vadd.f32 %v2254_v16, %v2216_v34 }
 0x3e1   :  { %v2294_v20 = vadd.f32 %v2293_v17, %v2255_v43 }
 0x3e3   :  { %v5157_v35 = vpop.f32.mrf.mxu1  ;;  %v2475_v63 = vmax.f32 %v2294_v20, 0.0 }
 0x3e4   :  { %2365 = vmatmul.bf16.gmra.mxu0 %v4975_v23  ;;  %v2164_v23 = vadd.f32 %v2163_v10, %v5081_v53  ;;  %v5159_v0 = vpop.f32.mrf.mxu2  ;;  %v2284_v10 = vadd.f32 %v2283_v5, %v2245_v42 }
 0x3e5   :  { %v2499_v49 = vmul.f32 %v2475_v63, %v4518_v15 }
 0x3e6   :  { %v2203_v56 = vadd.f32 %v2202_v50, %v2164_v23  ;;  %v3295_v50 = vld [vmem:[%s5282_s8 + $0x28] sm:$0xff]  ;;  %v2467_v14 = vmax.f32 %v2284_v10, 0.0  ;;  %v2493_v23 = vmul.f32 %v2469_v57, %v4453_v39 }
 0x3e7   :  { %2708 = vmatpush.bf16.msra.mxu2 %v3295_v50  ;;  %v3290_v50 = vld [vmem:[%s5282_s8] sm:$0xff] }
 0x3e8   :  { %v2242_v60 = vadd.f32 %v2241_v6, %v2203_v56  ;;  %v3294_v6 = vld [vmem:[%s5282_s8 + $0x20] sm:$0xff]  ;;  %v2491_v16 = vmul.f32 %v2467_v14, %v4445_v38 }
 0x3ea   :  { %v2281_v45 = vadd.f32 %v2280_v7, %v2242_v60  ;;  %v2471_v7 = vmax.f32 %v2289_v13, 0.0 }
 0x3eb   :  { %v2300_v18 = vpop.f32.mrf.mxu1  ;;  %2709 = vmatpush.bf16.msra.mxu2 %v3294_v6 }
 0x3ec   :  { %v2312_v5 = vpop.f32.mrf.mxu2  ;;  %v2465_v9 = vmax.f32 %v2281_v45, 0.0  ;;  %v2495_v11 = vmul.f32 %v2471_v7, %v4470_v58 }
 0x3ee   :  { %v2489_v17 = vmul.f32 %v2465_v9, %v4434_v32 }
 0x3ef   :  { %2710 = vmatpush.bf16.msra.mxu2 %v3293_v61 }
 0x3f0   :  { %v2526_v46 = vmax.f32 %v2489_v17, %v2491_v16 }
 0x3f2   :  { %v2527_v56 = vmax.f32 %v2526_v46, %v2493_v23 }
 0x3f3   :  { %2711 = vmatpush.bf16.msra.mxu2 %v3292_v4 }
 0x3f4   :  { %2370 = vmatmul.bf16.gmra.mxu0 %v5023_v19  ;;  %v5149_v19 = vpop.f32.mrf.mxu3  ;;  %v2314_v31 = vpop.f32.mrf.mxu2  ;;  %v2528_v52 = vrot.slane %v2527_v56, 4 }
 0x3f6   :  { %v2529_v45 = vmax.f32 %v2527_v56, %v2528_v52 }
 0x3f7   :  { %2712 = vmatpush.bf16.msra.mxu2 %v3291_v36 }
 0x3f8   :  { %v2530_v57 = vrot.slane %v2529_v45, 2 }
 0x3fb   :  { %2713 = vmatpush.bf16.msra.mxu2 %v3290_v50 }
 0x3fc   :  { %v2261_v29 = vpop.f32.mrf.mxu3 }
 0x404   :  { %2375 = vmatmul.bf16.gmra.mxu0 %v1808_v8  ;;  %v2252_v8 = vadd.f32 %v2251_v51, %v2213_v62  ;;  %v2390_v55 = vpop.f32.mrf.mxu3  ;;  %v2429_v62 = vpop.f32.mrf.mxu1 }
 0x406   :  { %v2291_v2 = vadd.f32 %v2290_v40, %v2252_v8  ;;  %v2217_v40 = vpop.f32.mrf.mxu0 }
 0x407   :  { %v2218_v42 = vadd.f32 %v2217_v40, %v2179_v1 }
 0x408   :  { %v2473_v51 = vmax.f32 %v2291_v2, 0.0  ;;  %v2184_v2 = vadd.f32 %v5159_v0, %v5081_v53  ;;  %v2531_v0 = vmax.f32 %v2529_v45, %v2530_v57 }
 0x409   :  { %v2257_v8 = vadd.f32 %v5140_v24, %v2218_v42  ;;  %v2510_v24 = vmax.f32 %v5118_v28, %v2509_v21 }
 0x40a   :  { %v2497_v22 = vmul.f32 %v2473_v51, %v4490_v3  ;;  %v5201_v51 = vperm.slane %v5078_v26, 1 }
 0x40b   :  { %v2296_v14 = vadd.f32 %v5144_v48, %v2257_v8  ;;  %v2511_v63 = vrot.slane %v2510_v24, 2 }
 0x40c   :  { %v2545_v41 = vmax.f32 %v2495_v11, %v2497_v22  ;;  %v2392_v33 = vpop.f32.mrf.mxu3  ;;  %v2431_v13 = vpop.f32.mrf.mxu1  ;;  %v2313_v28 = vadd.f32 %v2312_v5, %v5201_v51 }
 0x40d   :  { %v2477_v16 = vmax.f32 %v2296_v14, 0.0  ;;  %v2512_v23 = vmax.f32 %v2510_v24, %v2511_v63 }
 0x40e   :  { %v2546_v34 = vmax.f32 %v2545_v41, %v2499_v49 }
 0x40f   :  { %v2501_v61 = vmul.f32 %v2477_v16, %v4539_v27 }
 0x410   :  { %v2547_v43 = vrot.slane %v2546_v34, 4 }
 0x414   :  { %v2395_v46 = vpop.f32.mrf.mxu3  ;;  %v2434_v4 = vpop.f32.mrf.mxu1 }
 0x41c   :  { %v5210_v50 = vpop.f32.mrf.mxu3 }
 0x421   :  { %v2220_v12 = vpop.f32.mrf.mxu0 }
 0x422   :  { %v2221_v60 = vadd.f32 %v2220_v12, %v2182_v44  ;;  %v2315_v12 = vadd.f32 %v2314_v31, %v5201_v51 }
 0x424   :  { %v2260_v10 = vadd.f32 %v5149_v19, %v2221_v60  ;;  %v2548_v19 = vmax.f32 %v2546_v34, %v2547_v43 }
 0x426   :  { %v2299_v25 = vadd.f32 %v5157_v35, %v2260_v10  ;;  %v2317_v35 = vpop.f32.mrf.mxu2  ;;  %v2549_v40 = vrot.slane %v2548_v19, 2 }
 0x427   :  { %v2318_v31 = vadd.f32 %v2317_v35, %v5201_v51 }
 0x428   :  { %v2479_v6 = vmax.f32 %v2299_v25, 0.0  ;;  %v2550_v22 = vmax.f32 %v2548_v19, %v2549_v40  ;;  %v5212_v19 = vpop.f32.mrf.mxu1 }
 0x429   :  { %v2222_v20 = vpop.f32.mrf.mxu0 }
 0x42a   :  { %v2223_v9 = vadd.f32 %v2222_v20, %v2184_v2  ;;  %v2503_v53 = vmul.f32 %v2479_v6, %v4563_v54  ;;  %v2551_v42 = vrot.slane %v2550_v22, 1 }
 0x42c   :  { %v2262_v7 = vadd.f32 %v2261_v29, %v2223_v9  ;;  %v2564_v49 = vmax.f32 %v2501_v61, %v2503_v53  ;;  %v2532_v29 = vrot.slane %v2531_v0, 1  ;;  %v2552_v8 = vmax.f32 %v2550_v22, %v2551_v42 }
 0x42e   :  { %v2301_v48 = vadd.f32 %v2300_v18, %v2262_v7  ;;  %v5207_v44 = vpop.f32.mrf.mxu2  ;;  %v2513_v18 = vrot.slane %v2512_v23, 1  ;;  %v2533_v34 = vmax.f32 %v2531_v0, %v2532_v29  ;;  %v2587_v24 = vpack.c.bf16 %v2552_v8, %v2552_v8 }
 0x430   :  { %v2481_v17 = vmax.f32 %v2301_v48, 0.0  ;;  %v2514_v52 = vmax.f32 %v2512_v23, %v2513_v18  ;;  %v2585_v25 = vpack.c.bf16 %v2533_v34, %v2533_v34  ;;  %v2627_v40 = vunpack.c.l.b16 %v2587_v24 }
 0x431   :  { %v2351_v11 = vpop.f32.mrf.mxu0 }
 0x432   :  { %v2505_v26 = vmul.f32 %v2481_v17, %v4577_v30  ;;  %v2352_v1 = vadd.f32 %v2351_v11, %v2313_v28  ;;  %v2583_v14 = vpack.c.bf16 %v2514_v52, %v2514_v52  ;;  %v2625_v9 = vunpack.c.l.b16 %v2585_v25 }
 0x434   :  { %v2565_v56 = vmax.f32 %v2564_v49, %v2505_v26  ;;  %v2391_v41 = vadd.f32 %v2390_v55, %v2352_v1  ;;  %v2623_v63 = vunpack.c.l.b16 %v2583_v14  ;;  %v2439_v26 = vpop.f32.mrf.mxu1 }
 0x436   :  { %v2566_v5 = vrot.slane %v2565_v56, 4  ;;  %v2430_v36 = vadd.f32 %v2429_v62, %v2391_v41  ;;  %v2322_v62 = vpop.f32.mrf.mxu2  ;;  %v2632_v28 = vsel %vm2631_vm3, %v2625_v9, %v2623_v63 }
 0x437   :  { %v2634_v22 = vsel %vm2633_vm4, %v2627_v40, %v2632_v28 }
 0x438   :  { %v2567_v60 = vmax.f32 %v2565_v56, %v2566_v5  ;;  %v2460_v55 = vmax.f32 %v2430_v36, 0.0 }
 0x439   :  { %v2353_v10 = vpop.f32.mrf.mxu0 }
 0x43a   :  { %v2568_v21 = vrot.slane %v2567_v60, 2  ;;  %v2354_v43 = vadd.f32 %v2353_v10, %v2315_v12  ;;  %v2484_v16 = vmul.f32 %v2460_v55, %v4408_v37  ;;  %v2400_v37 = vpop.f32.mrf.mxu3 }
 0x43c   :  { %v2569_v45 = vmax.f32 %v2567_v60, %v2568_v21  ;;  %v2393_v2 = vadd.f32 %v2392_v33, %v2354_v43  ;;  %v2515_v35 = vsel %vm37_vm0, %v2484_v16, -inf  ;;  %v2441_v5 = vpop.f32.mrf.mxu1  ;;  %v2323_v43 = vadd.f32 %v2322_v62, %v5201_v51 }
 0x43e   :  { %v2570_v20 = vrot.slane %v2569_v45, 1  ;;  %v2432_v6 = vadd.f32 %v2431_v13, %v2393_v2  ;;  %v2324_v29 = vpop.f32.mrf.mxu2 }
 0x440   :  { %v2571_v57 = vmax.f32 %v2569_v45, %v2570_v20  ;;  %v2462_v7 = vmax.f32 %v2432_v6, 0.0  ;;  %v2325_v45 = vadd.f32 %v2324_v29, %v5201_v51 }
 0x441   :  { %v2356_v53 = vpop.f32.mrf.mxu0 }
 0x442   :  { %v2589_v48 = vpack.c.bf16 %v2571_v57, %v2571_v57  ;;  %v2486_v33 = vmul.f32 %v2462_v7, %v4415_v59  ;;  %v2357_v0 = vadd.f32 %v2356_v53, %v2318_v31 }
 0x444   :  { %v2629_v13 = vunpack.c.l.b16 %v2589_v48  ;;  %v2516_v61 = vsel %vm37_vm0, %v2486_v33, -inf  ;;  %v2396_v17 = vadd.f32 %v2395_v46, %v2357_v0  ;;  %v2402_v46 = vpop.f32.mrf.mxu3  ;;  %v2444_v36 = vpop.f32.mrf.mxu1 }
 0x445   :  { %v2517_v23 = vmax.f32 %v2515_v35, %v2516_v61 }
 0x446   :  { %v2435_v11 = vadd.f32 %v2434_v4, %v2396_v17  ;;  %v2636_v49 = vsel %vm2635_vm5, %v2629_v13, %v2634_v22  ;;  %v2327_v12 = vpop.f32.mrf.mxu2 }
 0x447   :  { %v2640_v59 = vpack.c.b16 %v2636_v49, %v2636_v49  ;;  %v2328_v14 = vadd.f32 %v2327_v12, %v5201_v51 }
 0x448   :  { %v2464_v1 = vmax.f32 %v2435_v11, 0.0 }
 0x449   :  { %v2358_v56 = vpop.f32.mrf.mxu0  ;;  %2714 = vmatmul.bf16.vlgmr.msra.gmra.mxu2 %v2640_v59 }
 0x44a   :  { %v2488_v41 = vmul.f32 %v2464_v1, %v4426_v47  ;;  %v2320_v47 = vadd.f32 %v5207_v44, %v5201_v51 }
 0x44c   :  { %v2518_v18 = vsel %vm37_vm0, %v2488_v41, -inf  ;;  %v2405_v60 = vpop.f32.mrf.mxu3  ;;  %v2446_v21 = vpop.f32.mrf.mxu1  ;;  %v2359_v20 = vadd.f32 %v2358_v56, %v2320_v47 }
 0x44d   :  { %v5224_v42 = vmax.f32 %v2517_v23, %v2518_v18 }
 0x44e   :  { %v2329_v52 = vpop.f32.mrf.mxu2  ;;  %v2398_v62 = vadd.f32 %v5210_v50, %v2359_v20 }
 0x44f   :  { %v2330_v55 = vadd.f32 %v2329_v52, %v5201_v51 }
 0x450   :  { %v2437_v13 = vadd.f32 %v5212_v19, %v2398_v62 }
 0x451   :  { %v2361_v34 = vpop.f32.mrf.mxu0 }
 0x452   :  { %v2362_v2 = vadd.f32 %v2361_v34, %v2323_v43  ;;  %v2466_v11 = vmax.f32 %v2437_v13, 0.0 }
 0x454   :  { %v2407_v10 = vpop.f32.mrf.mxu3  ;;  %v2401_v57 = vadd.f32 %v2400_v37, %v2362_v2  ;;  %v2449_v40 = vpop.f32.mrf.mxu1  ;;  %v2490_v19 = vmul.f32 %v2466_v11, %v4434_v32  ;;  %v3299_v2 = vld [vmem:[%s5282_s8 + $0x48] sm:$0xff] }
 0x455   :  { %2725 = vmatpush.bf16.msrb.mxu2 %v3299_v2 }
 0x456   :  { %v2332_v25 = vpop.f32.mrf.mxu2  ;;  %v2440_v48 = vadd.f32 %v2439_v26, %v2401_v57 }
 0x457   :  { %v2333_v53 = vadd.f32 %v2332_v25, %v5201_v51 }
 0x458   :  { %v2468_v23 = vmax.f32 %v2440_v48, 0.0 }
 0x459   :  { %v2363_v4 = vpop.f32.mrf.mxu0 }
 0x45a   :  { %v2364_v6 = vadd.f32 %v2363_v4, %v2325_v45  ;;  %v2492_v29 = vmul.f32 %v2468_v23, %v4445_v38 }
 0x45c   :  { %v2410_v16 = vpop.f32.mrf.mxu3  ;;  %v2403_v63 = vadd.f32 %v2402_v46, %v2364_v6  ;;  %v2451_v26 = vpop.f32.mrf.mxu1  ;;  %v2535_v4 = vsel %vm37_vm0, %v2492_v29, -inf  ;;  %v3298_v6 = vld [vmem:[%s5282_s8 + $0x40] sm:$0xff] }
 0x45d   :  { %2726 = vmatpush.bf16.msrb.mxu2 %v3298_v6 }
 0x45e   :  { %v2334_v33 = vpop.f32.mrf.mxu2  ;;  %v2442_v35 = vadd.f32 %v2441_v5, %v2403_v63 }
 0x460   :  { %v2470_v49 = vmax.f32 %v2442_v35, 0.0 }
 0x461   :  { %v2366_v8 = vpop.f32.mrf.mxu0 }
 0x462   :  { %v2367_v9 = vadd.f32 %v2366_v8, %v2328_v14  ;;  %v2494_v46 = vmul.f32 %v2470_v49, %v4453_v39 }
 0x464   :  { %v2406_v44 = vadd.f32 %v2405_v60, %v2367_v9  ;;  %v2412_v59 = vpop.f32.mrf.mxu3  ;;  %v2335_v60 = vadd.f32 %v2334_v33, %v5201_v51 }
 0x466   :  { %v2445_v17 = vadd.f32 %v2444_v36, %v2406_v44  ;;  %v2337_v5 = vpop.f32.mrf.mxu2  ;;  %v2534_v36 = vsel %vm37_vm0, %v2490_v19, -inf }
 0x467   :  { %v2536_v8 = vmax.f32 %v2534_v36, %v2535_v4 }
 0x468   :  { %v2472_v1 = vmax.f32 %v2445_v17, 0.0 }
 0x469   :  { %v2368_v24 = vpop.f32.mrf.mxu0 }
 0x46a   :  { %v2369_v31 = vadd.f32 %v2368_v24, %v2330_v55  ;;  %v2496_v34 = vmul.f32 %v2472_v1, %v4470_v58  ;;  %v2338_v58 = vadd.f32 %v2337_v5, %v5201_v51  ;;  %v2454_v55 = vpop.f32.mrf.mxu1 }
 0x46c   :  { %v2408_v7 = vadd.f32 %v2407_v10, %v2369_v31  ;;  %v2553_v32 = vsel %vm37_vm0, %v2496_v34, -inf }
 0x46e   :  { %v2447_v0 = vadd.f32 %v2446_v21, %v2408_v7  ;;  %v2339_v24 = vpop.f32.mrf.mxu2 }
 0x46f   :  { %v2340_v7 = vadd.f32 %v2339_v24, %v5201_v51 }
 0x470   :  { %v2474_v22 = vmax.f32 %v2447_v0, 0.0 }
 0x471   :  { %v2371_v28 = vpop.f32.mrf.mxu0 }
 0x472   :  { %v2372_v61 = vadd.f32 %v2371_v28, %v2333_v53  ;;  %v2498_v41 = vmul.f32 %v2474_v22, %v4490_v3  ;;  %v2537_v3 = vsel %vm37_vm0, %v2494_v46, -inf  ;;  %v2456_v35 = vpop.f32.mrf.mxu1 }
 0x473   :  { %v2538_v21 = vmax.f32 %v2536_v8, %v2537_v3 }
 0x474   :  { %v2411_v37 = vadd.f32 %v2410_v16, %v2372_v61  ;;  %v2554_v38 = vsel %vm37_vm0, %v2498_v41, -inf  ;;  %v2520_v16 = vrot.slane %v5224_v42, 4 }
 0x475   :  { %v2555_v10 = vmax.f32 %v2553_v32, %v2554_v38  ;;  %v2539_v20 = vrot.slane %v2538_v21, 4 }
 0x476   :  { %v2450_v50 = vadd.f32 %v2449_v40, %v2411_v37  ;;  %v2521_v33 = vmax.f32 %v5224_v42, %v2520_v16 }
 0x477   :  { %v2540_v63 = vmax.f32 %v2538_v21, %v2539_v20 }
 0x478   :  { %v2476_v56 = vmax.f32 %v2450_v50, 0.0  ;;  %v2522_v51 = vrot.slane %v2521_v33, 2 }
 0x479   :  { %v2373_v18 = vpop.f32.mrf.mxu0  ;;  %v2541_v61 = vrot.slane %v2540_v63, 2 }
 0x47a   :  { %v2500_v12 = vmul.f32 %v2476_v56, %v4518_v15  ;;  %v2374_v52 = vadd.f32 %v2373_v18, %v2335_v60  ;;  %v2415_v15 = vpop.f32.mrf.mxu3  ;;  %v2523_v1 = vmax.f32 %v2521_v33, %v2522_v51 }
 0x47b   :  { %v2542_v49 = vmax.f32 %v2540_v63, %v2541_v61 }
 0x47c   :  { %v2556_v39 = vsel %vm37_vm0, %v2500_v12, -inf  ;;  %v2413_v47 = vadd.f32 %v2412_v59, %v2374_v52  ;;  %v2524_v18 = vrot.slane %v2523_v1, 1 }
 0x47d   :  { %v2557_v25 = vmax.f32 %v2555_v10, %v2556_v39  ;;  %v2543_v56 = vrot.slane %v2542_v49, 1 }
 0x47e   :  { %v2452_v9 = vadd.f32 %v2451_v26, %v2413_v47  ;;  %v2525_v34 = vmax.f32 %v2523_v1, %v2524_v18 }
 0x47f   :  { %v2558_v31 = vrot.slane %v2557_v25, 4  ;;  %v2544_v19 = vmax.f32 %v2542_v49, %v2543_v56 }
 0x480   :  { %v2478_v53 = vmax.f32 %v2452_v9, 0.0  ;;  %v2584_v36 = vpack.c.bf16 %v2525_v34, %v2525_v34 }
 0x481   :  { %v2376_v43 = vpop.f32.mrf.mxu0  ;;  %v2559_v44 = vmax.f32 %v2557_v25, %v2558_v31  ;;  %v2586_v60 = vpack.c.bf16 %v2544_v19, %v2544_v19 }
 0x482   :  { %v2377_v45 = vadd.f32 %v2376_v43, %v2338_v58  ;;  %v2417_v0 = vpop.f32.mrf.mxu3  ;;  %v2502_v23 = vmul.f32 %v2478_v53, %v4539_v27  ;;  %v2624_v32 = vunpack.c.l.b16 %v2584_v36 }
 0x483   :  { %v2560_v17 = vrot.slane %v2559_v44, 2 }
 0x484   :  { %v2416_v14 = vadd.f32 %v2415_v15, %v2377_v45  ;;  %v2572_v59 = vsel %vm37_vm0, %v2502_v23, -inf  ;;  %v3678_v45 = vld [vmem:[%s5283_s9] ss:$0 sm:$0xff] }
 0x485   :  { %v2561_v50 = vmax.f32 %v2559_v44, %v2560_v17 }
 0x486   :  { %v2455_v57 = vadd.f32 %v2454_v55, %v2416_v14 }
 0x487   :  { %v2562_v41 = vrot.slane %v2561_v50, 1 }
 0x488   :  { %v2480_v62 = vmax.f32 %v2455_v57, 0.0 }
 0x489   :  { %v2378_v40 = vpop.f32.mrf.mxu0  ;;  %v2563_v5 = vmax.f32 %v2561_v50, %v2562_v41 }
 0x48a   :  { %v2379_v48 = vadd.f32 %v2378_v40, %v2340_v7  ;;  %v2504_v28 = vmul.f32 %v2480_v62, %v4563_v54 }
 0x48b   :  { %v2588_v38 = vpack.c.bf16 %v2563_v5, %v2563_v5 }
 0x48c   :  { %v2418_v13 = vadd.f32 %v2417_v0, %v2379_v48  ;;  %v2573_v22 = vsel %vm37_vm0, %v2504_v28, -inf }
 0x48d   :  { %v2574_v29 = vmax.f32 %v2572_v59, %v2573_v22  ;;  %v2628_v8 = vunpack.c.l.b16 %v2588_v38 }
 0x48e   :  { %v2457_v37 = vadd.f32 %v2456_v35, %v2418_v13 }
 0x490   :  { %v2482_v11 = vmax.f32 %v2457_v37, 0.0 }
 0x492   :  { %v2506_v42 = vmul.f32 %v2482_v11, %v4577_v30  ;;  %v2626_v30 = vunpack.c.l.b16 %v2586_v60 }
 0x494   :  { %v2575_v54 = vsel %vm37_vm0, %v2506_v42, -inf  ;;  %v2637_v58 = vsel %vm2631_vm3, %v2626_v30, %v2624_v32 }
 0x495   :  { %v2576_v26 = vmax.f32 %v2574_v29, %v2575_v54  ;;  %v2638_v15 = vsel %vm2633_vm4, %v2628_v8, %v2637_v58 }
 0x497   :  { %v2577_v27 = vrot.slane %v2576_v26, 4 }
 0x499   :  { %v2578_v46 = vmax.f32 %v2576_v26, %v2577_v27 }
 0x49b   :  { %v2579_v12 = vrot.slane %v2578_v46, 2 }
 0x49d   :  { %v2580_v4 = vmax.f32 %v2578_v46, %v2579_v12 }
 0x49f   :  { %v2581_v3 = vrot.slane %v2580_v4, 1 }
 0x4a1   :  { %v2582_v52 = vmax.f32 %v2580_v4, %v2581_v3 }
 0x4a3   :  { %v2590_v39 = vpack.c.bf16 %v2582_v52, %v2582_v52 }
 0x4a5   :  { %v2630_v10 = vunpack.c.l.b16 %v2590_v39 }
 0x4a7   :  { %v2639_v21 = vsel %vm2635_vm5, %v2630_v10, %v2638_v15 }
 0x4a8   :  { %v2641_v43 = vpack.c.b16 %v2639_v21, %v2639_v21 }
 0x4aa   :  { %3195 = vmatmul.msk.bf16.vlgmr.msrb.gmra.mxu2 %vm37_vm0, %v2641_v43 }
 0x4cc   :  { %v2715_v25 = vpop.f32.mrf.mxu2 }
 0x4cd   :  { %v2716_v55 = vadd.f32 %v3678_v45, %v2715_v25 }
 0x4d4   :  { %v2717_v47 = vpop.f32.mrf.mxu2 }
 0x52d   :  { %v2728_v2 = vpop.f32.mrf.mxu2 }
 0x52e   :  { %v2729_v14 = vadd.f32 %v2728_v2, %v2716_v55 }
 0x530   :  { %v2732_v24 = vmax.f32 %v2729_v14, 0.0 }
 0x532   :  { %2734 = vst.msk [vmem:[#allocation4] sm:$0xf] %vm2733_vm6, %v2732_v24 }
 0x533   :  { %2745 = dma.vmem_to_hbm [thread:$0]  %s2741_s0, 64, %s2743_s26, [#allocation5]  }
 0x535   :  { %v2730_v20 = vpop.f32.mrf.mxu2 }
 0x536   :  { %3703 = dma.done.wait [#allocation5], 64  }
 0x537   :  { %3704 = vsyncadd [#allocation5], 4294967232 }
 0x538   :  { %2750 = vsyncpa [#allocation5], 1 }

</bundles_post_ra>
